<compile_context>
chip_gen: v7x
topology: tpu7x:2x2x1
jax: 0.10.0
libtpu: 0.0.40
codegen_flags: <defaults>
</compile_context>

<pallas_src>
import functools
import math

import jax
import jax.numpy as jnp
from jax import lax
from jax.experimental import pallas as pl
from jax.experimental.pallas import tpu as pltpu


def _block_kernel(x_ref, w1_ref, b1_ref, w2_ref, b2_ref, o_ref,
                  t1_ref, y1_ref, t2_ref, *, img_w, ow2):
    # x_ref : (Cin, H*W)        one image, row-major flattened (NCHW layout)
    # w1_ref: (Cout, 9*Cin)     taps in (ky, kx, cin) order
    # b1_ref: (Cout, 1)
    # w2_ref: (Cout, 9*Cout)
    # b2_ref: (Cout, 1)
    # o_ref : (Cout, OH2*OW2)   compact flattened NCHW output of the Block
    # t1_ref: (9*Cin, L1)       conv1 im2col scratch, L1 = (H-2)*W - 2
    # y1_ref: (Cout, M1+2)      relu(conv1) intermediate, M1 = (H-2)*W
    # t2_ref: (9*Cout, M2)      conv2 im2col scratch, M2 = (H-4)*W
    cin = x_ref.shape[0]
    cout = o_ref.shape[0]
    l1 = t1_ref.shape[1]
    m2 = t2_ref.shape[1]
    oh2 = o_ref.shape[1] // ow2

    # ---- conv1: build im2col (9 lane-shifted copies stacked on sublanes),
    #      then one GEMM on the MXU; bias + ReLU fused on the VPU. ----
    for k in range(9):
        off = (k // 3) * img_w + (k % 3)
        t1_ref[k * cin:(k + 1) * cin, :] = x_ref[:, off:off + l1]
    y1 = jnp.dot(w1_ref[...], t1_ref[...], preferred_element_type=jnp.float32)
    y1_ref[:, :l1] = jnp.maximum(y1 + b1_ref[...], 0.0)
    # Zero the 4 tail lanes: only wrap-around (garbage) conv2 lanes read them.
    y1_ref[:, l1:] = jnp.zeros((cout, y1_ref.shape[1] - l1), jnp.float32)

    # ---- conv2: same im2col trick on the VMEM-resident intermediate. ----
    for k in range(9):
        off = (k // 3) * img_w + (k % 3)
        t2_ref[k * cout:(k + 1) * cout, :] = y1_ref[:, off:off + m2]
    y2 = jnp.dot(w2_ref[...], t2_ref[...],
                 preferred_element_type=jnp.float32) + b2_ref[...]

    # ---- compact: keep only the valid columns ow < OW2 of each output row
    #      (drops the wrap-around garbage); result is the flattened NCHW map.
    for oh in range(oh2):
        o_ref[:, oh * ow2:(oh + 1) * ow2] = y2[:, oh * img_w:oh * img_w + ow2]


def block_forward(x_flat, w1, b1, w2, b2, h, w):
    """Fused Block: conv2(relu(conv1(x))), both 3x3 valid convs.

    x_flat: (N, Cin, H*W) row-major-flattened NCHW input.
    Returns (N, Cout, H-4, W-4) in NCHW.
    """
    n, cin, hw = x_flat.shape
    assert hw == h * w and h >= 5 and w >= 5
    cout = w1.shape[0]
    oh2, ow2 = h - 4, w - 4
    m1 = (h - 2) * w          # conv1 flattened output length (stride = w)
    l1 = m1 - 2               # conv1 lanes actually computed (stays in bounds)
    m2 = oh2 * w              # conv2 flattened output length (stride = w)
    kern = functools.partial(_block_kernel, img_w=w, ow2=ow2)
    out = pl.pallas_call(
        kern,
        out_shape=jax.ShapeDtypeStruct((n, cout, oh2 * ow2), jnp.float32),
        grid=(n,),
        in_specs=[
            pl.BlockSpec((None, cin, hw), lambda i: (i, 0, 0)),
            pl.BlockSpec((cout, 9 * cin), lambda i: (0, 0)),
            pl.BlockSpec((cout, 1), lambda i: (0, 0)),
            pl.BlockSpec((cout, 9 * cout), lambda i: (0, 0)),
            pl.BlockSpec((cout, 1), lambda i: (0, 0)),
        ],
        out_specs=pl.BlockSpec((None, cout, oh2 * ow2), lambda i: (i, 0, 0)),
        scratch_shapes=[
            pltpu.VMEM((9 * cin, l1), jnp.float32),    # conv1 im2col
            pltpu.VMEM((cout, m1 + 2), jnp.float32),   # relu(conv1) intermediate
            pltpu.VMEM((9 * cout, m2), jnp.float32),   # conv2 im2col
        ],
        compiler_params=pltpu.CompilerParams(dimension_semantics=("parallel",)),
    )(x_flat, w1, b1, w2, b2)
    return out.reshape(n, cout, oh2, ow2)


def maxpool2_nchw(x):
    """nn.MaxPool2d(2) on an NCHW feature map (tiny -> plain jnp glue)."""
    n, c, h, w = x.shape
    ph, pw = h // 2, w // 2
    xr = x[:, :, :2 * ph, :2 * pw].reshape(n, c, ph, 2, pw, 2)
    return jnp.max(xr, axis=(3, 5))


def encoder_forward(x_nchw, params):
    """Equivalent of Encoder.forward: returns the per-stage feature maps (NCHW).

    params[i]: {"w1": (Cout,Cin,3,3), "b1": (Cout,), "w2": (Cout,Cout,3,3),
                "b2": (Cout,)}  -- PyTorch Conv2d layout.
    """
    n, c, h, w = x_nchw.shape
    x = x_nchw.reshape(n, c, h * w)
    ftrs = []
    for p in params:
        cout, cin = p["w1"].shape[0], p["w1"].shape[1]
        # (Cout, Cin, ky, kx) -> (Cout, (ky*3+kx)*Cin + cin) matching the im2col.
        w1 = jnp.transpose(p["w1"], (0, 2, 3, 1)).reshape(cout, 9 * cin)
        w2 = jnp.transpose(p["w2"], (0, 2, 3, 1)).reshape(cout, 9 * cout)
        b1 = p["b1"].reshape(cout, 1)
        b2 = p["b2"].reshape(cout, 1)
        ftr = block_forward(x, w1, b1, w2, b2, h, w)   # (N, Cout, H-4, W-4)
        ftrs.append(ftr)
        pooled = maxpool2_nchw(ftr)   # pooled after last block is unused (as in torch)
        n, c, h, w = pooled.shape
        x = pooled.reshape(n, c, h * w)
    return tuple(ftrs)


def encoder_reference(x, params):
    """Pure-JAX reference (lax.conv / reduce_window), default MXU precision."""
    dn = ("NCHW", "OIHW", "NCHW")
    ftrs = []
    for p in params:
        x = lax.conv_general_dilated(x, p["w1"], (1, 1), "VALID",
                                     dimension_numbers=dn)
        x = jnp.maximum(x + p["b1"][None, :, None, None], 0.0)
        x = lax.conv_general_dilated(x, p["w2"], (1, 1), "VALID",
                                     dimension_numbers=dn)
        x = x + p["b2"][None, :, None, None]
        ftrs.append(x)
        x = lax.reduce_window(x, -jnp.inf, lax.max,
                              (1, 1, 2, 2), (1, 1, 2, 2), "VALID")
    return tuple(ftrs)


if __name__ == "__main__":
    # Small, deterministic configuration consistent with the module:
    # chs=(3, 8, 16, 32) -> 3 encoder Blocks; input 2 x 3 x 36 x 36 (NCHW).
    key = jax.random.PRNGKey(0)
    chs = (3, 8, 16, 32)
    params = []
    for i in range(len(chs) - 1):
        cin, cout = chs[i], chs[i + 1]
        key, k1, k2, k3, k4 = jax.random.split(key, 5)
        params.append({
            "w1": jax.random.normal(k1, (cout, cin, 3, 3), jnp.float32) / math.sqrt(9 * cin),
            "b1": 0.05 * jax.random.normal(k2, (cout,), jnp.float32),
            "w2": jax.random.normal(k3, (cout, cout, 3, 3), jnp.float32) / math.sqrt(9 * cout),
            "b2": 0.05 * jax.random.normal(k4, (cout,), jnp.float32),
        })
    key, kx = jax.random.split(key)
    x = jax.random.normal(kx, (2, 3, 36, 36), jnp.float32)  # NCHW, like PyTorch

    ftrs = jax.block_until_ready(jax.jit(encoder_forward)(x, params))
    refs = jax.block_until_ready(encoder_reference(x, params))

    expected_shapes = [(2, 8, 32, 32), (2, 16, 12, 12), (2, 32, 2, 2)]
    assert len(ftrs) == len(expected_shapes)
    for f, r, s in zip(ftrs, refs, expected_shapes):
        assert f.shape == s, (f.shape, s)
        err = float(jnp.max(jnp.abs(f - r)))
        # Both paths run at default (bf16-pass) MXU precision; tolerance set
        # accordingly.
        assert jnp.allclose(f, r, atol=5e-2, rtol=5e-2), err
    print("KERNEL_OK")
</pallas_src>

<mosaic_0001>
module attributes {stable_mosaic.version = 11 : i64} {
  func.func @_block_kernel(%arg0: i32, %arg1: memref<1x3x1296xf32, #tpu.memory_space<vmem>>, %arg2: memref<8x27xf32, #tpu.memory_space<vmem>>, %arg3: memref<8x1xf32, #tpu.memory_space<vmem>>, %arg4: memref<8x72xf32, #tpu.memory_space<vmem>>, %arg5: memref<8x1xf32, #tpu.memory_space<vmem>>, %arg6: memref<1x8x1024xf32, #tpu.memory_space<vmem>>, %arg7: memref<27x1222xf32, #tpu.memory_space<vmem>>, %arg8: memref<8x1226xf32, #tpu.memory_space<vmem>>, %arg9: memref<72x1152xf32, #tpu.memory_space<vmem>>) attributes {dimension_semantics = [#tpu.dimension_semantics<parallel>], iteration_bounds = array<i64: 2>, scalar_prefetch = 0 : i64, scratch_operands = 3 : i64, tpu.core_type = #tpu.core_type<tc>, window_params = [{transform_indices = @transform_0, window_bounds = array<i64: 1, 3, 1296>}, {pipeline_mode = #tpu.pipeline_mode<synchronous>, transform_indices = @transform_1, window_bounds = array<i64: 8, 27>}, {pipeline_mode = #tpu.pipeline_mode<synchronous>, transform_indices = @transform_2, window_bounds = array<i64: 8, 1>}, {pipeline_mode = #tpu.pipeline_mode<synchronous>, transform_indices = @transform_3, window_bounds = array<i64: 8, 72>}, {pipeline_mode = #tpu.pipeline_mode<synchronous>, transform_indices = @transform_4, window_bounds = array<i64: 8, 1>}, {transform_indices = @transform_5, window_bounds = array<i64: 1, 8, 1024>}]} {
    %c0 = arith.constant 0 : index
    %c0_0 = arith.constant 0 : index
    %c0_1 = arith.constant 0 : index
    %0 = vector.load %arg1[%c0, %c0_0, %c0_1] : memref<1x3x1296xf32, #tpu.memory_space<vmem>>, vector<1x3x1222xf32>
    %1 = vector.shape_cast %0 : vector<1x3x1222xf32> to vector<3x1222xf32>
    %c0_2 = arith.constant 0 : index
    %c0_3 = arith.constant 0 : index
    %2 = vector.load %arg7[%c0_2, %c0_3] : memref<27x1222xf32, #tpu.memory_space<vmem>>, vector<3x1222xf32>
    tpu.vector_store %arg7[%c0_2, %c0_3], %1 {strides = array<i32>} : memref<27x1222xf32, #tpu.memory_space<vmem>>, vector<3x1222xf32>,
    %c0_4 = arith.constant 0 : index
    %c0_5 = arith.constant 0 : index
    %c1 = arith.constant 1 : index
    %3 = vector.load %arg1[%c0_4, %c0_5, %c1] : memref<1x3x1296xf32, #tpu.memory_space<vmem>>, vector<1x3x1222xf32>
    %4 = vector.shape_cast %3 : vector<1x3x1222xf32> to vector<3x1222xf32>
    %c3 = arith.constant 3 : index
    %c0_6 = arith.constant 0 : index
    %5 = vector.load %arg7[%c3, %c0_6] : memref<27x1222xf32, #tpu.memory_space<vmem>>, vector<3x1222xf32>
    tpu.vector_store %arg7[%c3, %c0_6], %4 {strides = array<i32>} : memref<27x1222xf32, #tpu.memory_space<vmem>>, vector<3x1222xf32>,
    %c0_7 = arith.constant 0 : index
    %c0_8 = arith.constant 0 : index
    %c2 = arith.constant 2 : index
    %6 = vector.load %arg1[%c0_7, %c0_8, %c2] : memref<1x3x1296xf32, #tpu.memory_space<vmem>>, vector<1x3x1222xf32>
    %7 = vector.shape_cast %6 : vector<1x3x1222xf32> to vector<3x1222xf32>
    %c6 = arith.constant 6 : index
    %c0_9 = arith.constant 0 : index
    %8 = vector.load %arg7[%c6, %c0_9] : memref<27x1222xf32, #tpu.memory_space<vmem>>, vector<3x1222xf32>
    tpu.vector_store %arg7[%c6, %c0_9], %7 {strides = array<i32>} : memref<27x1222xf32, #tpu.memory_space<vmem>>, vector<3x1222xf32>,
    %c0_10 = arith.constant 0 : index
    %c0_11 = arith.constant 0 : index
    %c36 = arith.constant 36 : index
    %9 = vector.load %arg1[%c0_10, %c0_11, %c36] : memref<1x3x1296xf32, #tpu.memory_space<vmem>>, vector<1x3x1222xf32>
    %10 = vector.shape_cast %9 : vector<1x3x1222xf32> to vector<3x1222xf32>
    %c9 = arith.constant 9 : index
    %c0_12 = arith.constant 0 : index
    %11 = vector.load %arg7[%c9, %c0_12] : memref<27x1222xf32, #tpu.memory_space<vmem>>, vector<3x1222xf32>
    tpu.vector_store %arg7[%c9, %c0_12], %10 {strides = array<i32>} : memref<27x1222xf32, #tpu.memory_space<vmem>>, vector<3x1222xf32>,
    %c0_13 = arith.constant 0 : index
    %c0_14 = arith.constant 0 : index
    %c37 = arith.constant 37 : index
    %12 = vector.load %arg1[%c0_13, %c0_14, %c37] : memref<1x3x1296xf32, #tpu.memory_space<vmem>>, vector<1x3x1222xf32>
    %13 = vector.shape_cast %12 : vector<1x3x1222xf32> to vector<3x1222xf32>
    %c12 = arith.constant 12 : index
    %c0_15 = arith.constant 0 : index
    %14 = vector.load %arg7[%c12, %c0_15] : memref<27x1222xf32, #tpu.memory_space<vmem>>, vector<3x1222xf32>
    tpu.vector_store %arg7[%c12, %c0_15], %13 {strides = array<i32>} : memref<27x1222xf32, #tpu.memory_space<vmem>>, vector<3x1222xf32>,
    %c0_16 = arith.constant 0 : index
    %c0_17 = arith.constant 0 : index
    %c38 = arith.constant 38 : index
    %15 = vector.load %arg1[%c0_16, %c0_17, %c38] : memref<1x3x1296xf32, #tpu.memory_space<vmem>>, vector<1x3x1222xf32>
    %16 = vector.shape_cast %15 : vector<1x3x1222xf32> to vector<3x1222xf32>
    %c15 = arith.constant 15 : index
    %c0_18 = arith.constant 0 : index
    %17 = vector.load %arg7[%c15, %c0_18] : memref<27x1222xf32, #tpu.memory_space<vmem>>, vector<3x1222xf32>
    tpu.vector_store %arg7[%c15, %c0_18], %16 {strides = array<i32>} : memref<27x1222xf32, #tpu.memory_space<vmem>>, vector<3x1222xf32>,
    %c0_19 = arith.constant 0 : index
    %c0_20 = arith.constant 0 : index
    %c72 = arith.constant 72 : index
    %18 = vector.load %arg1[%c0_19, %c0_20, %c72] : memref<1x3x1296xf32, #tpu.memory_space<vmem>>, vector<1x3x1222xf32>
    %19 = vector.shape_cast %18 : vector<1x3x1222xf32> to vector<3x1222xf32>
    %c18 = arith.constant 18 : index
    %c0_21 = arith.constant 0 : index
    %20 = vector.load %arg7[%c18, %c0_21] : memref<27x1222xf32, #tpu.memory_space<vmem>>, vector<3x1222xf32>
    tpu.vector_store %arg7[%c18, %c0_21], %19 {strides = array<i32>} : memref<27x1222xf32, #tpu.memory_space<vmem>>, vector<3x1222xf32>,
    %c0_22 = arith.constant 0 : index
    %c0_23 = arith.constant 0 : index
    %c73 = arith.constant 73 : index
    %21 = vector.load %arg1[%c0_22, %c0_23, %c73] : memref<1x3x1296xf32, #tpu.memory_space<vmem>>, vector<1x3x1222xf32>
    %22 = vector.shape_cast %21 : vector<1x3x1222xf32> to vector<3x1222xf32>
    %c21 = arith.constant 21 : index
    %c0_24 = arith.constant 0 : index
    %23 = vector.load %arg7[%c21, %c0_24] : memref<27x1222xf32, #tpu.memory_space<vmem>>, vector<3x1222xf32>
    tpu.vector_store %arg7[%c21, %c0_24], %22 {strides = array<i32>} : memref<27x1222xf32, #tpu.memory_space<vmem>>, vector<3x1222xf32>,
    %c0_25 = arith.constant 0 : index
    %c0_26 = arith.constant 0 : index
    %c74 = arith.constant 74 : index
    %24 = vector.load %arg1[%c0_25, %c0_26, %c74] : memref<1x3x1296xf32, #tpu.memory_space<vmem>>, vector<1x3x1222xf32>
    %25 = vector.shape_cast %24 : vector<1x3x1222xf32> to vector<3x1222xf32>
    %c24 = arith.constant 24 : index
    %c0_27 = arith.constant 0 : index
    %26 = vector.load %arg7[%c24, %c0_27] : memref<27x1222xf32, #tpu.memory_space<vmem>>, vector<3x1222xf32>
    tpu.vector_store %arg7[%c24, %c0_27], %25 {strides = array<i32>} : memref<27x1222xf32, #tpu.memory_space<vmem>>, vector<3x1222xf32>,
    %c0_28 = arith.constant 0 : index
    %c0_29 = arith.constant 0 : index
    %27 = vector.load %arg2[%c0_28, %c0_29] : memref<8x27xf32, #tpu.memory_space<vmem>>, vector<8x27xf32>
    %c0_30 = arith.constant 0 : index
    %c0_31 = arith.constant 0 : index
    %28 = vector.load %arg7[%c0_30, %c0_31] : memref<27x1222xf32, #tpu.memory_space<vmem>>, vector<27x1222xf32>
    %cst = arith.constant dense<0.000000e+00> : vector<8x1222xf32>
    %29 = tpu.matmul %27, %28, %cst {dimension_numbers = #tpu.dot_dimension_numbers<[1], [0], [0], [1], [0, 0, 1, 1], [], []>} : vector<8x27xf32>, vector<27x1222xf32>, vector<8x1222xf32> -> vector<8x1222xf32>
    %c0_32 = arith.constant 0 : index
    %c0_33 = arith.constant 0 : index
    %30 = vector.load %arg3[%c0_32, %c0_33] : memref<8x1xf32, #tpu.memory_space<vmem>>, vector<8x1xf32>
    %31 = vector.broadcast %30 : vector<8x1xf32> to vector<8x1222xf32>
    %32 = arith.addf %29, %31 : vector<8x1222xf32>
    %cst_34 = arith.constant 0.000000e+00 : f32
    %33 = vector.broadcast %cst_34 : f32 to vector<8x1222xf32>
    %34 = arith.maximumf %32, %33 : vector<8x1222xf32>
    %c0_35 = arith.constant 0 : index
    %c0_36 = arith.constant 0 : index
    %35 = vector.load %arg8[%c0_35, %c0_36] : memref<8x1226xf32, #tpu.memory_space<vmem>>, vector<8x1222xf32>
    tpu.vector_store %arg8[%c0_35, %c0_36], %34 {strides = array<i32>} : memref<8x1226xf32, #tpu.memory_space<vmem>>, vector<8x1222xf32>,
    %cst_37 = arith.constant 0.000000e+00 : f32
    %36 = vector.broadcast %cst_37 : f32 to vector<8x4xf32>
    %c0_38 = arith.constant 0 : index
    %c1222 = arith.constant 1222 : index
    %37 = vector.load %arg8[%c0_38, %c1222] : memref<8x1226xf32, #tpu.memory_space<vmem>>, vector<8x4xf32>
    tpu.vector_store %arg8[%c0_38, %c1222], %36 {strides = array<i32>} : memref<8x1226xf32, #tpu.memory_space<vmem>>, vector<8x4xf32>,
    %c0_39 = arith.constant 0 : index
    %c0_40 = arith.constant 0 : index
    %38 = vector.load %arg8[%c0_39, %c0_40] : memref<8x1226xf32, #tpu.memory_space<vmem>>, vector<8x1152xf32>
    %c0_41 = arith.constant 0 : index
    %c0_42 = arith.constant 0 : index
    %39 = vector.load %arg9[%c0_41, %c0_42] : memref<72x1152xf32, #tpu.memory_space<vmem>>, vector<8x1152xf32>
    tpu.vector_store %arg9[%c0_41, %c0_42], %38 {strides = array<i32>} : memref<72x1152xf32, #tpu.memory_space<vmem>>, vector<8x1152xf32>,
    %c0_43 = arith.constant 0 : index
    %c1_44 = arith.constant 1 : index
    %40 = vector.load %arg8[%c0_43, %c1_44] : memref<8x1226xf32, #tpu.memory_space<vmem>>, vector<8x1152xf32>
    %c8 = arith.constant 8 : index
    %c0_45 = arith.constant 0 : index
    %41 = vector.load %arg9[%c8, %c0_45] : memref<72x1152xf32, #tpu.memory_space<vmem>>, vector<8x1152xf32>
    tpu.vector_store %arg9[%c8, %c0_45], %40 {strides = array<i32>} : memref<72x1152xf32, #tpu.memory_space<vmem>>, vector<8x1152xf32>,
    %c0_46 = arith.constant 0 : index
    %c2_47 = arith.constant 2 : index
    %42 = vector.load %arg8[%c0_46, %c2_47] : memref<8x1226xf32, #tpu.memory_space<vmem>>, vector<8x1152xf32>
    %c16 = arith.constant 16 : index
    %c0_48 = arith.constant 0 : index
    %43 = vector.load %arg9[%c16, %c0_48] : memref<72x1152xf32, #tpu.memory_space<vmem>>, vector<8x1152xf32>
    tpu.vector_store %arg9[%c16, %c0_48], %42 {strides = array<i32>} : memref<72x1152xf32, #tpu.memory_space<vmem>>, vector<8x1152xf32>,
    %c0_49 = arith.constant 0 : index
    %c36_50 = arith.constant 36 : index
    %44 = vector.load %arg8[%c0_49, %c36_50] : memref<8x1226xf32, #tpu.memory_space<vmem>>, vector<8x1152xf32>
    %c24_51 = arith.constant 24 : index
    %c0_52 = arith.constant 0 : index
    %45 = vector.load %arg9[%c24_51, %c0_52] : memref<72x1152xf32, #tpu.memory_space<vmem>>, vector<8x1152xf32>
    tpu.vector_store %arg9[%c24_51, %c0_52], %44 {strides = array<i32>} : memref<72x1152xf32, #tpu.memory_space<vmem>>, vector<8x1152xf32>,
    %c0_53 = arith.constant 0 : index
    %c37_54 = arith.constant 37 : index
    %46 = vector.load %arg8[%c0_53, %c37_54] : memref<8x1226xf32, #tpu.memory_space<vmem>>, vector<8x1152xf32>
    %c32 = arith.constant 32 : index
    %c0_55 = arith.constant 0 : index
    %47 = vector.load %arg9[%c32, %c0_55] : memref<72x1152xf32, #tpu.memory_space<vmem>>, vector<8x1152xf32>
    tpu.vector_store %arg9[%c32, %c0_55], %46 {strides = array<i32>} : memref<72x1152xf32, #tpu.memory_space<vmem>>, vector<8x1152xf32>,
    %c0_56 = arith.constant 0 : index
    %c38_57 = arith.constant 38 : index
    %48 = vector.load %arg8[%c0_56, %c38_57] : memref<8x1226xf32, #tpu.memory_space<vmem>>, vector<8x1152xf32>
    %c40 = arith.constant 40 : index
    %c0_58 = arith.constant 0 : index
    %49 = vector.load %arg9[%c40, %c0_58] : memref<72x1152xf32, #tpu.memory_space<vmem>>, vector<8x1152xf32>
    tpu.vector_store %arg9[%c40, %c0_58], %48 {strides = array<i32>} : memref<72x1152xf32, #tpu.memory_space<vmem>>, vector<8x1152xf32>,
    %c0_59 = arith.constant 0 : index
    %c72_60 = arith.constant 72 : index
    %50 = vector.load %arg8[%c0_59, %c72_60] : memref<8x1226xf32, #tpu.memory_space<vmem>>, vector<8x1152xf32>
    %c48 = arith.constant 48 : index
    %c0_61 = arith.constant 0 : index
    %51 = vector.load %arg9[%c48, %c0_61] : memref<72x1152xf32, #tpu.memory_space<vmem>>, vector<8x1152xf32>
    tpu.vector_store %arg9[%c48, %c0_61], %50 {strides = array<i32>} : memref<72x1152xf32, #tpu.memory_space<vmem>>, vector<8x1152xf32>,
    %c0_62 = arith.constant 0 : index
    %c73_63 = arith.constant 73 : index
    %52 = vector.load %arg8[%c0_62, %c73_63] : memref<8x1226xf32, #tpu.memory_space<vmem>>, vector<8x1152xf32>
    %c56 = arith.constant 56 : index
    %c0_64 = arith.constant 0 : index
    %53 = vector.load %arg9[%c56, %c0_64] : memref<72x1152xf32, #tpu.memory_space<vmem>>, vector<8x1152xf32>
    tpu.vector_store %arg9[%c56, %c0_64], %52 {strides = array<i32>} : memref<72x1152xf32, #tpu.memory_space<vmem>>, vector<8x1152xf32>,
    %c0_65 = arith.constant 0 : index
    %c74_66 = arith.constant 74 : index
    %54 = vector.load %arg8[%c0_65, %c74_66] : memref<8x1226xf32, #tpu.memory_space<vmem>>, vector<8x1152xf32>
    %c64 = arith.constant 64 : index
    %c0_67 = arith.constant 0 : index
    %55 = vector.load %arg9[%c64, %c0_67] : memref<72x1152xf32, #tpu.memory_space<vmem>>, vector<8x1152xf32>
    tpu.vector_store %arg9[%c64, %c0_67], %54 {strides = array<i32>} : memref<72x1152xf32, #tpu.memory_space<vmem>>, vector<8x1152xf32>,
    %c0_68 = arith.constant 0 : index
    %c0_69 = arith.constant 0 : index
    %56 = vector.load %arg4[%c0_68, %c0_69] : memref<8x72xf32, #tpu.memory_space<vmem>>, vector<8x72xf32>
    %c0_70 = arith.constant 0 : index
    %c0_71 = arith.constant 0 : index
    %57 = vector.load %arg9[%c0_70, %c0_71] : memref<72x1152xf32, #tpu.memory_space<vmem>>, vector<72x1152xf32>
    %cst_72 = arith.constant dense<0.000000e+00> : vector<8x1152xf32>
    %58 = tpu.matmul %56, %57, %cst_72 {dimension_numbers = #tpu.dot_dimension_numbers<[1], [0], [0], [1], [0, 0, 1, 1], [], []>} : vector<8x72xf32>, vector<72x1152xf32>, vector<8x1152xf32> -> vector<8x1152xf32>
    %c0_73 = arith.constant 0 : index
    %c0_74 = arith.constant 0 : index
    %59 = vector.load %arg5[%c0_73, %c0_74] : memref<8x1xf32, #tpu.memory_space<vmem>>, vector<8x1xf32>
    %60 = vector.broadcast %59 : vector<8x1xf32> to vector<8x1152xf32>
    %61 = arith.addf %58, %60 : vector<8x1152xf32>
    %62 = vector.extract_strided_slice %61 {offsets = [0, 0], sizes = [8, 32], strides = [1, 1]} : vector<8x1152xf32> to vector<8x32xf32>
    %c0_75 = arith.constant 0 : index
    %c0_76 = arith.constant 0 : index
    %c0_77 = arith.constant 0 : index
    %63 = vector.load %arg6[%c0_75, %c0_76, %c0_77] : memref<1x8x1024xf32, #tpu.memory_space<vmem>>, vector<1x8x32xf32>
    %64 = vector.shape_cast %63 : vector<1x8x32xf32> to vector<8x32xf32>
    %65 = vector.shape_cast %62 : vector<8x32xf32> to vector<1x8x32xf32>
    tpu.vector_store %arg6[%c0_75, %c0_76, %c0_77], %65 {strides = array<i32>} : memref<1x8x1024xf32, #tpu.memory_space<vmem>>, vector<1x8x32xf32>,
    %66 = vector.extract_strided_slice %61 {offsets = [0, 36], sizes = [8, 32], strides = [1, 1]} : vector<8x1152xf32> to vector<8x32xf32>
    %c0_78 = arith.constant 0 : index
    %c0_79 = arith.constant 0 : index
    %c32_80 = arith.constant 32 : index
    %67 = vector.load %arg6[%c0_78, %c0_79, %c32_80] : memref<1x8x1024xf32, #tpu.memory_space<vmem>>, vector<1x8x32xf32>
    %68 = vector.shape_cast %67 : vector<1x8x32xf32> to vector<8x32xf32>
    %69 = vector.shape_cast %66 : vector<8x32xf32> to vector<1x8x32xf32>
    tpu.vector_store %arg6[%c0_78, %c0_79, %c32_80], %69 {strides = array<i32>} : memref<1x8x1024xf32, #tpu.memory_space<vmem>>, vector<1x8x32xf32>,
    %70 = vector.extract_strided_slice %61 {offsets = [0, 72], sizes = [8, 32], strides = [1, 1]} : vector<8x1152xf32> to vector<8x32xf32>
    %c0_81 = arith.constant 0 : index
    %c0_82 = arith.constant 0 : index
    %c64_83 = arith.constant 64 : index
    %71 = vector.load %arg6[%c0_81, %c0_82, %c64_83] : memref<1x8x1024xf32, #tpu.memory_space<vmem>>, vector<1x8x32xf32>
    %72 = vector.shape_cast %71 : vector<1x8x32xf32> to vector<8x32xf32>
    %73 = vector.shape_cast %70 : vector<8x32xf32> to vector<1x8x32xf32>
    tpu.vector_store %arg6[%c0_81, %c0_82, %c64_83], %73 {strides = array<i32>} : memref<1x8x1024xf32, #tpu.memory_space<vmem>>, vector<1x8x32xf32>,
    %74 = vector.extract_strided_slice %61 {offsets = [0, 108], sizes = [8, 32], strides = [1, 1]} : vector<8x1152xf32> to vector<8x32xf32>
    %c0_84 = arith.constant 0 : index
    %c0_85 = arith.constant 0 : index
    %c96 = arith.constant 96 : index
    %75 = vector.load %arg6[%c0_84, %c0_85, %c96] : memref<1x8x1024xf32, #tpu.memory_space<vmem>>, vector<1x8x32xf32>
    %76 = vector.shape_cast %75 : vector<1x8x32xf32> to vector<8x32xf32>
    %77 = vector.shape_cast %74 : vector<8x32xf32> to vector<1x8x32xf32>
    tpu.vector_store %arg6[%c0_84, %c0_85, %c96], %77 {strides = array<i32>} : memref<1x8x1024xf32, #tpu.memory_space<vmem>>, vector<1x8x32xf32>,
    %78 = vector.extract_strided_slice %61 {offsets = [0, 144], sizes = [8, 32], strides = [1, 1]} : vector<8x1152xf32> to vector<8x32xf32>
    %c0_86 = arith.constant 0 : index
    %c0_87 = arith.constant 0 : index
    %c128 = arith.constant 128 : index
    %79 = vector.load %arg6[%c0_86, %c0_87, %c128] : memref<1x8x1024xf32, #tpu.memory_space<vmem>>, vector<1x8x32xf32>
    %80 = vector.shape_cast %79 : vector<1x8x32xf32> to vector<8x32xf32>
    %81 = vector.shape_cast %78 : vector<8x32xf32> to vector<1x8x32xf32>
    tpu.vector_store %arg6[%c0_86, %c0_87, %c128], %81 {strides = array<i32>} : memref<1x8x1024xf32, #tpu.memory_space<vmem>>, vector<1x8x32xf32>,
    %82 = vector.extract_strided_slice %61 {offsets = [0, 180], sizes = [8, 32], strides = [1, 1]} : vector<8x1152xf32> to vector<8x32xf32>
    %c0_88 = arith.constant 0 : index
    %c0_89 = arith.constant 0 : index
    %c160 = arith.constant 160 : index
    %83 = vector.load %arg6[%c0_88, %c0_89, %c160] : memref<1x8x1024xf32, #tpu.memory_space<vmem>>, vector<1x8x32xf32>
    %84 = vector.shape_cast %83 : vector<1x8x32xf32> to vector<8x32xf32>
    %85 = vector.shape_cast %82 : vector<8x32xf32> to vector<1x8x32xf32>
    tpu.vector_store %arg6[%c0_88, %c0_89, %c160], %85 {strides = array<i32>} : memref<1x8x1024xf32, #tpu.memory_space<vmem>>, vector<1x8x32xf32>,
    %86 = vector.extract_strided_slice %61 {offsets = [0, 216], sizes = [8, 32], strides = [1, 1]} : vector<8x1152xf32> to vector<8x32xf32>
    %c0_90 = arith.constant 0 : index
    %c0_91 = arith.constant 0 : index
    %c192 = arith.constant 192 : index
    %87 = vector.load %arg6[%c0_90, %c0_91, %c192] : memref<1x8x1024xf32, #tpu.memory_space<vmem>>, vector<1x8x32xf32>
    %88 = vector.shape_cast %87 : vector<1x8x32xf32> to vector<8x32xf32>
    %89 = vector.shape_cast %86 : vector<8x32xf32> to vector<1x8x32xf32>
    tpu.vector_store %arg6[%c0_90, %c0_91, %c192], %89 {strides = array<i32>} : memref<1x8x1024xf32, #tpu.memory_space<vmem>>, vector<1x8x32xf32>,
    %90 = vector.extract_strided_slice %61 {offsets = [0, 252], sizes = [8, 32], strides = [1, 1]} : vector<8x1152xf32> to vector<8x32xf32>
    %c0_92 = arith.constant 0 : index
    %c0_93 = arith.constant 0 : index
    %c224 = arith.constant 224 : index
    %91 = vector.load %arg6[%c0_92, %c0_93, %c224] : memref<1x8x1024xf32, #tpu.memory_space<vmem>>, vector<1x8x32xf32>
    %92 = vector.shape_cast %91 : vector<1x8x32xf32> to vector<8x32xf32>
    %93 = vector.shape_cast %90 : vector<8x32xf32> to vector<1x8x32xf32>
    tpu.vector_store %arg6[%c0_92, %c0_93, %c224], %93 {strides = array<i32>} : memref<1x8x1024xf32, #tpu.memory_space<vmem>>, vector<1x8x32xf32>,
    %94 = vector.extract_strided_slice %61 {offsets = [0, 288], sizes = [8, 32], strides = [1, 1]} : vector<8x1152xf32> to vector<8x32xf32>
    %c0_94 = arith.constant 0 : index
    %c0_95 = arith.constant 0 : index
    %c256 = arith.constant 256 : index
    %95 = vector.load %arg6[%c0_94, %c0_95, %c256] : memref<1x8x1024xf32, #tpu.memory_space<vmem>>, vector<1x8x32xf32>
    %96 = vector.shape_cast %95 : vector<1x8x32xf32> to vector<8x32xf32>
    %97 = vector.shape_cast %94 : vector<8x32xf32> to vector<1x8x32xf32>
    tpu.vector_store %arg6[%c0_94, %c0_95, %c256], %97 {strides = array<i32>} : memref<1x8x1024xf32, #tpu.memory_space<vmem>>, vector<1x8x32xf32>,
    %98 = vector.extract_strided_slice %61 {offsets = [0, 324], sizes = [8, 32], strides = [1, 1]} : vector<8x1152xf32> to vector<8x32xf32>
    %c0_96 = arith.constant 0 : index
    %c0_97 = arith.constant 0 : index
    %c288 = arith.constant 288 : index
    %99 = vector.load %arg6[%c0_96, %c0_97, %c288] : memref<1x8x1024xf32, #tpu.memory_space<vmem>>, vector<1x8x32xf32>
    %100 = vector.shape_cast %99 : vector<1x8x32xf32> to vector<8x32xf32>
    %101 = vector.shape_cast %98 : vector<8x32xf32> to vector<1x8x32xf32>
    tpu.vector_store %arg6[%c0_96, %c0_97, %c288], %101 {strides = array<i32>} : memref<1x8x1024xf32, #tpu.memory_space<vmem>>, vector<1x8x32xf32>,
    %102 = vector.extract_strided_slice %61 {offsets = [0, 360], sizes = [8, 32], strides = [1, 1]} : vector<8x1152xf32> to vector<8x32xf32>
    %c0_98 = arith.constant 0 : index
    %c0_99 = arith.constant 0 : index
    %c320 = arith.constant 320 : index
    %103 = vector.load %arg6[%c0_98, %c0_99, %c320] : memref<1x8x1024xf32, #tpu.memory_space<vmem>>, vector<1x8x32xf32>
    %104 = vector.shape_cast %103 : vector<1x8x32xf32> to vector<8x32xf32>
    %105 = vector.shape_cast %102 : vector<8x32xf32> to vector<1x8x32xf32>
    tpu.vector_store %arg6[%c0_98, %c0_99, %c320], %105 {strides = array<i32>} : memref<1x8x1024xf32, #tpu.memory_space<vmem>>, vector<1x8x32xf32>,
    %106 = vector.extract_strided_slice %61 {offsets = [0, 396], sizes = [8, 32], strides = [1, 1]} : vector<8x1152xf32> to vector<8x32xf32>
    %c0_100 = arith.constant 0 : index
    %c0_101 = arith.constant 0 : index
    %c352 = arith.constant 352 : index
    %107 = vector.load %arg6[%c0_100, %c0_101, %c352] : memref<1x8x1024xf32, #tpu.memory_space<vmem>>, vector<1x8x32xf32>
    %108 = vector.shape_cast %107 : vector<1x8x32xf32> to vector<8x32xf32>
    %109 = vector.shape_cast %106 : vector<8x32xf32> to vector<1x8x32xf32>
    tpu.vector_store %arg6[%c0_100, %c0_101, %c352], %109 {strides = array<i32>} : memref<1x8x1024xf32, #tpu.memory_space<vmem>>, vector<1x8x32xf32>,
    %110 = vector.extract_strided_slice %61 {offsets = [0, 432], sizes = [8, 32], strides = [1, 1]} : vector<8x1152xf32> to vector<8x32xf32>
    %c0_102 = arith.constant 0 : index
    %c0_103 = arith.constant 0 : index
    %c384 = arith.constant 384 : index
    %111 = vector.load %arg6[%c0_102, %c0_103, %c384] : memref<1x8x1024xf32, #tpu.memory_space<vmem>>, vector<1x8x32xf32>
    %112 = vector.shape_cast %111 : vector<1x8x32xf32> to vector<8x32xf32>
    %113 = vector.shape_cast %110 : vector<8x32xf32> to vector<1x8x32xf32>
    tpu.vector_store %arg6[%c0_102, %c0_103, %c384], %113 {strides = array<i32>} : memref<1x8x1024xf32, #tpu.memory_space<vmem>>, vector<1x8x32xf32>,
    %114 = vector.extract_strided_slice %61 {offsets = [0, 468], sizes = [8, 32], strides = [1, 1]} : vector<8x1152xf32> to vector<8x32xf32>
    %c0_104 = arith.constant 0 : index
    %c0_105 = arith.constant 0 : index
    %c416 = arith.constant 416 : index
    %115 = vector.load %arg6[%c0_104, %c0_105, %c416] : memref<1x8x1024xf32, #tpu.memory_space<vmem>>, vector<1x8x32xf32>
    %116 = vector.shape_cast %115 : vector<1x8x32xf32> to vector<8x32xf32>
    %117 = vector.shape_cast %114 : vector<8x32xf32> to vector<1x8x32xf32>
    tpu.vector_store %arg6[%c0_104, %c0_105, %c416], %117 {strides = array<i32>} : memref<1x8x1024xf32, #tpu.memory_space<vmem>>, vector<1x8x32xf32>,
    %118 = vector.extract_strided_slice %61 {offsets = [0, 504], sizes = [8, 32], strides = [1, 1]} : vector<8x1152xf32> to vector<8x32xf32>
    %c0_106 = arith.constant 0 : index
    %c0_107 = arith.constant 0 : index
    %c448 = arith.constant 448 : index
    %119 = vector.load %arg6[%c0_106, %c0_107, %c448] : memref<1x8x1024xf32, #tpu.memory_space<vmem>>, vector<1x8x32xf32>
    %120 = vector.shape_cast %119 : vector<1x8x32xf32> to vector<8x32xf32>
    %121 = vector.shape_cast %118 : vector<8x32xf32> to vector<1x8x32xf32>
    tpu.vector_store %arg6[%c0_106, %c0_107, %c448], %121 {strides = array<i32>} : memref<1x8x1024xf32, #tpu.memory_space<vmem>>, vector<1x8x32xf32>,
    %122 = vector.extract_strided_slice %61 {offsets = [0, 540], sizes = [8, 32], strides = [1, 1]} : vector<8x1152xf32> to vector<8x32xf32>
    %c0_108 = arith.constant 0 : index
    %c0_109 = arith.constant 0 : index
    %c480 = arith.constant 480 : index
    %123 = vector.load %arg6[%c0_108, %c0_109, %c480] : memref<1x8x1024xf32, #tpu.memory_space<vmem>>, vector<1x8x32xf32>
    %124 = vector.shape_cast %123 : vector<1x8x32xf32> to vector<8x32xf32>
    %125 = vector.shape_cast %122 : vector<8x32xf32> to vector<1x8x32xf32>
    tpu.vector_store %arg6[%c0_108, %c0_109, %c480], %125 {strides = array<i32>} : memref<1x8x1024xf32, #tpu.memory_space<vmem>>, vector<1x8x32xf32>,
    %126 = vector.extract_strided_slice %61 {offsets = [0, 576], sizes = [8, 32], strides = [1, 1]} : vector<8x1152xf32> to vector<8x32xf32>
    %c0_110 = arith.constant 0 : index
    %c0_111 = arith.constant 0 : index
    %c512 = arith.constant 512 : index
    %127 = vector.load %arg6[%c0_110, %c0_111, %c512] : memref<1x8x1024xf32, #tpu.memory_space<vmem>>, vector<1x8x32xf32>
    %128 = vector.shape_cast %127 : vector<1x8x32xf32> to vector<8x32xf32>
    %129 = vector.shape_cast %126 : vector<8x32xf32> to vector<1x8x32xf32>
    tpu.vector_store %arg6[%c0_110, %c0_111, %c512], %129 {strides = array<i32>} : memref<1x8x1024xf32, #tpu.memory_space<vmem>>, vector<1x8x32xf32>,
    %130 = vector.extract_strided_slice %61 {offsets = [0, 612], sizes = [8, 32], strides = [1, 1]} : vector<8x1152xf32> to vector<8x32xf32>
    %c0_112 = arith.constant 0 : index
    %c0_113 = arith.constant 0 : index
    %c544 = arith.constant 544 : index
    %131 = vector.load %arg6[%c0_112, %c0_113, %c544] : memref<1x8x1024xf32, #tpu.memory_space<vmem>>, vector<1x8x32xf32>
    %132 = vector.shape_cast %131 : vector<1x8x32xf32> to vector<8x32xf32>
    %133 = vector.shape_cast %130 : vector<8x32xf32> to vector<1x8x32xf32>
    tpu.vector_store %arg6[%c0_112, %c0_113, %c544], %133 {strides = array<i32>} : memref<1x8x1024xf32, #tpu.memory_space<vmem>>, vector<1x8x32xf32>,
    %134 = vector.extract_strided_slice %61 {offsets = [0, 648], sizes = [8, 32], strides = [1, 1]} : vector<8x1152xf32> to vector<8x32xf32>
    %c0_114 = arith.constant 0 : index
    %c0_115 = arith.constant 0 : index
    %c576 = arith.constant 576 : index
    %135 = vector.load %arg6[%c0_114, %c0_115, %c576] : memref<1x8x1024xf32, #tpu.memory_space<vmem>>, vector<1x8x32xf32>
    %136 = vector.shape_cast %135 : vector<1x8x32xf32> to vector<8x32xf32>
    %137 = vector.shape_cast %134 : vector<8x32xf32> to vector<1x8x32xf32>
    tpu.vector_store %arg6[%c0_114, %c0_115, %c576], %137 {strides = array<i32>} : memref<1x8x1024xf32, #tpu.memory_space<vmem>>, vector<1x8x32xf32>,
    %138 = vector.extract_strided_slice %61 {offsets = [0, 684], sizes = [8, 32], strides = [1, 1]} : vector<8x1152xf32> to vector<8x32xf32>
    %c0_116 = arith.constant 0 : index
    %c0_117 = arith.constant 0 : index
    %c608 = arith.constant 608 : index
    %139 = vector.load %arg6[%c0_116, %c0_117, %c608] : memref<1x8x1024xf32, #tpu.memory_space<vmem>>, vector<1x8x32xf32>
    %140 = vector.shape_cast %139 : vector<1x8x32xf32> to vector<8x32xf32>
    %141 = vector.shape_cast %138 : vector<8x32xf32> to vector<1x8x32xf32>
    tpu.vector_store %arg6[%c0_116, %c0_117, %c608], %141 {strides = array<i32>} : memref<1x8x1024xf32, #tpu.memory_space<vmem>>, vector<1x8x32xf32>,
    %142 = vector.extract_strided_slice %61 {offsets = [0, 720], sizes = [8, 32], strides = [1, 1]} : vector<8x1152xf32> to vector<8x32xf32>
    %c0_118 = arith.constant 0 : index
    %c0_119 = arith.constant 0 : index
    %c640 = arith.constant 640 : index
    %143 = vector.load %arg6[%c0_118, %c0_119, %c640] : memref<1x8x1024xf32, #tpu.memory_space<vmem>>, vector<1x8x32xf32>
    %144 = vector.shape_cast %143 : vector<1x8x32xf32> to vector<8x32xf32>
    %145 = vector.shape_cast %142 : vector<8x32xf32> to vector<1x8x32xf32>
    tpu.vector_store %arg6[%c0_118, %c0_119, %c640], %145 {strides = array<i32>} : memref<1x8x1024xf32, #tpu.memory_space<vmem>>, vector<1x8x32xf32>,
    %146 = vector.extract_strided_slice %61 {offsets = [0, 756], sizes = [8, 32], strides = [1, 1]} : vector<8x1152xf32> to vector<8x32xf32>
    %c0_120 = arith.constant 0 : index
    %c0_121 = arith.constant 0 : index
    %c672 = arith.constant 672 : index
    %147 = vector.load %arg6[%c0_120, %c0_121, %c672] : memref<1x8x1024xf32, #tpu.memory_space<vmem>>, vector<1x8x32xf32>
    %148 = vector.shape_cast %147 : vector<1x8x32xf32> to vector<8x32xf32>
    %149 = vector.shape_cast %146 : vector<8x32xf32> to vector<1x8x32xf32>
    tpu.vector_store %arg6[%c0_120, %c0_121, %c672], %149 {strides = array<i32>} : memref<1x8x1024xf32, #tpu.memory_space<vmem>>, vector<1x8x32xf32>,
    %150 = vector.extract_strided_slice %61 {offsets = [0, 792], sizes = [8, 32], strides = [1, 1]} : vector<8x1152xf32> to vector<8x32xf32>
    %c0_122 = arith.constant 0 : index
    %c0_123 = arith.constant 0 : index
    %c704 = arith.constant 704 : index
    %151 = vector.load %arg6[%c0_122, %c0_123, %c704] : memref<1x8x1024xf32, #tpu.memory_space<vmem>>, vector<1x8x32xf32>
    %152 = vector.shape_cast %151 : vector<1x8x32xf32> to vector<8x32xf32>
    %153 = vector.shape_cast %150 : vector<8x32xf32> to vector<1x8x32xf32>
    tpu.vector_store %arg6[%c0_122, %c0_123, %c704], %153 {strides = array<i32>} : memref<1x8x1024xf32, #tpu.memory_space<vmem>>, vector<1x8x32xf32>,
    %154 = vector.extract_strided_slice %61 {offsets = [0, 828], sizes = [8, 32], strides = [1, 1]} : vector<8x1152xf32> to vector<8x32xf32>
    %c0_124 = arith.constant 0 : index
    %c0_125 = arith.constant 0 : index
    %c736 = arith.constant 736 : index
    %155 = vector.load %arg6[%c0_124, %c0_125, %c736] : memref<1x8x1024xf32, #tpu.memory_space<vmem>>, vector<1x8x32xf32>
    %156 = vector.shape_cast %155 : vector<1x8x32xf32> to vector<8x32xf32>
    %157 = vector.shape_cast %154 : vector<8x32xf32> to vector<1x8x32xf32>
    tpu.vector_store %arg6[%c0_124, %c0_125, %c736], %157 {strides = array<i32>} : memref<1x8x1024xf32, #tpu.memory_space<vmem>>, vector<1x8x32xf32>,
    %158 = vector.extract_strided_slice %61 {offsets = [0, 864], sizes = [8, 32], strides = [1, 1]} : vector<8x1152xf32> to vector<8x32xf32>
    %c0_126 = arith.constant 0 : index
    %c0_127 = arith.constant 0 : index
    %c768 = arith.constant 768 : index
    %159 = vector.load %arg6[%c0_126, %c0_127, %c768] : memref<1x8x1024xf32, #tpu.memory_space<vmem>>, vector<1x8x32xf32>
    %160 = vector.shape_cast %159 : vector<1x8x32xf32> to vector<8x32xf32>
    %161 = vector.shape_cast %158 : vector<8x32xf32> to vector<1x8x32xf32>
    tpu.vector_store %arg6[%c0_126, %c0_127, %c768], %161 {strides = array<i32>} : memref<1x8x1024xf32, #tpu.memory_space<vmem>>, vector<1x8x32xf32>,
    %162 = vector.extract_strided_slice %61 {offsets = [0, 900], sizes = [8, 32], strides = [1, 1]} : vector<8x1152xf32> to vector<8x32xf32>
    %c0_128 = arith.constant 0 : index
    %c0_129 = arith.constant 0 : index
    %c800 = arith.constant 800 : index
    %163 = vector.load %arg6[%c0_128, %c0_129, %c800] : memref<1x8x1024xf32, #tpu.memory_space<vmem>>, vector<1x8x32xf32>
    %164 = vector.shape_cast %163 : vector<1x8x32xf32> to vector<8x32xf32>
    %165 = vector.shape_cast %162 : vector<8x32xf32> to vector<1x8x32xf32>
    tpu.vector_store %arg6[%c0_128, %c0_129, %c800], %165 {strides = array<i32>} : memref<1x8x1024xf32, #tpu.memory_space<vmem>>, vector<1x8x32xf32>,
    %166 = vector.extract_strided_slice %61 {offsets = [0, 936], sizes = [8, 32], strides = [1, 1]} : vector<8x1152xf32> to vector<8x32xf32>
    %c0_130 = arith.constant 0 : index
    %c0_131 = arith.constant 0 : index
    %c832 = arith.constant 832 : index
    %167 = vector.load %arg6[%c0_130, %c0_131, %c832] : memref<1x8x1024xf32, #tpu.memory_space<vmem>>, vector<1x8x32xf32>
    %168 = vector.shape_cast %167 : vector<1x8x32xf32> to vector<8x32xf32>
    %169 = vector.shape_cast %166 : vector<8x32xf32> to vector<1x8x32xf32>
    tpu.vector_store %arg6[%c0_130, %c0_131, %c832], %169 {strides = array<i32>} : memref<1x8x1024xf32, #tpu.memory_space<vmem>>, vector<1x8x32xf32>,
    %170 = vector.extract_strided_slice %61 {offsets = [0, 972], sizes = [8, 32], strides = [1, 1]} : vector<8x1152xf32> to vector<8x32xf32>
    %c0_132 = arith.constant 0 : index
    %c0_133 = arith.constant 0 : index
    %c864 = arith.constant 864 : index
    %171 = vector.load %arg6[%c0_132, %c0_133, %c864] : memref<1x8x1024xf32, #tpu.memory_space<vmem>>, vector<1x8x32xf32>
    %172 = vector.shape_cast %171 : vector<1x8x32xf32> to vector<8x32xf32>
    %173 = vector.shape_cast %170 : vector<8x32xf32> to vector<1x8x32xf32>
    tpu.vector_store %arg6[%c0_132, %c0_133, %c864], %173 {strides = array<i32>} : memref<1x8x1024xf32, #tpu.memory_space<vmem>>, vector<1x8x32xf32>,
    %174 = vector.extract_strided_slice %61 {offsets = [0, 1008], sizes = [8, 32], strides = [1, 1]} : vector<8x1152xf32> to vector<8x32xf32>
    %c0_134 = arith.constant 0 : index
    %c0_135 = arith.constant 0 : index
    %c896 = arith.constant 896 : index
    %175 = vector.load %arg6[%c0_134, %c0_135, %c896] : memref<1x8x1024xf32, #tpu.memory_space<vmem>>, vector<1x8x32xf32>
    %176 = vector.shape_cast %175 : vector<1x8x32xf32> to vector<8x32xf32>
    %177 = vector.shape_cast %174 : vector<8x32xf32> to vector<1x8x32xf32>
    tpu.vector_store %arg6[%c0_134, %c0_135, %c896], %177 {strides = array<i32>} : memref<1x8x1024xf32, #tpu.memory_space<vmem>>, vector<1x8x32xf32>,
    %178 = vector.extract_strided_slice %61 {offsets = [0, 1044], sizes = [8, 32], strides = [1, 1]} : vector<8x1152xf32> to vector<8x32xf32>
    %c0_136 = arith.constant 0 : index
    %c0_137 = arith.constant 0 : index
    %c928 = arith.constant 928 : index
    %179 = vector.load %arg6[%c0_136, %c0_137, %c928] : memref<1x8x1024xf32, #tpu.memory_space<vmem>>, vector<1x8x32xf32>
    %180 = vector.shape_cast %179 : vector<1x8x32xf32> to vector<8x32xf32>
    %181 = vector.shape_cast %178 : vector<8x32xf32> to vector<1x8x32xf32>
    tpu.vector_store %arg6[%c0_136, %c0_137, %c928], %181 {strides = array<i32>} : memref<1x8x1024xf32, #tpu.memory_space<vmem>>, vector<1x8x32xf32>,
    %182 = vector.extract_strided_slice %61 {offsets = [0, 1080], sizes = [8, 32], strides = [1, 1]} : vector<8x1152xf32> to vector<8x32xf32>
    %c0_138 = arith.constant 0 : index
    %c0_139 = arith.constant 0 : index
    %c960 = arith.constant 960 : index
    %183 = vector.load %arg6[%c0_138, %c0_139, %c960] : memref<1x8x1024xf32, #tpu.memory_space<vmem>>, vector<1x8x32xf32>
    %184 = vector.shape_cast %183 : vector<1x8x32xf32> to vector<8x32xf32>
    %185 = vector.shape_cast %182 : vector<8x32xf32> to vector<1x8x32xf32>
    tpu.vector_store %arg6[%c0_138, %c0_139, %c960], %185 {strides = array<i32>} : memref<1x8x1024xf32, #tpu.memory_space<vmem>>, vector<1x8x32xf32>,
    %186 = vector.extract_strided_slice %61 {offsets = [0, 1116], sizes = [8, 32], strides = [1, 1]} : vector<8x1152xf32> to vector<8x32xf32>
    %c0_140 = arith.constant 0 : index
    %c0_141 = arith.constant 0 : index
    %c992 = arith.constant 992 : index
    %187 = vector.load %arg6[%c0_140, %c0_141, %c992] : memref<1x8x1024xf32, #tpu.memory_space<vmem>>, vector<1x8x32xf32>
    %188 = vector.shape_cast %187 : vector<1x8x32xf32> to vector<8x32xf32>
    %189 = vector.shape_cast %186 : vector<8x32xf32> to vector<1x8x32xf32>
    tpu.vector_store %arg6[%c0_140, %c0_141, %c992], %189 {strides = array<i32>} : memref<1x8x1024xf32, #tpu.memory_space<vmem>>, vector<1x8x32xf32>,
    return
  }
  func.func @transform_0(%arg0: i32) -> (i32, i32, i32) {
    %c0_i32 = arith.constant 0 : i32
    %c0_i32_0 = arith.constant 0 : i32
    %c0_i32_1 = arith.constant 0 : i32
    return %arg0, %c0_i32, %c0_i32_0 : i32, i32, i32
  }
  func.func @transform_1(%arg0: i32) -> (i32, i32) {
    %c0_i32 = arith.constant 0 : i32
    %c0_i32_0 = arith.constant 0 : i32
    %c0_i32_1 = arith.constant 0 : i32
    return %c0_i32, %c0_i32_0 : i32, i32
  }
  func.func @transform_2(%arg0: i32) -> (i32, i32) {
    %c0_i32 = arith.constant 0 : i32
    %c0_i32_0 = arith.constant 0 : i32
    %c0_i32_1 = arith.constant 0 : i32
    return %c0_i32, %c0_i32_0 : i32, i32
  }
  func.func @transform_3(%arg0: i32) -> (i32, i32) {
    %c0_i32 = arith.constant 0 : i32
    %c0_i32_0 = arith.constant 0 : i32
    %c0_i32_1 = arith.constant 0 : i32
    return %c0_i32, %c0_i32_0 : i32, i32
  }
  func.func @transform_4(%arg0: i32) -> (i32, i32) {
    %c0_i32 = arith.constant 0 : i32
    %c0_i32_0 = arith.constant 0 : i32
    %c0_i32_1 = arith.constant 0 : i32
    return %c0_i32, %c0_i32_0 : i32, i32
  }
  func.func @transform_5(%arg0: i32) -> (i32, i32, i32) {
    %c0_i32 = arith.constant 0 : i32
    %c0_i32_0 = arith.constant 0 : i32
    %c0_i32_1 = arith.constant 0 : i32
    return %arg0, %c0_i32, %c0_i32_0 : i32, i32, i32
  }
}

module attributes {stable_mosaic.version = 11 : i64} {
  func.func @_block_kernel(%arg0: i32, %arg1: memref<1x8x256xf32, #tpu.memory_space<vmem>>, %arg2: memref<16x72xf32, #tpu.memory_space<vmem>>, %arg3: memref<16x1xf32, #tpu.memory_space<vmem>>, %arg4: memref<16x144xf32, #tpu.memory_space<vmem>>, %arg5: memref<16x1xf32, #tpu.memory_space<vmem>>, %arg6: memref<1x16x144xf32, #tpu.memory_space<vmem>>, %arg7: memref<72x222xf32, #tpu.memory_space<vmem>>, %arg8: memref<16x226xf32, #tpu.memory_space<vmem>>, %arg9: memref<144x192xf32, #tpu.memory_space<vmem>>) attributes {dimension_semantics = [#tpu.dimension_semantics<parallel>], iteration_bounds = array<i64: 2>, scalar_prefetch = 0 : i64, scratch_operands = 3 : i64, tpu.core_type = #tpu.core_type<tc>, window_params = [{transform_indices = @transform_0, window_bounds = array<i64: 1, 8, 256>}, {pipeline_mode = #tpu.pipeline_mode<synchronous>, transform_indices = @transform_1, window_bounds = array<i64: 16, 72>}, {pipeline_mode = #tpu.pipeline_mode<synchronous>, transform_indices = @transform_2, window_bounds = array<i64: 16, 1>}, {pipeline_mode = #tpu.pipeline_mode<synchronous>, transform_indices = @transform_3, window_bounds = array<i64: 16, 144>}, {pipeline_mode = #tpu.pipeline_mode<synchronous>, transform_indices = @transform_4, window_bounds = array<i64: 16, 1>}, {transform_indices = @transform_5, window_bounds = array<i64: 1, 16, 144>}]} {
    %c0 = arith.constant 0 : index
    %c0_0 = arith.constant 0 : index
    %c0_1 = arith.constant 0 : index
    %0 = vector.load %arg1[%c0, %c0_0, %c0_1] : memref<1x8x256xf32, #tpu.memory_space<vmem>>, vector<1x8x222xf32>
    %1 = vector.shape_cast %0 : vector<1x8x222xf32> to vector<8x222xf32>
    %c0_2 = arith.constant 0 : index
    %c0_3 = arith.constant 0 : index
    %2 = vector.load %arg7[%c0_2, %c0_3] : memref<72x222xf32, #tpu.memory_space<vmem>>, vector<8x222xf32>
    tpu.vector_store %arg7[%c0_2, %c0_3], %1 {strides = array<i32>} : memref<72x222xf32, #tpu.memory_space<vmem>>, vector<8x222xf32>,
    %c0_4 = arith.constant 0 : index
    %c0_5 = arith.constant 0 : index
    %c1 = arith.constant 1 : index
    %3 = vector.load %arg1[%c0_4, %c0_5, %c1] : memref<1x8x256xf32, #tpu.memory_space<vmem>>, vector<1x8x222xf32>
    %4 = vector.shape_cast %3 : vector<1x8x222xf32> to vector<8x222xf32>
    %c8 = arith.constant 8 : index
    %c0_6 = arith.constant 0 : index
    %5 = vector.load %arg7[%c8, %c0_6] : memref<72x222xf32, #tpu.memory_space<vmem>>, vector<8x222xf32>
    tpu.vector_store %arg7[%c8, %c0_6], %4 {strides = array<i32>} : memref<72x222xf32, #tpu.memory_space<vmem>>, vector<8x222xf32>,
    %c0_7 = arith.constant 0 : index
    %c0_8 = arith.constant 0 : index
    %c2 = arith.constant 2 : index
    %6 = vector.load %arg1[%c0_7, %c0_8, %c2] : memref<1x8x256xf32, #tpu.memory_space<vmem>>, vector<1x8x222xf32>
    %7 = vector.shape_cast %6 : vector<1x8x222xf32> to vector<8x222xf32>
    %c16 = arith.constant 16 : index
    %c0_9 = arith.constant 0 : index
    %8 = vector.load %arg7[%c16, %c0_9] : memref<72x222xf32, #tpu.memory_space<vmem>>, vector<8x222xf32>
    tpu.vector_store %arg7[%c16, %c0_9], %7 {strides = array<i32>} : memref<72x222xf32, #tpu.memory_space<vmem>>, vector<8x222xf32>,
    %c0_10 = arith.constant 0 : index
    %c0_11 = arith.constant 0 : index
    %c16_12 = arith.constant 16 : index
    %9 = vector.load %arg1[%c0_10, %c0_11, %c16_12] : memref<1x8x256xf32, #tpu.memory_space<vmem>>, vector<1x8x222xf32>
    %10 = vector.shape_cast %9 : vector<1x8x222xf32> to vector<8x222xf32>
    %c24 = arith.constant 24 : index
    %c0_13 = arith.constant 0 : index
    %11 = vector.load %arg7[%c24, %c0_13] : memref<72x222xf32, #tpu.memory_space<vmem>>, vector<8x222xf32>
    tpu.vector_store %arg7[%c24, %c0_13], %10 {strides = array<i32>} : memref<72x222xf32, #tpu.memory_space<vmem>>, vector<8x222xf32>,
    %c0_14 = arith.constant 0 : index
    %c0_15 = arith.constant 0 : index
    %c17 = arith.constant 17 : index
    %12 = vector.load %arg1[%c0_14, %c0_15, %c17] : memref<1x8x256xf32, #tpu.memory_space<vmem>>, vector<1x8x222xf32>
    %13 = vector.shape_cast %12 : vector<1x8x222xf32> to vector<8x222xf32>
    %c32 = arith.constant 32 : index
    %c0_16 = arith.constant 0 : index
    %14 = vector.load %arg7[%c32, %c0_16] : memref<72x222xf32, #tpu.memory_space<vmem>>, vector<8x222xf32>
    tpu.vector_store %arg7[%c32, %c0_16], %13 {strides = array<i32>} : memref<72x222xf32, #tpu.memory_space<vmem>>, vector<8x222xf32>,
    %c0_17 = arith.constant 0 : index
    %c0_18 = arith.constant 0 : index
    %c18 = arith.constant 18 : index
    %15 = vector.load %arg1[%c0_17, %c0_18, %c18] : memref<1x8x256xf32, #tpu.memory_space<vmem>>, vector<1x8x222xf32>
    %16 = vector.shape_cast %15 : vector<1x8x222xf32> to vector<8x222xf32>
    %c40 = arith.constant 40 : index
    %c0_19 = arith.constant 0 : index
    %17 = vector.load %arg7[%c40, %c0_19] : memref<72x222xf32, #tpu.memory_space<vmem>>, vector<8x222xf32>
    tpu.vector_store %arg7[%c40, %c0_19], %16 {strides = array<i32>} : memref<72x222xf32, #tpu.memory_space<vmem>>, vector<8x222xf32>,
    %c0_20 = arith.constant 0 : index
    %c0_21 = arith.constant 0 : index
    %c32_22 = arith.constant 32 : index
    %18 = vector.load %arg1[%c0_20, %c0_21, %c32_22] : memref<1x8x256xf32, #tpu.memory_space<vmem>>, vector<1x8x222xf32>
    %19 = vector.shape_cast %18 : vector<1x8x222xf32> to vector<8x222xf32>
    %c48 = arith.constant 48 : index
    %c0_23 = arith.constant 0 : index
    %20 = vector.load %arg7[%c48, %c0_23] : memref<72x222xf32, #tpu.memory_space<vmem>>, vector<8x222xf32>
    tpu.vector_store %arg7[%c48, %c0_23], %19 {strides = array<i32>} : memref<72x222xf32, #tpu.memory_space<vmem>>, vector<8x222xf32>,
    %c0_24 = arith.constant 0 : index
    %c0_25 = arith.constant 0 : index
    %c33 = arith.constant 33 : index
    %21 = vector.load %arg1[%c0_24, %c0_25, %c33] : memref<1x8x256xf32, #tpu.memory_space<vmem>>, vector<1x8x222xf32>
    %22 = vector.shape_cast %21 : vector<1x8x222xf32> to vector<8x222xf32>
    %c56 = arith.constant 56 : index
    %c0_26 = arith.constant 0 : index
    %23 = vector.load %arg7[%c56, %c0_26] : memref<72x222xf32, #tpu.memory_space<vmem>>, vector<8x222xf32>
    tpu.vector_store %arg7[%c56, %c0_26], %22 {strides = array<i32>} : memref<72x222xf32, #tpu.memory_space<vmem>>, vector<8x222xf32>,
    %c0_27 = arith.constant 0 : index
    %c0_28 = arith.constant 0 : index
    %c34 = arith.constant 34 : index
    %24 = vector.load %arg1[%c0_27, %c0_28, %c34] : memref<1x8x256xf32, #tpu.memory_space<vmem>>, vector<1x8x222xf32>
    %25 = vector.shape_cast %24 : vector<1x8x222xf32> to vector<8x222xf32>
    %c64 = arith.constant 64 : index
    %c0_29 = arith.constant 0 : index
    %26 = vector.load %arg7[%c64, %c0_29] : memref<72x222xf32, #tpu.memory_space<vmem>>, vector<8x222xf32>
    tpu.vector_store %arg7[%c64, %c0_29], %25 {strides = array<i32>} : memref<72x222xf32, #tpu.memory_space<vmem>>, vector<8x222xf32>,
    %c0_30 = arith.constant 0 : index
    %c0_31 = arith.constant 0 : index
    %27 = vector.load %arg2[%c0_30, %c0_31] : memref<16x72xf32, #tpu.memory_space<vmem>>, vector<16x72xf32>
    %c0_32 = arith.constant 0 : index
    %c0_33 = arith.constant 0 : index
    %28 = vector.load %arg7[%c0_32, %c0_33] : memref<72x222xf32, #tpu.memory_space<vmem>>, vector<72x222xf32>
    %cst = arith.constant dense<0.000000e+00> : vector<16x222xf32>
    %29 = tpu.matmul %27, %28, %cst {dimension_numbers = #tpu.dot_dimension_numbers<[1], [0], [0], [1], [0, 0, 1, 1], [], []>} : vector<16x72xf32>, vector<72x222xf32>, vector<16x222xf32> -> vector<16x222xf32>
    %c0_34 = arith.constant 0 : index
    %c0_35 = arith.constant 0 : index
    %30 = vector.load %arg3[%c0_34, %c0_35] : memref<16x1xf32, #tpu.memory_space<vmem>>, vector<16x1xf32>
    %31 = vector.broadcast %30 : vector<16x1xf32> to vector<16x222xf32>
    %32 = arith.addf %29, %31 : vector<16x222xf32>
    %cst_36 = arith.constant 0.000000e+00 : f32
    %33 = vector.broadcast %cst_36 : f32 to vector<16x222xf32>
    %34 = arith.maximumf %32, %33 : vector<16x222xf32>
    %c0_37 = arith.constant 0 : index
    %c0_38 = arith.constant 0 : index
    %35 = vector.load %arg8[%c0_37, %c0_38] : memref<16x226xf32, #tpu.memory_space<vmem>>, vector<16x222xf32>
    tpu.vector_store %arg8[%c0_37, %c0_38], %34 {strides = array<i32>} : memref<16x226xf32, #tpu.memory_space<vmem>>, vector<16x222xf32>,
    %cst_39 = arith.constant 0.000000e+00 : f32
    %36 = vector.broadcast %cst_39 : f32 to vector<16x4xf32>
    %c0_40 = arith.constant 0 : index
    %c222 = arith.constant 222 : index
    %37 = vector.load %arg8[%c0_40, %c222] : memref<16x226xf32, #tpu.memory_space<vmem>>, vector<16x4xf32>
    tpu.vector_store %arg8[%c0_40, %c222], %36 {strides = array<i32>} : memref<16x226xf32, #tpu.memory_space<vmem>>, vector<16x4xf32>,
    %c0_41 = arith.constant 0 : index
    %c0_42 = arith.constant 0 : index
    %38 = vector.load %arg8[%c0_41, %c0_42] : memref<16x226xf32, #tpu.memory_space<vmem>>, vector<16x192xf32>
    %c0_43 = arith.constant 0 : index
    %c0_44 = arith.constant 0 : index
    %39 = vector.load %arg9[%c0_43, %c0_44] : memref<144x192xf32, #tpu.memory_space<vmem>>, vector<16x192xf32>
    tpu.vector_store %arg9[%c0_43, %c0_44], %38 {strides = array<i32>} : memref<144x192xf32, #tpu.memory_space<vmem>>, vector<16x192xf32>,
    %c0_45 = arith.constant 0 : index
    %c1_46 = arith.constant 1 : index
    %40 = vector.load %arg8[%c0_45, %c1_46] : memref<16x226xf32, #tpu.memory_space<vmem>>, vector<16x192xf32>
    %c16_47 = arith.constant 16 : index
    %c0_48 = arith.constant 0 : index
    %41 = vector.load %arg9[%c16_47, %c0_48] : memref<144x192xf32, #tpu.memory_space<vmem>>, vector<16x192xf32>
    tpu.vector_store %arg9[%c16_47, %c0_48], %40 {strides = array<i32>} : memref<144x192xf32, #tpu.memory_space<vmem>>, vector<16x192xf32>,
    %c0_49 = arith.constant 0 : index
    %c2_50 = arith.constant 2 : index
    %42 = vector.load %arg8[%c0_49, %c2_50] : memref<16x226xf32, #tpu.memory_space<vmem>>, vector<16x192xf32>
    %c32_51 = arith.constant 32 : index
    %c0_52 = arith.constant 0 : index
    %43 = vector.load %arg9[%c32_51, %c0_52] : memref<144x192xf32, #tpu.memory_space<vmem>>, vector<16x192xf32>
    tpu.vector_store %arg9[%c32_51, %c0_52], %42 {strides = array<i32>} : memref<144x192xf32, #tpu.memory_space<vmem>>, vector<16x192xf32>,
    %c0_53 = arith.constant 0 : index
    %c16_54 = arith.constant 16 : index
    %44 = vector.load %arg8[%c0_53, %c16_54] : memref<16x226xf32, #tpu.memory_space<vmem>>, vector<16x192xf32>
    %c48_55 = arith.constant 48 : index
    %c0_56 = arith.constant 0 : index
    %45 = vector.load %arg9[%c48_55, %c0_56] : memref<144x192xf32, #tpu.memory_space<vmem>>, vector<16x192xf32>
    tpu.vector_store %arg9[%c48_55, %c0_56], %44 {strides = array<i32>} : memref<144x192xf32, #tpu.memory_space<vmem>>, vector<16x192xf32>,
    %c0_57 = arith.constant 0 : index
    %c17_58 = arith.constant 17 : index
    %46 = vector.load %arg8[%c0_57, %c17_58] : memref<16x226xf32, #tpu.memory_space<vmem>>, vector<16x192xf32>
    %c64_59 = arith.constant 64 : index
    %c0_60 = arith.constant 0 : index
    %47 = vector.load %arg9[%c64_59, %c0_60] : memref<144x192xf32, #tpu.memory_space<vmem>>, vector<16x192xf32>
    tpu.vector_store %arg9[%c64_59, %c0_60], %46 {strides = array<i32>} : memref<144x192xf32, #tpu.memory_space<vmem>>, vector<16x192xf32>,
    %c0_61 = arith.constant 0 : index
    %c18_62 = arith.constant 18 : index
    %48 = vector.load %arg8[%c0_61, %c18_62] : memref<16x226xf32, #tpu.memory_space<vmem>>, vector<16x192xf32>
    %c80 = arith.constant 80 : index
    %c0_63 = arith.constant 0 : index
    %49 = vector.load %arg9[%c80, %c0_63] : memref<144x192xf32, #tpu.memory_space<vmem>>, vector<16x192xf32>
    tpu.vector_store %arg9[%c80, %c0_63], %48 {strides = array<i32>} : memref<144x192xf32, #tpu.memory_space<vmem>>, vector<16x192xf32>,
    %c0_64 = arith.constant 0 : index
    %c32_65 = arith.constant 32 : index
    %50 = vector.load %arg8[%c0_64, %c32_65] : memref<16x226xf32, #tpu.memory_space<vmem>>, vector<16x192xf32>
    %c96 = arith.constant 96 : index
    %c0_66 = arith.constant 0 : index
    %51 = vector.load %arg9[%c96, %c0_66] : memref<144x192xf32, #tpu.memory_space<vmem>>, vector<16x192xf32>
    tpu.vector_store %arg9[%c96, %c0_66], %50 {strides = array<i32>} : memref<144x192xf32, #tpu.memory_space<vmem>>, vector<16x192xf32>,
    %c0_67 = arith.constant 0 : index
    %c33_68 = arith.constant 33 : index
    %52 = vector.load %arg8[%c0_67, %c33_68] : memref<16x226xf32, #tpu.memory_space<vmem>>, vector<16x192xf32>
    %c112 = arith.constant 112 : index
    %c0_69 = arith.constant 0 : index
    %53 = vector.load %arg9[%c112, %c0_69] : memref<144x192xf32, #tpu.memory_space<vmem>>, vector<16x192xf32>
    tpu.vector_store %arg9[%c112, %c0_69], %52 {strides = array<i32>} : memref<144x192xf32, #tpu.memory_space<vmem>>, vector<16x192xf32>,
    %c0_70 = arith.constant 0 : index
    %c34_71 = arith.constant 34 : index
    %54 = vector.load %arg8[%c0_70, %c34_71] : memref<16x226xf32, #tpu.memory_space<vmem>>, vector<16x192xf32>
    %c128 = arith.constant 128 : index
    %c0_72 = arith.constant 0 : index
    %55 = vector.load %arg9[%c128, %c0_72] : memref<144x192xf32, #tpu.memory_space<vmem>>, vector<16x192xf32>
    tpu.vector_store %arg9[%c128, %c0_72], %54 {strides = array<i32>} : memref<144x192xf32, #tpu.memory_space<vmem>>, vector<16x192xf32>,
    %c0_73 = arith.constant 0 : index
    %c0_74 = arith.constant 0 : index
    %56 = vector.load %arg4[%c0_73, %c0_74] : memref<16x144xf32, #tpu.memory_space<vmem>>, vector<16x144xf32>
    %c0_75 = arith.constant 0 : index
    %c0_76 = arith.constant 0 : index
    %57 = vector.load %arg9[%c0_75, %c0_76] : memref<144x192xf32, #tpu.memory_space<vmem>>, vector<144x192xf32>
    %cst_77 = arith.constant dense<0.000000e+00> : vector<16x192xf32>
    %58 = tpu.matmul %56, %57, %cst_77 {dimension_numbers = #tpu.dot_dimension_numbers<[1], [0], [0], [1], [0, 0, 1, 1], [], []>} : vector<16x144xf32>, vector<144x192xf32>, vector<16x192xf32> -> vector<16x192xf32>
    %c0_78 = arith.constant 0 : index
    %c0_79 = arith.constant 0 : index
    %59 = vector.load %arg5[%c0_78, %c0_79] : memref<16x1xf32, #tpu.memory_space<vmem>>, vector<16x1xf32>
    %60 = vector.broadcast %59 : vector<16x1xf32> to vector<16x192xf32>
    %61 = arith.addf %58, %60 : vector<16x192xf32>
    %62 = vector.extract_strided_slice %61 {offsets = [0, 0], sizes = [16, 12], strides = [1, 1]} : vector<16x192xf32> to vector<16x12xf32>
    %c0_80 = arith.constant 0 : index
    %c0_81 = arith.constant 0 : index
    %c0_82 = arith.constant 0 : index
    %63 = vector.load %arg6[%c0_80, %c0_81, %c0_82] : memref<1x16x144xf32, #tpu.memory_space<vmem>>, vector<1x16x12xf32>
    %64 = vector.shape_cast %63 : vector<1x16x12xf32> to vector<16x12xf32>
    %65 = vector.shape_cast %62 : vector<16x12xf32> to vector<1x16x12xf32>
    tpu.vector_store %arg6[%c0_80, %c0_81, %c0_82], %65 {strides = array<i32>} : memref<1x16x144xf32, #tpu.memory_space<vmem>>, vector<1x16x12xf32>,
    %66 = vector.extract_strided_slice %61 {offsets = [0, 16], sizes = [16, 12], strides = [1, 1]} : vector<16x192xf32> to vector<16x12xf32>
    %c0_83 = arith.constant 0 : index
    %c0_84 = arith.constant 0 : index
    %c12 = arith.constant 12 : index
    %67 = vector.load %arg6[%c0_83, %c0_84, %c12] : memref<1x16x144xf32, #tpu.memory_space<vmem>>, vector<1x16x12xf32>
    %68 = vector.shape_cast %67 : vector<1x16x12xf32> to vector<16x12xf32>
    %69 = vector.shape_cast %66 : vector<16x12xf32> to vector<1x16x12xf32>
    tpu.vector_store %arg6[%c0_83, %c0_84, %c12], %69 {strides = array<i32>} : memref<1x16x144xf32, #tpu.memory_space<vmem>>, vector<1x16x12xf32>,
    %70 = vector.extract_strided_slice %61 {offsets = [0, 32], sizes = [16, 12], strides = [1, 1]} : vector<16x192xf32> to vector<16x12xf32>
    %c0_85 = arith.constant 0 : index
    %c0_86 = arith.constant 0 : index
    %c24_87 = arith.constant 24 : index
    %71 = vector.load %arg6[%c0_85, %c0_86, %c24_87] : memref<1x16x144xf32, #tpu.memory_space<vmem>>, vector<1x16x12xf32>
    %72 = vector.shape_cast %71 : vector<1x16x12xf32> to vector<16x12xf32>
    %73 = vector.shape_cast %70 : vector<16x12xf32> to vector<1x16x12xf32>
    tpu.vector_store %arg6[%c0_85, %c0_86, %c24_87], %73 {strides = array<i32>} : memref<1x16x144xf32, #tpu.memory_space<vmem>>, vector<1x16x12xf32>,
    %74 = vector.extract_strided_slice %61 {offsets = [0, 48], sizes = [16, 12], strides = [1, 1]} : vector<16x192xf32> to vector<16x12xf32>
    %c0_88 = arith.constant 0 : index
    %c0_89 = arith.constant 0 : index
    %c36 = arith.constant 36 : index
    %75 = vector.load %arg6[%c0_88, %c0_89, %c36] : memref<1x16x144xf32, #tpu.memory_space<vmem>>, vector<1x16x12xf32>
    %76 = vector.shape_cast %75 : vector<1x16x12xf32> to vector<16x12xf32>
    %77 = vector.shape_cast %74 : vector<16x12xf32> to vector<1x16x12xf32>
    tpu.vector_store %arg6[%c0_88, %c0_89, %c36], %77 {strides = array<i32>} : memref<1x16x144xf32, #tpu.memory_space<vmem>>, vector<1x16x12xf32>,
    %78 = vector.extract_strided_slice %61 {offsets = [0, 64], sizes = [16, 12], strides = [1, 1]} : vector<16x192xf32> to vector<16x12xf32>
    %c0_90 = arith.constant 0 : index
    %c0_91 = arith.constant 0 : index
    %c48_92 = arith.constant 48 : index
    %79 = vector.load %arg6[%c0_90, %c0_91, %c48_92] : memref<1x16x144xf32, #tpu.memory_space<vmem>>, vector<1x16x12xf32>
    %80 = vector.shape_cast %79 : vector<1x16x12xf32> to vector<16x12xf32>
    %81 = vector.shape_cast %78 : vector<16x12xf32> to vector<1x16x12xf32>
    tpu.vector_store %arg6[%c0_90, %c0_91, %c48_92], %81 {strides = array<i32>} : memref<1x16x144xf32, #tpu.memory_space<vmem>>, vector<1x16x12xf32>,
    %82 = vector.extract_strided_slice %61 {offsets = [0, 80], sizes = [16, 12], strides = [1, 1]} : vector<16x192xf32> to vector<16x12xf32>
    %c0_93 = arith.constant 0 : index
    %c0_94 = arith.constant 0 : index
    %c60 = arith.constant 60 : index
    %83 = vector.load %arg6[%c0_93, %c0_94, %c60] : memref<1x16x144xf32, #tpu.memory_space<vmem>>, vector<1x16x12xf32>
    %84 = vector.shape_cast %83 : vector<1x16x12xf32> to vector<16x12xf32>
    %85 = vector.shape_cast %82 : vector<16x12xf32> to vector<1x16x12xf32>
    tpu.vector_store %arg6[%c0_93, %c0_94, %c60], %85 {strides = array<i32>} : memref<1x16x144xf32, #tpu.memory_space<vmem>>, vector<1x16x12xf32>,
    %86 = vector.extract_strided_slice %61 {offsets = [0, 96], sizes = [16, 12], strides = [1, 1]} : vector<16x192xf32> to vector<16x12xf32>
    %c0_95 = arith.constant 0 : index
    %c0_96 = arith.constant 0 : index
    %c72 = arith.constant 72 : index
    %87 = vector.load %arg6[%c0_95, %c0_96, %c72] : memref<1x16x144xf32, #tpu.memory_space<vmem>>, vector<1x16x12xf32>
    %88 = vector.shape_cast %87 : vector<1x16x12xf32> to vector<16x12xf32>
    %89 = vector.shape_cast %86 : vector<16x12xf32> to vector<1x16x12xf32>
    tpu.vector_store %arg6[%c0_95, %c0_96, %c72], %89 {strides = array<i32>} : memref<1x16x144xf32, #tpu.memory_space<vmem>>, vector<1x16x12xf32>,
    %90 = vector.extract_strided_slice %61 {offsets = [0, 112], sizes = [16, 12], strides = [1, 1]} : vector<16x192xf32> to vector<16x12xf32>
    %c0_97 = arith.constant 0 : index
    %c0_98 = arith.constant 0 : index
    %c84 = arith.constant 84 : index
    %91 = vector.load %arg6[%c0_97, %c0_98, %c84] : memref<1x16x144xf32, #tpu.memory_space<vmem>>, vector<1x16x12xf32>
    %92 = vector.shape_cast %91 : vector<1x16x12xf32> to vector<16x12xf32>
    %93 = vector.shape_cast %90 : vector<16x12xf32> to vector<1x16x12xf32>
    tpu.vector_store %arg6[%c0_97, %c0_98, %c84], %93 {strides = array<i32>} : memref<1x16x144xf32, #tpu.memory_space<vmem>>, vector<1x16x12xf32>,
    %94 = vector.extract_strided_slice %61 {offsets = [0, 128], sizes = [16, 12], strides = [1, 1]} : vector<16x192xf32> to vector<16x12xf32>
    %c0_99 = arith.constant 0 : index
    %c0_100 = arith.constant 0 : index
    %c96_101 = arith.constant 96 : index
    %95 = vector.load %arg6[%c0_99, %c0_100, %c96_101] : memref<1x16x144xf32, #tpu.memory_space<vmem>>, vector<1x16x12xf32>
    %96 = vector.shape_cast %95 : vector<1x16x12xf32> to vector<16x12xf32>
    %97 = vector.shape_cast %94 : vector<16x12xf32> to vector<1x16x12xf32>
    tpu.vector_store %arg6[%c0_99, %c0_100, %c96_101], %97 {strides = array<i32>} : memref<1x16x144xf32, #tpu.memory_space<vmem>>, vector<1x16x12xf32>,
    %98 = vector.extract_strided_slice %61 {offsets = [0, 144], sizes = [16, 12], strides = [1, 1]} : vector<16x192xf32> to vector<16x12xf32>
    %c0_102 = arith.constant 0 : index
    %c0_103 = arith.constant 0 : index
    %c108 = arith.constant 108 : index
    %99 = vector.load %arg6[%c0_102, %c0_103, %c108] : memref<1x16x144xf32, #tpu.memory_space<vmem>>, vector<1x16x12xf32>
    %100 = vector.shape_cast %99 : vector<1x16x12xf32> to vector<16x12xf32>
    %101 = vector.shape_cast %98 : vector<16x12xf32> to vector<1x16x12xf32>
    tpu.vector_store %arg6[%c0_102, %c0_103, %c108], %101 {strides = array<i32>} : memref<1x16x144xf32, #tpu.memory_space<vmem>>, vector<1x16x12xf32>,
    %102 = vector.extract_strided_slice %61 {offsets = [0, 160], sizes = [16, 12], strides = [1, 1]} : vector<16x192xf32> to vector<16x12xf32>
    %c0_104 = arith.constant 0 : index
    %c0_105 = arith.constant 0 : index
    %c120 = arith.constant 120 : index
    %103 = vector.load %arg6[%c0_104, %c0_105, %c120] : memref<1x16x144xf32, #tpu.memory_space<vmem>>, vector<1x16x12xf32>
    %104 = vector.shape_cast %103 : vector<1x16x12xf32> to vector<16x12xf32>
    %105 = vector.shape_cast %102 : vector<16x12xf32> to vector<1x16x12xf32>
    tpu.vector_store %arg6[%c0_104, %c0_105, %c120], %105 {strides = array<i32>} : memref<1x16x144xf32, #tpu.memory_space<vmem>>, vector<1x16x12xf32>,
    %106 = vector.extract_strided_slice %61 {offsets = [0, 176], sizes = [16, 12], strides = [1, 1]} : vector<16x192xf32> to vector<16x12xf32>
    %c0_106 = arith.constant 0 : index
    %c0_107 = arith.constant 0 : index
    %c132 = arith.constant 132 : index
    %107 = vector.load %arg6[%c0_106, %c0_107, %c132] : memref<1x16x144xf32, #tpu.memory_space<vmem>>, vector<1x16x12xf32>
    %108 = vector.shape_cast %107 : vector<1x16x12xf32> to vector<16x12xf32>
    %109 = vector.shape_cast %106 : vector<16x12xf32> to vector<1x16x12xf32>
    tpu.vector_store %arg6[%c0_106, %c0_107, %c132], %109 {strides = array<i32>} : memref<1x16x144xf32, #tpu.memory_space<vmem>>, vector<1x16x12xf32>,
    return
  }
  func.func @transform_0(%arg0: i32) -> (i32, i32, i32) {
    %c0_i32 = arith.constant 0 : i32
    %c0_i32_0 = arith.constant 0 : i32
    %c0_i32_1 = arith.constant 0 : i32
    return %arg0, %c0_i32, %c0_i32_0 : i32, i32, i32
  }
  func.func @transform_1(%arg0: i32) -> (i32, i32) {
    %c0_i32 = arith.constant 0 : i32
    %c0_i32_0 = arith.constant 0 : i32
    %c0_i32_1 = arith.constant 0 : i32
    return %c0_i32, %c0_i32_0 : i32, i32
  }
  func.func @transform_2(%arg0: i32) -> (i32, i32) {
    %c0_i32 = arith.constant 0 : i32
    %c0_i32_0 = arith.constant 0 : i32
    %c0_i32_1 = arith.constant 0 : i32
    return %c0_i32, %c0_i32_0 : i32, i32
  }
  func.func @transform_3(%arg0: i32) -> (i32, i32) {
    %c0_i32 = arith.constant 0 : i32
    %c0_i32_0 = arith.constant 0 : i32
    %c0_i32_1 = arith.constant 0 : i32
    return %c0_i32, %c0_i32_0 : i32, i32
  }
  func.func @transform_4(%arg0: i32) -> (i32, i32) {
    %c0_i32 = arith.constant 0 : i32
    %c0_i32_0 = arith.constant 0 : i32
    %c0_i32_1 = arith.constant 0 : i32
    return %c0_i32, %c0_i32_0 : i32, i32
  }
  func.func @transform_5(%arg0: i32) -> (i32, i32, i32) {
    %c0_i32 = arith.constant 0 : i32
    %c0_i32_0 = arith.constant 0 : i32
    %c0_i32_1 = arith.constant 0 : i32
    return %arg0, %c0_i32, %c0_i32_0 : i32, i32, i32
  }
}

module attributes {stable_mosaic.version = 11 : i64} {
  func.func @_block_kernel(%arg0: i32, %arg1: memref<1x16x36xf32, #tpu.memory_space<vmem>>, %arg2: memref<32x144xf32, #tpu.memory_space<vmem>>, %arg3: memref<32x1xf32, #tpu.memory_space<vmem>>, %arg4: memref<32x288xf32, #tpu.memory_space<vmem>>, %arg5: memref<32x1xf32, #tpu.memory_space<vmem>>, %arg6: memref<1x32x4xf32, #tpu.memory_space<vmem>>, %arg7: memref<144x22xf32, #tpu.memory_space<vmem>>, %arg8: memref<32x26xf32, #tpu.memory_space<vmem>>, %arg9: memref<288x12xf32, #tpu.memory_space<vmem>>) attributes {dimension_semantics = [#tpu.dimension_semantics<parallel>], iteration_bounds = array<i64: 2>, scalar_prefetch = 0 : i64, scratch_operands = 3 : i64, tpu.core_type = #tpu.core_type<tc>, window_params = [{transform_indices = @transform_0, window_bounds = array<i64: 1, 16, 36>}, {pipeline_mode = #tpu.pipeline_mode<synchronous>, transform_indices = @transform_1, window_bounds = array<i64: 32, 144>}, {pipeline_mode = #tpu.pipeline_mode<synchronous>, transform_indices = @transform_2, window_bounds = array<i64: 32, 1>}, {pipeline_mode = #tpu.pipeline_mode<synchronous>, transform_indices = @transform_3, window_bounds = array<i64: 32, 288>}, {pipeline_mode = #tpu.pipeline_mode<synchronous>, transform_indices = @transform_4, window_bounds = array<i64: 32, 1>}, {transform_indices = @transform_5, window_bounds = array<i64: 1, 32, 4>}]} {
    %c0 = arith.constant 0 : index
    %c0_0 = arith.constant 0 : index
    %c0_1 = arith.constant 0 : index
    %0 = vector.load %arg1[%c0, %c0_0, %c0_1] : memref<1x16x36xf32, #tpu.memory_space<vmem>>, vector<1x16x22xf32>
    %1 = vector.shape_cast %0 : vector<1x16x22xf32> to vector<16x22xf32>
    %c0_2 = arith.constant 0 : index
    %c0_3 = arith.constant 0 : index
    %2 = vector.load %arg7[%c0_2, %c0_3] : memref<144x22xf32, #tpu.memory_space<vmem>>, vector<16x22xf32>
    tpu.vector_store %arg7[%c0_2, %c0_3], %1 {strides = array<i32>} : memref<144x22xf32, #tpu.memory_space<vmem>>, vector<16x22xf32>,
    %c0_4 = arith.constant 0 : index
    %c0_5 = arith.constant 0 : index
    %c1 = arith.constant 1 : index
    %3 = vector.load %arg1[%c0_4, %c0_5, %c1] : memref<1x16x36xf32, #tpu.memory_space<vmem>>, vector<1x16x22xf32>
    %4 = vector.shape_cast %3 : vector<1x16x22xf32> to vector<16x22xf32>
    %c16 = arith.constant 16 : index
    %c0_6 = arith.constant 0 : index
    %5 = vector.load %arg7[%c16, %c0_6] : memref<144x22xf32, #tpu.memory_space<vmem>>, vector<16x22xf32>
    tpu.vector_store %arg7[%c16, %c0_6], %4 {strides = array<i32>} : memref<144x22xf32, #tpu.memory_space<vmem>>, vector<16x22xf32>,
    %c0_7 = arith.constant 0 : index
    %c0_8 = arith.constant 0 : index
    %c2 = arith.constant 2 : index
    %6 = vector.load %arg1[%c0_7, %c0_8, %c2] : memref<1x16x36xf32, #tpu.memory_space<vmem>>, vector<1x16x22xf32>
    %7 = vector.shape_cast %6 : vector<1x16x22xf32> to vector<16x22xf32>
    %c32 = arith.constant 32 : index
    %c0_9 = arith.constant 0 : index
    %8 = vector.load %arg7[%c32, %c0_9] : memref<144x22xf32, #tpu.memory_space<vmem>>, vector<16x22xf32>
    tpu.vector_store %arg7[%c32, %c0_9], %7 {strides = array<i32>} : memref<144x22xf32, #tpu.memory_space<vmem>>, vector<16x22xf32>,
    %c0_10 = arith.constant 0 : index
    %c0_11 = arith.constant 0 : index
    %c6 = arith.constant 6 : index
    %9 = vector.load %arg1[%c0_10, %c0_11, %c6] : memref<1x16x36xf32, #tpu.memory_space<vmem>>, vector<1x16x22xf32>
    %10 = vector.shape_cast %9 : vector<1x16x22xf32> to vector<16x22xf32>
    %c48 = arith.constant 48 : index
    %c0_12 = arith.constant 0 : index
    %11 = vector.load %arg7[%c48, %c0_12] : memref<144x22xf32, #tpu.memory_space<vmem>>, vector<16x22xf32>
    tpu.vector_store %arg7[%c48, %c0_12], %10 {strides = array<i32>} : memref<144x22xf32, #tpu.memory_space<vmem>>, vector<16x22xf32>,
    %c0_13 = arith.constant 0 : index
    %c0_14 = arith.constant 0 : index
    %c7 = arith.constant 7 : index
    %12 = vector.load %arg1[%c0_13, %c0_14, %c7] : memref<1x16x36xf32, #tpu.memory_space<vmem>>, vector<1x16x22xf32>
    %13 = vector.shape_cast %12 : vector<1x16x22xf32> to vector<16x22xf32>
    %c64 = arith.constant 64 : index
    %c0_15 = arith.constant 0 : index
    %14 = vector.load %arg7[%c64, %c0_15] : memref<144x22xf32, #tpu.memory_space<vmem>>, vector<16x22xf32>
    tpu.vector_store %arg7[%c64, %c0_15], %13 {strides = array<i32>} : memref<144x22xf32, #tpu.memory_space<vmem>>, vector<16x22xf32>,
    %c0_16 = arith.constant 0 : index
    %c0_17 = arith.constant 0 : index
    %c8 = arith.constant 8 : index
    %15 = vector.load %arg1[%c0_16, %c0_17, %c8] : memref<1x16x36xf32, #tpu.memory_space<vmem>>, vector<1x16x22xf32>
    %16 = vector.shape_cast %15 : vector<1x16x22xf32> to vector<16x22xf32>
    %c80 = arith.constant 80 : index
    %c0_18 = arith.constant 0 : index
    %17 = vector.load %arg7[%c80, %c0_18] : memref<144x22xf32, #tpu.memory_space<vmem>>, vector<16x22xf32>
    tpu.vector_store %arg7[%c80, %c0_18], %16 {strides = array<i32>} : memref<144x22xf32, #tpu.memory_space<vmem>>, vector<16x22xf32>,
    %c0_19 = arith.constant 0 : index
    %c0_20 = arith.constant 0 : index
    %c12 = arith.constant 12 : index
    %18 = vector.load %arg1[%c0_19, %c0_20, %c12] : memref<1x16x36xf32, #tpu.memory_space<vmem>>, vector<1x16x22xf32>
    %19 = vector.shape_cast %18 : vector<1x16x22xf32> to vector<16x22xf32>
    %c96 = arith.constant 96 : index
    %c0_21 = arith.constant 0 : index
    %20 = vector.load %arg7[%c96, %c0_21] : memref<144x22xf32, #tpu.memory_space<vmem>>, vector<16x22xf32>
    tpu.vector_store %arg7[%c96, %c0_21], %19 {strides = array<i32>} : memref<144x22xf32, #tpu.memory_space<vmem>>, vector<16x22xf32>,
    %c0_22 = arith.constant 0 : index
    %c0_23 = arith.constant 0 : index
    %c13 = arith.constant 13 : index
    %21 = vector.load %arg1[%c0_22, %c0_23, %c13] : memref<1x16x36xf32, #tpu.memory_space<vmem>>, vector<1x16x22xf32>
    %22 = vector.shape_cast %21 : vector<1x16x22xf32> to vector<16x22xf32>
    %c112 = arith.constant 112 : index
    %c0_24 = arith.constant 0 : index
    %23 = vector.load %arg7[%c112, %c0_24] : memref<144x22xf32, #tpu.memory_space<vmem>>, vector<16x22xf32>
    tpu.vector_store %arg7[%c112, %c0_24], %22 {strides = array<i32>} : memref<144x22xf32, #tpu.memory_space<vmem>>, vector<16x22xf32>,
    %c0_25 = arith.constant 0 : index
    %c0_26 = arith.constant 0 : index
    %c14 = arith.constant 14 : index
    %24 = vector.load %arg1[%c0_25, %c0_26, %c14] : memref<1x16x36xf32, #tpu.memory_space<vmem>>, vector<1x16x22xf32>
    %25 = vector.shape_cast %24 : vector<1x16x22xf32> to vector<16x22xf32>
    %c128 = arith.constant 128 : index
    %c0_27 = arith.constant 0 : index
    %26 = vector.load %arg7[%c128, %c0_27] : memref<144x22xf32, #tpu.memory_space<vmem>>, vector<16x22xf32>
    tpu.vector_store %arg7[%c128, %c0_27], %25 {strides = array<i32>} : memref<144x22xf32, #tpu.memory_space<vmem>>, vector<16x22xf32>,
    %c0_28 = arith.constant 0 : index
    %c0_29 = arith.constant 0 : index
    %27 = vector.load %arg2[%c0_28, %c0_29] : memref<32x144xf32, #tpu.memory_space<vmem>>, vector<32x144xf32>
    %c0_30 = arith.constant 0 : index
    %c0_31 = arith.constant 0 : index
    %28 = vector.load %arg7[%c0_30, %c0_31] : memref<144x22xf32, #tpu.memory_space<vmem>>, vector<144x22xf32>
    %cst = arith.constant dense<0.000000e+00> : vector<32x22xf32>
    %29 = tpu.matmul %27, %28, %cst {dimension_numbers = #tpu.dot_dimension_numbers<[1], [0], [0], [1], [0, 0, 1, 1], [], []>} : vector<32x144xf32>, vector<144x22xf32>, vector<32x22xf32> -> vector<32x22xf32>
    %c0_32 = arith.constant 0 : index
    %c0_33 = arith.constant 0 : index
    %30 = vector.load %arg3[%c0_32, %c0_33] : memref<32x1xf32, #tpu.memory_space<vmem>>, vector<32x1xf32>
    %31 = vector.broadcast %30 : vector<32x1xf32> to vector<32x22xf32>
    %32 = arith.addf %29, %31 : vector<32x22xf32>
    %cst_34 = arith.constant 0.000000e+00 : f32
    %33 = vector.broadcast %cst_34 : f32 to vector<32x22xf32>
    %34 = arith.maximumf %32, %33 : vector<32x22xf32>
    %c0_35 = arith.constant 0 : index
    %c0_36 = arith.constant 0 : index
    %35 = vector.load %arg8[%c0_35, %c0_36] : memref<32x26xf32, #tpu.memory_space<vmem>>, vector<32x22xf32>
    tpu.vector_store %arg8[%c0_35, %c0_36], %34 {strides = array<i32>} : memref<32x26xf32, #tpu.memory_space<vmem>>, vector<32x22xf32>,
    %cst_37 = arith.constant 0.000000e+00 : f32
    %36 = vector.broadcast %cst_37 : f32 to vector<32x4xf32>
    %c0_38 = arith.constant 0 : index
    %c22 = arith.constant 22 : index
    %37 = vector.load %arg8[%c0_38, %c22] : memref<32x26xf32, #tpu.memory_space<vmem>>, vector<32x4xf32>
    tpu.vector_store %arg8[%c0_38, %c22], %36 {strides = array<i32>} : memref<32x26xf32, #tpu.memory_space<vmem>>, vector<32x4xf32>,
    %c0_39 = arith.constant 0 : index
    %c0_40 = arith.constant 0 : index
    %38 = vector.load %arg8[%c0_39, %c0_40] : memref<32x26xf32, #tpu.memory_space<vmem>>, vector<32x12xf32>
    %c0_41 = arith.constant 0 : index
    %c0_42 = arith.constant 0 : index
    %39 = vector.load %arg9[%c0_41, %c0_42] : memref<288x12xf32, #tpu.memory_space<vmem>>, vector<32x12xf32>
    tpu.vector_store %arg9[%c0_41, %c0_42], %38 {strides = array<i32>} : memref<288x12xf32, #tpu.memory_space<vmem>>, vector<32x12xf32>,
    %c0_43 = arith.constant 0 : index
    %c1_44 = arith.constant 1 : index
    %40 = vector.load %arg8[%c0_43, %c1_44] : memref<32x26xf32, #tpu.memory_space<vmem>>, vector<32x12xf32>
    %c32_45 = arith.constant 32 : index
    %c0_46 = arith.constant 0 : index
    %41 = vector.load %arg9[%c32_45, %c0_46] : memref<288x12xf32, #tpu.memory_space<vmem>>, vector<32x12xf32>
    tpu.vector_store %arg9[%c32_45, %c0_46], %40 {strides = array<i32>} : memref<288x12xf32, #tpu.memory_space<vmem>>, vector<32x12xf32>,
    %c0_47 = arith.constant 0 : index
    %c2_48 = arith.constant 2 : index
    %42 = vector.load %arg8[%c0_47, %c2_48] : memref<32x26xf32, #tpu.memory_space<vmem>>, vector<32x12xf32>
    %c64_49 = arith.constant 64 : index
    %c0_50 = arith.constant 0 : index
    %43 = vector.load %arg9[%c64_49, %c0_50] : memref<288x12xf32, #tpu.memory_space<vmem>>, vector<32x12xf32>
    tpu.vector_store %arg9[%c64_49, %c0_50], %42 {strides = array<i32>} : memref<288x12xf32, #tpu.memory_space<vmem>>, vector<32x12xf32>,
    %c0_51 = arith.constant 0 : index
    %c6_52 = arith.constant 6 : index
    %44 = vector.load %arg8[%c0_51, %c6_52] : memref<32x26xf32, #tpu.memory_space<vmem>>, vector<32x12xf32>
    %c96_53 = arith.constant 96 : index
    %c0_54 = arith.constant 0 : index
    %45 = vector.load %arg9[%c96_53, %c0_54] : memref<288x12xf32, #tpu.memory_space<vmem>>, vector<32x12xf32>
    tpu.vector_store %arg9[%c96_53, %c0_54], %44 {strides = array<i32>} : memref<288x12xf32, #tpu.memory_space<vmem>>, vector<32x12xf32>,
    %c0_55 = arith.constant 0 : index
    %c7_56 = arith.constant 7 : index
    %46 = vector.load %arg8[%c0_55, %c7_56] : memref<32x26xf32, #tpu.memory_space<vmem>>, vector<32x12xf32>
    %c128_57 = arith.constant 128 : index
    %c0_58 = arith.constant 0 : index
    %47 = vector.load %arg9[%c128_57, %c0_58] : memref<288x12xf32, #tpu.memory_space<vmem>>, vector<32x12xf32>
    tpu.vector_store %arg9[%c128_57, %c0_58], %46 {strides = array<i32>} : memref<288x12xf32, #tpu.memory_space<vmem>>, vector<32x12xf32>,
    %c0_59 = arith.constant 0 : index
    %c8_60 = arith.constant 8 : index
    %48 = vector.load %arg8[%c0_59, %c8_60] : memref<32x26xf32, #tpu.memory_space<vmem>>, vector<32x12xf32>
    %c160 = arith.constant 160 : index
    %c0_61 = arith.constant 0 : index
    %49 = vector.load %arg9[%c160, %c0_61] : memref<288x12xf32, #tpu.memory_space<vmem>>, vector<32x12xf32>
    tpu.vector_store %arg9[%c160, %c0_61], %48 {strides = array<i32>} : memref<288x12xf32, #tpu.memory_space<vmem>>, vector<32x12xf32>,
    %c0_62 = arith.constant 0 : index
    %c12_63 = arith.constant 12 : index
    %50 = vector.load %arg8[%c0_62, %c12_63] : memref<32x26xf32, #tpu.memory_space<vmem>>, vector<32x12xf32>
    %c192 = arith.constant 192 : index
    %c0_64 = arith.constant 0 : index
    %51 = vector.load %arg9[%c192, %c0_64] : memref<288x12xf32, #tpu.memory_space<vmem>>, vector<32x12xf32>
    tpu.vector_store %arg9[%c192, %c0_64], %50 {strides = array<i32>} : memref<288x12xf32, #tpu.memory_space<vmem>>, vector<32x12xf32>,
    %c0_65 = arith.constant 0 : index
    %c13_66 = arith.constant 13 : index
    %52 = vector.load %arg8[%c0_65, %c13_66] : memref<32x26xf32, #tpu.memory_space<vmem>>, vector<32x12xf32>
    %c224 = arith.constant 224 : index
    %c0_67 = arith.constant 0 : index
    %53 = vector.load %arg9[%c224, %c0_67] : memref<288x12xf32, #tpu.memory_space<vmem>>, vector<32x12xf32>
    tpu.vector_store %arg9[%c224, %c0_67], %52 {strides = array<i32>} : memref<288x12xf32, #tpu.memory_space<vmem>>, vector<32x12xf32>,
    %c0_68 = arith.constant 0 : index
    %c14_69 = arith.constant 14 : index
    %54 = vector.load %arg8[%c0_68, %c14_69] : memref<32x26xf32, #tpu.memory_space<vmem>>, vector<32x12xf32>
    %c256 = arith.constant 256 : index
    %c0_70 = arith.constant 0 : index
    %55 = vector.load %arg9[%c256, %c0_70] : memref<288x12xf32, #tpu.memory_space<vmem>>, vector<32x12xf32>
    tpu.vector_store %arg9[%c256, %c0_70], %54 {strides = array<i32>} : memref<288x12xf32, #tpu.memory_space<vmem>>, vector<32x12xf32>,
    %c0_71 = arith.constant 0 : index
    %c0_72 = arith.constant 0 : index
    %56 = vector.load %arg4[%c0_71, %c0_72] : memref<32x288xf32, #tpu.memory_space<vmem>>, vector<32x288xf32>
    %c0_73 = arith.constant 0 : index
    %c0_74 = arith.constant 0 : index
    %57 = vector.load %arg9[%c0_73, %c0_74] : memref<288x12xf32, #tpu.memory_space<vmem>>, vector<288x12xf32>
    %cst_75 = arith.constant dense<0.000000e+00> : vector<32x12xf32>
    %58 = tpu.matmul %56, %57, %cst_75 {dimension_numbers = #tpu.dot_dimension_numbers<[1], [0], [0], [1], [0, 0, 1, 1], [], []>} : vector<32x288xf32>, vector<288x12xf32>, vector<32x12xf32> -> vector<32x12xf32>
    %c0_76 = arith.constant 0 : index
    %c0_77 = arith.constant 0 : index
    %59 = vector.load %arg5[%c0_76, %c0_77] : memref<32x1xf32, #tpu.memory_space<vmem>>, vector<32x1xf32>
    %60 = vector.broadcast %59 : vector<32x1xf32> to vector<32x12xf32>
    %61 = arith.addf %58, %60 : vector<32x12xf32>
    %62 = vector.extract_strided_slice %61 {offsets = [0, 0], sizes = [32, 2], strides = [1, 1]} : vector<32x12xf32> to vector<32x2xf32>
    %c0_78 = arith.constant 0 : index
    %c0_79 = arith.constant 0 : index
    %c0_80 = arith.constant 0 : index
    %63 = vector.load %arg6[%c0_78, %c0_79, %c0_80] : memref<1x32x4xf32, #tpu.memory_space<vmem>>, vector<1x32x2xf32>
    %64 = vector.shape_cast %63 : vector<1x32x2xf32> to vector<32x2xf32>
    %65 = vector.shape_cast %62 : vector<32x2xf32> to vector<1x32x2xf32>
    tpu.vector_store %arg6[%c0_78, %c0_79, %c0_80], %65 {strides = array<i32>} : memref<1x32x4xf32, #tpu.memory_space<vmem>>, vector<1x32x2xf32>,
    %66 = vector.extract_strided_slice %61 {offsets = [0, 6], sizes = [32, 2], strides = [1, 1]} : vector<32x12xf32> to vector<32x2xf32>
    %c0_81 = arith.constant 0 : index
    %c0_82 = arith.constant 0 : index
    %c2_83 = arith.constant 2 : index
    %67 = vector.load %arg6[%c0_81, %c0_82, %c2_83] : memref<1x32x4xf32, #tpu.memory_space<vmem>>, vector<1x32x2xf32>
    %68 = vector.shape_cast %67 : vector<1x32x2xf32> to vector<32x2xf32>
    %69 = vector.shape_cast %66 : vector<32x2xf32> to vector<1x32x2xf32>
    tpu.vector_store %arg6[%c0_81, %c0_82, %c2_83], %69 {strides = array<i32>} : memref<1x32x4xf32, #tpu.memory_space<vmem>>, vector<1x32x2xf32>,
    return
  }
  func.func @transform_0(%arg0: i32) -> (i32, i32, i32) {
    %c0_i32 = arith.constant 0 : i32
    %c0_i32_0 = arith.constant 0 : i32
    %c0_i32_1 = arith.constant 0 : i32
    return %arg0, %c0_i32, %c0_i32_0 : i32, i32, i32
  }
  func.func @transform_1(%arg0: i32) -> (i32, i32) {
    %c0_i32 = arith.constant 0 : i32
    %c0_i32_0 = arith.constant 0 : i32
    %c0_i32_1 = arith.constant 0 : i32
    return %c0_i32, %c0_i32_0 : i32, i32
  }
  func.func @transform_2(%arg0: i32) -> (i32, i32) {
    %c0_i32 = arith.constant 0 : i32
    %c0_i32_0 = arith.constant 0 : i32
    %c0_i32_1 = arith.constant 0 : i32
    return %c0_i32, %c0_i32_0 : i32, i32
  }
  func.func @transform_3(%arg0: i32) -> (i32, i32) {
    %c0_i32 = arith.constant 0 : i32
    %c0_i32_0 = arith.constant 0 : i32
    %c0_i32_1 = arith.constant 0 : i32
    return %c0_i32, %c0_i32_0 : i32, i32
  }
  func.func @transform_4(%arg0: i32) -> (i32, i32) {
    %c0_i32 = arith.constant 0 : i32
    %c0_i32_0 = arith.constant 0 : i32
    %c0_i32_1 = arith.constant 0 : i32
    return %c0_i32, %c0_i32_0 : i32, i32
  }
  func.func @transform_5(%arg0: i32) -> (i32, i32, i32) {
    %c0_i32 = arith.constant 0 : i32
    %c0_i32_0 = arith.constant 0 : i32
    %c0_i32_1 = arith.constant 0 : i32
    return %arg0, %c0_i32, %c0_i32_0 : i32, i32, i32
  }
}

</mosaic_0001>

<bundles_post_ra>
// kernel: encoder_forward.4
= control target key start
LH: loop header
LB: loop body
LE: loop exit
PB: predicated region body
PF: predicated region fallthrough
CT: control target
= control target key end

     0   :  { %s1140_s18 = smov 0   ;;  %s1356_s0 = inlined_call_operand.vmem [shape: f32[2,8,256], index: 0, kind: input, shape index: {}]   ;;  %s1357_s1 = inlined_call_operand.vmem [shape: f32[16,72], index: 1, kind: input, shape index: {}]   ;;  %s1358_s2 = inlined_call_operand.vmem [shape: f32[16,1], index: 2, kind: input, shape index: {}]   ;;  %s1359_s3 = inlined_call_operand.vmem [shape: f32[16,144], index: 3, kind: input, shape index: {}]   ;;  %s1360_s4 = inlined_call_operand.vmem [shape: f32[16,1], index: 4, kind: input, shape index: {}]   ;;  %s1361_s5 = inlined_call_operand.vmem [shape: f32[2,16,144], index: 5, kind: output, shape index: {}]  }
   0x1 LB: > { %s985_s19 = sadd.s32 4294967295, %s1089_s18   ;;  %p989_p0 = scmp.ge.s32.totalorder %s1089_s18, 1  ;;  %s1089_s18 = sphi %s1140_s18, %s15_s18  }
   0x2   : > { %p187_p1 = scmp.lt.s32.totalorder %s1089_s18, 3 }
   0x4   : > { %p188_p2 = pnand %p989_p0, %p187_p1 }
   0x5   : > { %p215_p3 = scmp.lt.s32.totalorder (!%p188_p2), %s985_s19, 1  ;;  %vm228_vm0 = vcmask (!%p188_p2), 769024   ;;  %s1091_s24 = smov (!%p188_p2), 126   ;;  %v1098_v2 = vmov (!%p188_p2), 0.0   ;;  %v361_v3 = vld [vmem:[%s1358_s2] sm:$0xff] (!%p188_p2)  ;;  %v362_v4 = vld [vmem:[%s1358_s2 + $0x8] sm:$0xff] (!%p188_p2) }
   0x6   : > { %191 = sbr.rel (%p188_p2) target bundleno = 961 (0x3c1), region = 40  ;;  %s1092_s25 = smov (!%p188_p2), 127   ;;  %444 = vmatprep.mubr.f32.mxu0 (!%p188_p2), %v1098_v2  ;;  %v1100_v5 = vmov (!%p188_p2), 0   ;;  %vm252_vm1 = vcmask (!%p188_p2), 1031168   ;;  %vm238_vm2 = vcmask (!%p188_p2), 1039360   ;;  %vm266_vm3 = vcmask (!%p188_p2), 916480  }
   0x7   : > { %s1093_s26 = smov (!%p188_p2), 112   ;;  %s1094_s27 = smov (!%p188_p2), 111   ;;  %1081 = vset.pattern.permute.xlu0 (!%p188_p2), %v1100_v5  ;;  %1082 = vset.pattern.permute.xlu1 (!%p188_p2), %v1100_v5  ;;  %vm280_vm4 = vcmask (!%p188_p2), 908288   ;;  %vm294_vm5 = vcmask (!%p188_p2), 900096   ;;  %vm308_vm6 = vcmask (!%p188_p2), 785408   ;;  %vm322_vm7 = vcmask (!%p188_p2), 777216  }
   0x8   : > { %s1095_s28 = smov (!%p188_p2), 110   ;;  %s1096_s29 = smov (!%p188_p2), 96   ;;  %v341_v47 = vld [vmem:[%s1357_s1] sm:$0xff] (!%p188_p2)  ;;  %vm373_vm8 = vcmask (!%p188_p2), 588800   ;;  %v342_v48 = vld [vmem:[%s1357_s1 + $0x8] sm:$0xff] (!%p188_p2)  ;;  %vm465_vm9 = vcmask (!%p188_p2), 802544  }
   0x9   : > { %s1097_s30 = smov (!%p188_p2), 95   ;;  %s1099_s6 = smov (!%p188_p2), 94   ;;  %vm473_vm10 = vcmask (!%p188_p2), 523264   ;;  %v725_v5 = vld [vmem:[%s1360_s4] sm:$0xff] (!%p188_p2)  ;;  %vm737_vm11 = vcmask (!%p188_p2), 130048   ;;  %vm821_vm12 = vcmask (!%p188_p2), 97280  }
   0xa   : > { %s1101_s10 = smov (!%p188_p2), 124   ;;  %s1103_s11 = smov (!%p188_p2), 116   ;;  %vm832_vm13 = vcmask (!%p188_p2), 195680   ;;  %vm841_vm14 = vcmask (!%p188_p2), 294080   ;;  %vm850_vm15 = vcmask (!%p188_p2), 392480  }
   0xb   : > { %s1104_s12 = smov (!%p188_p2), 108   ;;  %s1105_s13 = smov (!%p188_p2), 104  }
   0xc   : > { %s1106_s14 = smov (!%p188_p2), 100   ;;  %s1107_s15 = smov (!%p188_p2), 92  }
   0xd   : > { %s1363_s19 = smov (!%p215_p3, %s985_s19), 1  ;;  %s1109_s16 = smov 84  }
   0xe   : > { %s1000_s20 = sshll.u32 %s1363_s19, 4 }
   0xf   : > { %s219_s23 = scalar_lea.vmem %s1356_s0, %s1000_s20 }
  0x10   : > { %v1154_v0 = vld [vmem:[%s219_s23] sm:$0xff]  ;;  %v245_v1 = vld [vmem:[%s219_s23 + $0x8] sm:$0xff] }
  0x11   : > { %248 = vrot.lane.b32.xlu1 %v1154_v0, %s1091_s24  ;;  %234 = vrot.lane.b32.xlu0 %v1154_v0, %s1092_s25  ;;  %229 = vst.msk [vmem:[#allocation2 + $0x8] sm:$0xff] %vm228_vm0, %v245_v1 }
  0x15   : > { %250 = vrot.lane.b32.xlu1 %v245_v1, %s1091_s24  ;;  %236 = vrot.lane.b32.xlu0 %v245_v1, %s1092_s25 }
  0x18   : > { %v344_v15 = vld [vmem:[#allocation2 + $0x8] sm:$0xff] }
  0x19   : > { %264 = vrot.lane.b32.xlu1 %v245_v1, %s1093_s26  ;;  %262 = vrot.lane.b32.xlu0 %v1154_v0, %s1093_s26 }
  0x1d   : > { %278 = vrot.lane.b32.xlu1 %v245_v1, %s1094_s27  ;;  %276 = vrot.lane.b32.xlu0 %v1154_v0, %s1094_s27 }
  0x21   : > { %292 = vrot.lane.b32.xlu1 %v245_v1, %s1095_s28  ;;  %290 = vrot.lane.b32.xlu0 %v1154_v0, %s1095_s28 }
  0x25   : > { %306 = vrot.lane.b32.xlu1 %v245_v1, %s1096_s29  ;;  %304 = vrot.lane.b32.xlu0 %v1154_v0, %s1096_s29 }
  0x29   : > { %320 = vrot.lane.b32.xlu1 %v245_v1, %s1097_s30  ;;  %318 = vrot.lane.b32.xlu0 %v1154_v0, %s1097_s30 }
  0x2d   : > { %334 = vrot.lane.b32.xlu1 %v245_v1, %s1099_s6  ;;  %332 = vrot.lane.b32.xlu0 %v1154_v0, %s1099_s6 }
  0x31   : > { %365 = vperm.xlu0 %1081, %v361_v3   ;;  %370 = vperm.xlu1 %1082, %v362_v4  }
  0x83   : > { %v249_v6 = vpop.permute.xlu1 %248  ;;  %v235_v7 = vpop.permute.xlu0 %234 }
  0x87   : > { %v251_v8 = vpop.permute.xlu1 %250  ;;  %v237_v9 = vpop.permute.xlu0 %236 }
  0x88   : > { %v253_v10 = vsel %vm252_vm1, %v249_v6, %v251_v8  ;;  %257 = vst.msk [vmem:[#allocation2 + $0x28] sm:$0xff] %vm228_vm0, %v251_v8  ;;  %v239_v11 = vsel %vm238_vm2, %v235_v7, %v237_v9  ;;  %243 = vst.msk [vmem:[#allocation2 + $0x18] sm:$0xff] %vm228_vm0, %v237_v9  ;;  %v686_v6 = vld [vmem:[%s1359_s3 + $0x8] sm:$0xff] }
  0x89   : > { %v1004_v21 = vpack.c.bf16 %v239_v11, %v1154_v0  ;;  %996 = vmatprep.mubr.msk.f32.mxu1 %vm737_vm11, %v686_v6  ;;  %v726_v7 = vld [vmem:[%s1360_s4 + $0x8] sm:$0xff] }
  0x8b   : > { %v265_v12 = vpop.permute.xlu1 %264  ;;  %v263_v13 = vpop.permute.xlu0 %262 }
  0x8c   : > { %271 = vst.msk [vmem:[#allocation2 + $0x38] sm:$0xff] %vm228_vm0, %v265_v12  ;;  %v267_v14 = vsel %vm266_vm3, %v263_v13, %v265_v12 }
  0x8d   : > { %v1008_v28 = vpack.c.bf16 %v267_v14, %v253_v10 }
  0x8f   : > { %v279_v16 = vpop.permute.xlu1 %278  ;;  %v277_v17 = vpop.permute.xlu0 %276  ;;  %v346_v18 = vld [vmem:[#allocation2 + $0x18] sm:$0xff]  ;;  %v348_v24 = vld [vmem:[#allocation2 + $0x28] sm:$0xff] }
  0x90   : > { %285 = vst.msk [vmem:[#allocation2 + $0x48] sm:$0xff] %vm228_vm0, %v279_v16  ;;  %v281_v19 = vsel %vm280_vm4, %v277_v17, %v279_v16  ;;  %v1002_v20 = vpack.c.bf16 %v346_v18, %v344_v15 }
  0x92   : > { %1003 = vmatprep.subr.bf16.mxu0 %v1002_v20 }
  0x93   : > { %v293_v22 = vpop.permute.xlu1 %292  ;;  %v291_v23 = vpop.permute.xlu0 %290  ;;  %1005 = vmatpush1.bf16.msra.mxu0 %v1004_v21  ;;  %v350_v25 = vld [vmem:[#allocation2 + $0x38] sm:$0xff] }
  0x94   : > { %299 = vst.msk [vmem:[#allocation2 + $0x58] sm:$0xff] %vm228_vm0, %v293_v22  ;;  %v295_v26 = vsel %vm294_vm5, %v291_v23, %v293_v22  ;;  %v1006_v27 = vpack.c.bf16 %v350_v25, %v348_v24 }
  0x95   : > { %v1012_v38 = vpack.c.bf16 %v295_v26, %v281_v19 }
  0x96   : > { %1007 = vmatprep.subr.bf16.mxu0 %v1006_v27 }
  0x97   : > { %v307_v29 = vpop.permute.xlu1 %306  ;;  %v305_v30 = vpop.permute.xlu0 %304  ;;  %1009 = vmatpush1.bf16.msra.mxu0 %v1008_v28  ;;  %v352_v34 = vld [vmem:[#allocation2 + $0x48] sm:$0xff] }
  0x98   : > { %313 = vst.msk [vmem:[#allocation2 + $0x68] sm:$0xff] %vm228_vm0, %v307_v29  ;;  %v309_v31 = vsel %vm308_vm6, %v305_v30, %v307_v29 }
  0x9b   : > { %v321_v32 = vpop.permute.xlu1 %320  ;;  %v319_v33 = vpop.permute.xlu0 %318  ;;  %v354_v35 = vld [vmem:[#allocation2 + $0x58] sm:$0xff] }
  0x9c   : > { %327 = vst.msk [vmem:[#allocation2 + $0x78] sm:$0xff] %vm228_vm0, %v321_v32  ;;  %v323_v36 = vsel %vm322_vm7, %v319_v33, %v321_v32  ;;  %v1010_v37 = vpack.c.bf16 %v354_v35, %v352_v34 }
  0x9d   : > { %v1016_v45 = vpack.c.bf16 %v323_v36, %v309_v31 }
  0x9e   : > { %1011 = vmatprep.subr.bf16.mxu0 %v1010_v37 }
  0x9f   : > { %1013 = vmatpush1.bf16.msra.mxu0 %v1012_v38  ;;  %v335_v39 = vpop.permute.xlu1 %334  ;;  %v333_v40 = vpop.permute.xlu0 %332  ;;  %v356_v42 = vld [vmem:[#allocation2 + $0x68] sm:$0xff] }
  0xa0   : > { %340 = vst.msk [vmem:[#allocation2 + $0x88] sm:$0xff] %vm228_vm0, %v335_v39  ;;  %v336_v41 = vsel %vm228_vm0, %v333_v40, %v335_v39 }
  0xa3   : > { %v358_v43 = vld [vmem:[#allocation2 + $0x78] sm:$0xff] }
  0xa4   : > { %v1014_v44 = vpack.c.bf16 %v358_v43, %v356_v42 }
  0xa6   : > { %1015 = vmatprep.subr.bf16.mxu0 %v1014_v44 }
  0xa7   : > { %1017 = vmatpush1.bf16.msra.mxu0 %v1016_v45  ;;  %v360_v46 = vld [vmem:[#allocation2 + $0x88] sm:$0xff] }
  0xa8   : > { %396 = vmatprep.subr.mxu0 %v360_v46 }
  0xab   : > { %397 = vmatpush1.msra.mxu0 %v336_v41 }
  0xac   : > { %994 = vmatmul.mubr.msk.f32.vlgmr.msra.gmra.mrb[0].mxu0 %vm373_vm8, %v341_v47 }
  0xad   : > { %450 = vmatprep.mubr.f32.mxu0 %v1098_v2 }
  0xb0   : > { %995 = vmatmul.mubr.msk.f32.gmra.mrb[2].mxu0 %vm373_vm8, %v342_v48  ;;  %v366_v49 = vpop.permute.xlu0 %365  ;;  %v371_v54 = vpop.permute.xlu1 %370  ;;  %vm927_vm8 = vcmask 130080  }
 0x17f   : > { %v446_v50 = vpop.f32.mrb[0].mxu0 }
 0x180   : > { %v447_v51 = vadd.f32 %v446_v50, %v366_v49  ;;  %v448_v52 = vpop.f32.mrb[1].mxu0 }
 0x181   : > { %v449_v53 = vadd.f32 %v448_v52, %v366_v49 }
 0x182   : > { %v457_v55 = vmax.f32 %v447_v51, 0.0 }
 0x183   : > { %v458_v56 = vmax.f32 %v449_v53, 0.0  ;;  %v452_v57 = vpop.f32.mrb[2].mxu0 }
 0x184   : > { %v453_v58 = vadd.f32 %v452_v57, %v371_v54  ;;  %v454_v59 = vpop.f32.mrb[3].mxu0  ;;  %485 = vrot.lane.b32.xlu1 %v457_v55, %s1092_s25 }
 0x185   : > { %462 = vst.msk [vmem:[#allocation3 + $0x8] sm:$0xff] %vm228_vm0, %v458_v56  ;;  %v455_v60 = vadd.f32 %v454_v59, %v371_v54 }
 0x186   : > { %466 = vst.msk [vmem:[#allocation3 + $0x8] sm:$0xff] %vm465_vm9, %v1098_v2  ;;  %v459_v61 = vmax.f32 %v453_v58, 0.0 }
 0x187   : > { %v460_v62 = vmax.f32 %v455_v60, 0.0 }
 0x188   : > { %511 = vrot.lane.b32.xlu1 %v457_v55, %s1091_s24  ;;  %v1020_v63 = vpack.c.bf16 %v459_v61, %v457_v55 }
 0x189   : > { %464 = vst.msk [vmem:[#allocation3 + $0x18] sm:$0xff] %vm228_vm0, %v460_v62 }
 0x18a   : > { %467 = vst.msk [vmem:[#allocation3 + $0x18] sm:$0xff] %vm465_vm9, %v1098_v2 }
 0x18c   : > { %537 = vrot.lane.b32.xlu1 %v457_v55, %s1093_s26 }
 0x18d   : > { %v478_v0 = vld [vmem:[#allocation3 + $0x8] sm:$0xff] }
 0x18e   : > { %487 = vrot.lane.b32.xlu0 %v478_v0, %s1092_s25  ;;  %474 = vst.msk [vmem:[#allocation4 + $0x8] sm:$0xff] %vm473_vm10, %v478_v0 }
 0x190   : > { %563 = vrot.lane.b32.xlu1 %v457_v55, %s1094_s27 }
 0x191   : > { %v471_v1 = vld [vmem:[#allocation3 + $0x18] sm:$0xff] }
 0x192   : > { %513 = vrot.lane.b32.xlu0 %v478_v0, %s1091_s24  ;;  %476 = vst.msk [vmem:[#allocation4 + $0x18] sm:$0xff] %vm473_vm10, %v471_v1 }
 0x194   : > { %589 = vrot.lane.b32.xlu1 %v457_v55, %s1095_s28 }
 0x195   : > { %v690_v2 = vld [vmem:[#allocation4 + $0x8] sm:$0xff] }
 0x196   : > { %539 = vrot.lane.b32.xlu0 %v478_v0, %s1093_s26 }
 0x198   : > { %615 = vrot.lane.b32.xlu1 %v457_v55, %s1096_s29 }
 0x199   : > { %v692_v3 = vld [vmem:[#allocation4 + $0x18] sm:$0xff] }
 0x19a   : > { %565 = vrot.lane.b32.xlu0 %v478_v0, %s1094_s27  ;;  %v1018_v4 = vpack.c.bf16 %v692_v3, %v690_v2 }
 0x19c   : > { %1019 = vmatprep.subr.bf16.mxu1 %v1018_v4  ;;  %641 = vrot.lane.b32.xlu1 %v457_v55, %s1097_s30 }
 0x19d   : > { %1021 = vmatpush1.bf16.msra.mxu1 %v1020_v63 }
 0x19e   : > { %591 = vrot.lane.b32.xlu0 %v478_v0, %s1095_s28 }
 0x1a0   : > { %667 = vrot.lane.b32.xlu1 %v457_v55, %s1099_s6 }
 0x1a2   : > { %617 = vrot.lane.b32.xlu0 %v478_v0, %s1096_s29 }
 0x1a4   : > { %489 = vrot.lane.b32.xlu1 %v459_v61, %s1092_s25 }
 0x1a6   : > { %643 = vrot.lane.b32.xlu0 %v478_v0, %s1097_s30 }
 0x1a8   : > { %515 = vrot.lane.b32.xlu1 %v459_v61, %s1091_s24 }
 0x1aa   : > { %669 = vrot.lane.b32.xlu0 %v478_v0, %s1099_s6 }
 0x1ac   : > { %541 = vrot.lane.b32.xlu1 %v459_v61, %s1093_s26 }
 0x1ae   : > { %491 = vrot.lane.b32.xlu0 %v471_v1, %s1092_s25 }
 0x1b0   : > { %567 = vrot.lane.b32.xlu1 %v459_v61, %s1094_s27 }
 0x1b2   : > { %517 = vrot.lane.b32.xlu0 %v471_v1, %s1091_s24 }
 0x1b4   : > { %593 = vrot.lane.b32.xlu1 %v459_v61, %s1095_s28 }
 0x1b6   : > { %543 = vrot.lane.b32.xlu0 %v471_v1, %s1093_s26 }
 0x1b8   : > { %619 = vrot.lane.b32.xlu1 %v459_v61, %s1096_s29 }
 0x1ba   : > { %569 = vrot.lane.b32.xlu0 %v471_v1, %s1094_s27 }
 0x1bc   : > { %645 = vrot.lane.b32.xlu1 %v459_v61, %s1097_s30 }
 0x1be   : > { %595 = vrot.lane.b32.xlu0 %v471_v1, %s1095_s28 }
 0x1c0   : > { %671 = vrot.lane.b32.xlu1 %v459_v61, %s1099_s6 }
 0x1c2   : > { %621 = vrot.lane.b32.xlu0 %v471_v1, %s1096_s29 }
 0x1c4   : > { %729 = vperm.xlu1 %1082, %v725_v5  }
 0x1c6   : > { %647 = vrot.lane.b32.xlu0 %v471_v1, %s1097_s30 }
 0x1ca   : > { %673 = vrot.lane.b32.xlu0 %v471_v1, %s1099_s6  ;;  %s1001_s6 = sshll.u32 %s1363_s19, 5  ;;  %s1102_s19 = smov 120  }
 0x1cb   : > { %s1321_s9 = scalar_lea.vmem %s1361_s5, %s1001_s6 }
 0x1ce   : > { %734 = vperm.xlu0 %1081, %v726_v7  }
 0x1f6   : > { %v486_v8 = vpop.permute.xlu1 %485 }
 0x1fa   : > { %v512_v9 = vpop.permute.xlu1 %511 }
 0x1fe   : > { %v538_v10 = vpop.permute.xlu1 %537 }
 0x200   : > { %v488_v11 = vpop.permute.xlu0 %487 }
 0x201   : > { %v493_v12 = vsel %vm238_vm2, %v486_v8, %v488_v11  ;;  %500 = vst.msk [vmem:[#allocation4 + $0x28] sm:$0xff] %vm473_vm10, %v488_v11 }
 0x202   : > { %v564_v13 = vpop.permute.xlu1 %563 }
 0x204   : > { %v514_v14 = vpop.permute.xlu0 %513 }
 0x205   : > { %v519_v15 = vsel %vm252_vm1, %v512_v9, %v514_v14  ;;  %526 = vst.msk [vmem:[#allocation4 + $0x48] sm:$0xff] %vm473_vm10, %v514_v14 }
 0x206   : > { %v590_v16 = vpop.permute.xlu1 %589 }
 0x208   : > { %v540_v17 = vpop.permute.xlu0 %539  ;;  %v694_v41 = vld [vmem:[#allocation4 + $0x28] sm:$0xff] }
 0x209   : > { %v545_v18 = vsel %vm266_vm3, %v538_v10, %v540_v17  ;;  %552 = vst.msk [vmem:[#allocation4 + $0x68] sm:$0xff] %vm473_vm10, %v540_v17 }
 0x20a   : > { %v616_v19 = vpop.permute.xlu1 %615 }
 0x20c   : > { %v566_v20 = vpop.permute.xlu0 %565  ;;  %v698_v48 = vld [vmem:[#allocation4 + $0x48] sm:$0xff] }
 0x20d   : > { %v1267_v21 = vsel %vm280_vm4, %v564_v13, %v566_v20  ;;  %578 = vst.msk [vmem:[#allocation4 + $0x88] sm:$0xff] %vm473_vm10, %v566_v20 }
 0x20e   : > { %v642_v22 = vpop.permute.xlu1 %641 }
 0x210   : > { %v592_v23 = vpop.permute.xlu0 %591  ;;  %v702_v55 = vld [vmem:[#allocation4 + $0x68] sm:$0xff] }
 0x211   : > { %v1271_v24 = vsel %vm294_vm5, %v590_v16, %v592_v23  ;;  %604 = vst.msk [vmem:[#allocation4 + $0xa8] sm:$0xff] %vm473_vm10, %v592_v23 }
 0x212   : > { %v668_v25 = vpop.permute.xlu1 %667 }
 0x214   : > { %v618_v26 = vpop.permute.xlu0 %617  ;;  %v706_v61 = vld [vmem:[#allocation4 + $0x88] sm:$0xff] }
 0x215   : > { %v1275_v27 = vsel %vm308_vm6, %v616_v19, %v618_v26  ;;  %630 = vst.msk [vmem:[#allocation4 + $0xc8] sm:$0xff] %vm473_vm10, %v618_v26  ;;  %v687_v26 = vld [vmem:[%s1359_s3 + $0x10] sm:$0xff] }
 0x216   : > { %v490_v28 = vpop.permute.xlu1 %489 }
 0x218   : > { %v644_v29 = vpop.permute.xlu0 %643  ;;  %v710_v4 = vld [vmem:[#allocation4 + $0xa8] sm:$0xff] }
 0x219   : > { %v1279_v30 = vsel %vm322_vm7, %v642_v22, %v644_v29  ;;  %656 = vst.msk [vmem:[#allocation4 + $0xe8] sm:$0xff] %vm473_vm10, %v644_v29 }
 0x21a   : > { %v516_v31 = vpop.permute.xlu1 %515 }
 0x21c   : > { %v670_v32 = vpop.permute.xlu0 %669  ;;  %v714_v11 = vld [vmem:[#allocation4 + $0xc8] sm:$0xff] }
 0x21d   : > { %v1283_v33 = vsel %vm228_vm0, %v668_v25, %v670_v32  ;;  %682 = vst.msk [vmem:[#allocation4 + $0x108] sm:$0xff] %vm473_vm10, %v670_v32  ;;  %v688_v25 = vld [vmem:[%s1359_s3 + $0x18] sm:$0xff] }
 0x21e   : > { %v542_v34 = vpop.permute.xlu1 %541 }
 0x220   : > { %v492_v35 = vpop.permute.xlu0 %491  ;;  %v718_v16 = vld [vmem:[#allocation4 + $0xe8] sm:$0xff] }
 0x221   : > { %v494_v36 = vsel %vm238_vm2, %v490_v28, %v492_v35  ;;  %502 = vst.msk [vmem:[#allocation4 + $0x38] sm:$0xff] %vm473_vm10, %v492_v35  ;;  %vm877_vm2 = vcmask 687680  }
 0x222   : > { %v568_v38 = vpop.permute.xlu1 %567  ;;  %v1024_v45 = vpack.c.bf16 %v494_v36, %v493_v12 }
 0x224   : > { %v518_v37 = vpop.permute.xlu0 %517  ;;  %v722_v20 = vld [vmem:[#allocation4 + $0x108] sm:$0xff] }
 0x225   : > { %v520_v39 = vsel %vm252_vm1, %v516_v31, %v518_v37  ;;  %528 = vst.msk [vmem:[#allocation4 + $0x58] sm:$0xff] %vm473_vm10, %v518_v37  ;;  %vm868_vm1 = vcmask 589280  }
 0x226   : > { %v594_v46 = vpop.permute.xlu1 %593  ;;  %v1028_v52 = vpack.c.bf16 %v520_v39, %v519_v15 }
 0x228   : > { %v544_v40 = vpop.permute.xlu0 %543  ;;  %v696_v42 = vld [vmem:[#allocation4 + $0x38] sm:$0xff] }
 0x229   : > { %v546_v43 = vsel %vm266_vm3, %v542_v34, %v544_v40  ;;  %554 = vst.msk [vmem:[#allocation4 + $0x78] sm:$0xff] %vm473_vm10, %v544_v40  ;;  %v1022_v44 = vpack.c.bf16 %v696_v42, %v694_v41  ;;  %vm886_vm3 = vcmask 786080  }
 0x22a   : > { %v620_v54 = vpop.permute.xlu1 %619  ;;  %v1032_v59 = vpack.c.bf16 %v546_v43, %v545_v18 }
 0x22b   : > { %1023 = vmatprep.subr.bf16.mxu1 %v1022_v44 }
 0x22c   : > { %v570_v47 = vpop.permute.xlu0 %569  ;;  %1025 = vmatpush1.bf16.msra.mxu1 %v1024_v45  ;;  %v700_v49 = vld [vmem:[#allocation4 + $0x58] sm:$0xff] }
 0x22d   : > { %v572_v50 = vsel %vm280_vm4, %v568_v38, %v570_v47  ;;  %580 = vst.msk [vmem:[#allocation4 + $0x98] sm:$0xff] %vm473_vm10, %v570_v47  ;;  %v1026_v51 = vpack.c.bf16 %v700_v49, %v698_v48  ;;  %vm897_vm4 = vcmask 884480  }
 0x22e   : > { %v646_v1 = vpop.permute.xlu1 %645  ;;  %v1036_v2 = vpack.c.bf16 %v572_v50, %v1267_v21 }
 0x22f   : > { %1027 = vmatprep.subr.bf16.mxu1 %v1026_v51 }
 0x230   : > { %v596_v53 = vpop.permute.xlu0 %595  ;;  %1029 = vmatpush1.bf16.msra.mxu1 %v1028_v52  ;;  %v704_v56 = vld [vmem:[#allocation4 + $0x78] sm:$0xff] }
 0x231   : > { %v598_v57 = vsel %vm294_vm5, %v594_v46, %v596_v53  ;;  %606 = vst.msk [vmem:[#allocation4 + $0xb8] sm:$0xff] %vm473_vm10, %v596_v53  ;;  %v1030_v58 = vpack.c.bf16 %v704_v56, %v702_v55  ;;  %vm906_vm5 = vcmask 982880  }
 0x232   : > { %v1040_v8 = vpack.c.bf16 %v598_v57, %v1271_v24  ;;  %v672_v9 = vpop.permute.xlu1 %671  ;;  %v685_v24 = vld [vmem:[%s1359_s3] sm:$0xff] }
 0x233   : > { %1031 = vmatprep.subr.bf16.mxu1 %v1030_v58 }
 0x234   : > { %v622_v60 = vpop.permute.xlu0 %621  ;;  %1033 = vmatpush1.bf16.msra.mxu1 %v1032_v59  ;;  %v708_v62 = vld [vmem:[#allocation4 + $0x98] sm:$0xff] }
 0x235   : > { %v624_v63 = vsel %vm308_vm6, %v620_v54, %v622_v60  ;;  %632 = vst.msk [vmem:[#allocation4 + $0xd8] sm:$0xff] %vm473_vm10, %v622_v60  ;;  %v1034_v0 = vpack.c.bf16 %v708_v62, %v706_v61  ;;  %vm915_vm6 = vcmask 1048512  }
 0x236   : > { %v1044_v15 = vpack.c.bf16 %v624_v63, %v1275_v27 }
 0x237   : > { %1035 = vmatprep.subr.bf16.mxu1 %v1034_v0 }
 0x238   : > { %v648_v3 = vpop.permute.xlu0 %647  ;;  %1037 = vmatpush1.bf16.msra.mxu1 %v1036_v2  ;;  %v712_v5 = vld [vmem:[#allocation4 + $0xb8] sm:$0xff] }
 0x239   : > { %v650_v6 = vsel %vm322_vm7, %v646_v1, %v648_v3  ;;  %658 = vst.msk [vmem:[#allocation4 + $0xf8] sm:$0xff] %vm473_vm10, %v648_v3  ;;  %v1038_v7 = vpack.c.bf16 %v712_v5, %v710_v4  ;;  %vm917_vm7 = vcmask 31744  }
 0x23a   : > { %v1048_v19 = vpack.c.bf16 %v650_v6, %v1279_v30 }
 0x23b   : > { %1039 = vmatprep.subr.bf16.mxu1 %v1038_v7 }
 0x23c   : > { %v674_v10 = vpop.permute.xlu0 %673  ;;  %1041 = vmatpush1.bf16.msra.mxu1 %v1040_v8  ;;  %v716_v12 = vld [vmem:[#allocation4 + $0xd8] sm:$0xff] }
 0x23d   : > { %v676_v13 = vsel %vm228_vm0, %v672_v9, %v674_v10  ;;  %684 = vst.msk [vmem:[#allocation4 + $0x118] sm:$0xff] %vm473_vm10, %v674_v10  ;;  %v1042_v14 = vpack.c.bf16 %v716_v12, %v714_v11  ;;  %vm859_vm0 = vcmask 490880  }
 0x23e   : > { %v1052_v23 = vpack.c.bf16 %v676_v13, %v1283_v33 }
 0x23f   : > { %1043 = vmatprep.subr.bf16.mxu1 %v1042_v14 }
 0x240   : > { %1045 = vmatpush1.bf16.msra.mxu1 %v1044_v15  ;;  %v720_v17 = vld [vmem:[#allocation4 + $0xf8] sm:$0xff] }
 0x241   : > { %v1046_v18 = vpack.c.bf16 %v720_v17, %v718_v16 }
 0x243   : > { %1047 = vmatprep.subr.bf16.mxu1 %v1046_v18  ;;  %v730_v27 = vpop.permute.xlu1 %729 }
 0x244   : > { %1049 = vmatpush1.bf16.msra.mxu1 %v1048_v19  ;;  %v724_v21 = vld [vmem:[#allocation4 + $0x118] sm:$0xff] }
 0x245   : > { %v1050_v22 = vpack.c.bf16 %v724_v21, %v722_v20 }
 0x247   : > { %1051 = vmatprep.subr.bf16.mxu1 %v1050_v22 }
 0x248   : > { %1053 = vmatpush1.bf16.msra.mxu1 %v1052_v23 }
 0x24b   : > { %809 = vmatmul.mubr.f32.vlgmr.msra.gmra.mrb[0].mxu1 %v685_v24 }
 0x24c   : > { %997 = vmatprep.mubr.msk.f32.mxu1 %vm737_vm11, %v688_v25 }
 0x24d   : > { %v735_v31 = vpop.permute.xlu0 %734 }
 0x24f   : > { %815 = vmatmul.mubr.f32.gmra.mrb[2].mxu1 %v687_v26 }
 0x31e   : > { %v810_v28 = vpop.f32.mrb[0].mxu1 }
 0x31f   : > { %v811_v29 = vadd.f32 %v810_v28, %v730_v27  ;;  %v812_v30 = vpop.f32.mrb[1].mxu1 }
 0x320   : > { %v813_v35 = vadd.f32 %v812_v30, %v730_v27 }
 0x321   : > { %826 = vrot.lane.b32.xlu1 %v811_v29, %s1101_s10  ;;  %822 = vst.msk [vmem:[%s1321_s9] sm:$0xff] %vm821_vm12, %v811_v29 }
 0x322   : > { %v816_v32 = vpop.f32.mrb[2].mxu1 }
 0x323   : > { %v817_v33 = vadd.f32 %v816_v32, %v735_v31  ;;  %v818_v34 = vpop.f32.mrb[3].mxu1 }
 0x324   : > { %v819_v36 = vadd.f32 %v818_v34, %v735_v31 }
 0x325   : > { %828 = vrot.lane.b32.xlu0 %v817_v33, %s1101_s10  ;;  %835 = vrot.lane.b32.xlu1 %v811_v29, %s1102_s19  ;;  %823 = vst.msk [vmem:[%s1321_s9 + $0x10] sm:$0xff] %vm821_vm12, %v817_v33 }
 0x329   : > { %837 = vrot.lane.b32.xlu0 %v817_v33, %s1102_s19  ;;  %844 = vrot.lane.b32.xlu1 %v811_v29, %s1103_s11 }
 0x32d   : > { %846 = vrot.lane.b32.xlu0 %v817_v33, %s1103_s11  ;;  %853 = vrot.lane.b32.xlu1 %v811_v29, %s1093_s26 }
 0x331   : > { %855 = vrot.lane.b32.xlu0 %v817_v33, %s1093_s26  ;;  %862 = vrot.lane.b32.xlu1 %v811_v29, %s1104_s12  ;;  %s1108_s26 = smov 88  }
 0x335   : > { %864 = vrot.lane.b32.xlu0 %v817_v33, %s1104_s12  ;;  %871 = vrot.lane.b32.xlu1 %v811_v29, %s1105_s13 }
 0x339   : > { %873 = vrot.lane.b32.xlu0 %v817_v33, %s1105_s13  ;;  %880 = vrot.lane.b32.xlu1 %v811_v29, %s1106_s14 }
 0x33d   : > { %882 = vrot.lane.b32.xlu0 %v817_v33, %s1106_s14  ;;  %891 = vrot.lane.b32.xlu1 %v813_v35, %s1096_s29 }
 0x341   : > { %893 = vrot.lane.b32.xlu0 %v819_v36, %s1096_s29  ;;  %900 = vrot.lane.b32.xlu1 %v813_v35, %s1107_s15 }
 0x345   : > { %902 = vrot.lane.b32.xlu0 %v819_v36, %s1107_s15  ;;  %909 = vrot.lane.b32.xlu1 %v813_v35, %s1108_s26 }
 0x349   : > { %911 = vrot.lane.b32.xlu0 %v819_v36, %s1108_s26  ;;  %921 = vrot.lane.b32.xlu1 %v813_v35, %s1109_s16 }
 0x34d   : > { %923 = vrot.lane.b32.xlu0 %v819_v36, %s1109_s16 }
 0x393   : > { %v827_v37 = vpop.permute.xlu1 %826 }
 0x394   : > { %833 = vst.msk [vmem:[%s1321_s9] sm:$0xff] %vm832_vm13, %v827_v37 }
 0x397   : > { %v829_v38 = vpop.permute.xlu0 %828  ;;  %v836_v39 = vpop.permute.xlu1 %835 }
 0x398   : > { %834 = vst.msk [vmem:[%s1321_s9 + $0x10] sm:$0xff] %vm832_vm13, %v829_v38 }
 0x399   : > { %842 = vst.msk [vmem:[%s1321_s9] sm:$0xff] %vm841_vm14, %v836_v39 }
 0x39b   : > { %v838_v40 = vpop.permute.xlu0 %837  ;;  %v845_v41 = vpop.permute.xlu1 %844 }
 0x39c   : > { %843 = vst.msk [vmem:[%s1321_s9 + $0x10] sm:$0xff] %vm841_vm14, %v838_v40 }
 0x39d   : > { %851 = vst.msk [vmem:[%s1321_s9] sm:$0xff] %vm850_vm15, %v845_v41 }
 0x39f   : > { %v847_v42 = vpop.permute.xlu0 %846  ;;  %v854_v43 = vpop.permute.xlu1 %853 }
 0x3a0   : > { %852 = vst.msk [vmem:[%s1321_s9 + $0x10] sm:$0xff] %vm850_vm15, %v847_v42 }
 0x3a1   : > { %860 = vst.msk [vmem:[%s1321_s9] sm:$0xff] %vm859_vm0, %v854_v43 }
 0x3a3   : > { %v856_v44 = vpop.permute.xlu0 %855  ;;  %v863_v45 = vpop.permute.xlu1 %862 }
 0x3a4   : > { %861 = vst.msk [vmem:[%s1321_s9 + $0x10] sm:$0xff] %vm859_vm0, %v856_v44 }
 0x3a5   : > { %869 = vst.msk [vmem:[%s1321_s9] sm:$0xff] %vm868_vm1, %v863_v45 }
 0x3a7   : > { %v865_v46 = vpop.permute.xlu0 %864  ;;  %v872_v47 = vpop.permute.xlu1 %871 }
 0x3a8   : > { %870 = vst.msk [vmem:[%s1321_s9 + $0x10] sm:$0xff] %vm868_vm1, %v865_v46 }
 0x3a9   : > { %878 = vst.msk [vmem:[%s1321_s9] sm:$0xff] %vm877_vm2, %v872_v47 }
 0x3ab   : > { %v874_v48 = vpop.permute.xlu0 %873  ;;  %v881_v49 = vpop.permute.xlu1 %880 }
 0x3ac   : > { %879 = vst.msk [vmem:[%s1321_s9 + $0x10] sm:$0xff] %vm877_vm2, %v874_v48 }
 0x3ad   : > { %887 = vst.msk [vmem:[%s1321_s9] sm:$0xff] %vm886_vm3, %v881_v49 }
 0x3af   : > { %v883_v50 = vpop.permute.xlu0 %882  ;;  %v892_v51 = vpop.permute.xlu1 %891 }
 0x3b0   : > { %888 = vst.msk [vmem:[%s1321_s9 + $0x10] sm:$0xff] %vm886_vm3, %v883_v50 }
 0x3b1   : > { %898 = vst.msk [vmem:[%s1321_s9] sm:$0xff] %vm897_vm4, %v892_v51 }
 0x3b3   : > { %v894_v52 = vpop.permute.xlu0 %893  ;;  %v901_v53 = vpop.permute.xlu1 %900 }
 0x3b4   : > { %899 = vst.msk [vmem:[%s1321_s9 + $0x10] sm:$0xff] %vm897_vm4, %v894_v52 }
 0x3b5   : > { %907 = vst.msk [vmem:[%s1321_s9] sm:$0xff] %vm906_vm5, %v901_v53 }
 0x3b7   : > { %v903_v54 = vpop.permute.xlu0 %902  ;;  %v910_v55 = vpop.permute.xlu1 %909 }
 0x3b8   : > { %908 = vst.msk [vmem:[%s1321_s9 + $0x10] sm:$0xff] %vm906_vm5, %v903_v54 }
 0x3b9   : > { %916 = vst.msk [vmem:[%s1321_s9] sm:$0xff] %vm915_vm6, %v910_v55 }
 0x3ba   : > { %918 = vst.msk [vmem:[%s1321_s9 + $0x8] sm:$0xff] %vm917_vm7, %v910_v55 }
 0x3bb   : > { %v912_v56 = vpop.permute.xlu0 %911  ;;  %v922_v57 = vpop.permute.xlu1 %921 }
 0x3bc   : > { %919 = vst.msk [vmem:[%s1321_s9 + $0x10] sm:$0xff] %vm915_vm6, %v912_v56 }
 0x3bd   : > { %920 = vst.msk [vmem:[%s1321_s9 + $0x18] sm:$0xff] %vm917_vm7, %v912_v56 }
 0x3be   : > { %928 = vst.msk [vmem:[%s1321_s9 + $0x8] sm:$0xff] %vm927_vm8, %v922_v57 }
 0x3bf   : > { %v924_v58 = vpop.permute.xlu0 %923 }
 0x3c0   : > { %929 = vst.msk [vmem:[%s1321_s9 + $0x18] sm:$0xff] %vm927_vm8, %v924_v58 }
 0x3c1 PF: > { %s15_s18 = sadd.s32 1, %s1089_s18  }
 0x3c2   : > { %p12_p4 = scmp.ge.s32.totalorder %s15_s18, 4  }
 0x3c4   :  { %14 = sbr.rel (!%p12_p4) target bundleno = 1 (0x1), region = 70 }

// kernel: encoder_forward.3
= control target key start
LH: loop header
LB: loop body
LE: loop exit
PB: predicated region body
PF: predicated region fallthrough
CT: control target
= control target key end

     0   :  { %s3088_s18 = smov 0   ;;  %s3998_s0 = inlined_call_operand.vmem [shape: f32[2,3,1296], index: 0, kind: input, shape index: {}]   ;;  %s3999_s1 = inlined_call_operand.vmem [shape: f32[8,27], index: 1, kind: input, shape index: {}]   ;;  %s4000_s2 = inlined_call_operand.vmem [shape: f32[8,1], index: 2, kind: input, shape index: {}]   ;;  %s4001_s3 = inlined_call_operand.vmem [shape: f32[8,72], index: 3, kind: input, shape index: {}]   ;;  %s4002_s4 = inlined_call_operand.vmem [shape: f32[8,1], index: 4, kind: input, shape index: {}]   ;;  %s4003_s5 = inlined_call_operand.vmem [shape: f32[2,8,1024], index: 5, kind: output, shape index: {}]  }
   0x1 LB: > { %s2562_s19 = sadd.s32 4294967295, %s3014_s18   ;;  %p2566_p0 = scmp.ge.s32.totalorder %s3014_s18, 1  ;;  %s3014_s18 = sphi %s3088_s18, %s15_s18  }
   0x2   : > { %p187_p1 = scmp.lt.s32.totalorder %s3014_s18, 3 }
   0x4   : > { %p188_p2 = pnand %p2566_p0, %p187_p1 }
   0x5   : > { %p215_p3 = scmp.lt.s32.totalorder (!%p188_p2), %s2562_s19, 1  ;;  %s3016_s24 = smov (!%p188_p2), 91   ;;  %vm4004_vm0 = vcmask (!%p188_p2), 1039360   ;;  %vm530_vm1 = vcmask (!%p188_p2), 744448   ;;  %vm464_vm2 = vcmask (!%p188_p2), 752640   ;;  %vm377_vm3 = vcmask (!%p188_p2), 1031168  }
   0x6   : > { %191 = sbr.rel (%p188_p2) target bundleno = 1086 (0x43e), region = 40  ;;  %s3017_s25 = smov (!%p188_p2), 126   ;;  %vm606_vm4 = vcmask (!%p188_p2), 736256   ;;  %vm254_vm5 = vcmask (!%p188_p2), 567296   ;;  %vm698_vm6 = vcmask (!%p188_p2), 457728   ;;  %vm780_vm7 = vcmask (!%p188_p2), 449536  }
   0x7   : > { %s3018_s26 = smov (!%p188_p2), 127   ;;  %s3019_s27 = smov (!%p188_p2), 92   ;;  %vm851_vm8 = vcmask (!%p188_p2), 441344   ;;  %vm933_vm9 = vcmask (!%p188_p2), 1042432   ;;  %vm3025_vm10 = vmmov (!%p188_p2), 1   ;;  %vm929_vm12 = vcmask (!%p188_p2), 220160  }
   0x8   : > { %s3020_s28 = smov (!%p188_p2), 90   ;;  %s3021_s29 = smov (!%p188_p2), 56   ;;  %vm3368_vm11 = vmpackc.low (!%p188_p2), %vm933_vm9, %vm3025_vm10  ;;  %vm330_vm13 = vcmask (!%p188_p2), 570371   ;;  %vm406_vm14 = vcmask (!%p188_p2), 572422   ;;  %vm417_vm15 = vcmask (!%p188_p2), 565248   ;;  %vm493_vm9 = vcmask (!%p188_p2), 568321  }
   0x9   : > { %s3022_s30 = smov (!%p188_p2), 55   ;;  %s3023_s6 = smov (!%p188_p2), 54   ;;  %vm559_vm10 = vcmask (!%p188_p2), 571396  }
   0xa   : > { %s3029_s21 = smov (!%p188_p2), 116   ;;  %s3030_s22 = smov (!%p188_p2), 124  }
   0xb   : > { %s3039_s7 = smov (!%p188_p2), 72   ;;  %s3040_s8 = smov (!%p188_p2), 76  }
   0xc   : > { %s3041_s9 = smov (!%p188_p2), 84   ;;  %s3042_s10 = smov (!%p188_p2), 64  }
   0xd   : > { %s4022_s19 = smov (!%p215_p3, %s2562_s19), 1  ;;  %s3044_s11 = smov 48  }
   0xe   : > { %s2750_s20 = smul.u32 44, %s4022_s19  ;;  %s2592_s15 = sshll.u32 %s4022_s19, 6 }
   0xf   : > { %s3031_s19 = smov 112   ;;  %s3045_s12 = smov 68  }
  0x10   : > { %s3102_s23 = scalar_lea.vmem %s3998_s0, %s2750_s20  ;;  %s3917_s20 = scalar_lea.vmem %s4003_s5, %s2592_s15 }
  0x11   : > { %v495_v0 = vld [vmem:[%s3102_s23] sm:$0x77]  ;;  %v3106_v1 = vld [vmem:[%s3102_s23 + $0x8] sm:$0x77]  ;;  %v258_v48 = vld [vmem:[%s3102_s23 + $0x10] sm:$0x77] }
  0x12   : > { %v3109_v2 = vld [vmem:[%s3102_s23 + $0x8] sm:$0x77]  ;;  %512 = vrot.lane.b32.xlu0 %v495_v0, %s3016_s24  ;;  %v349_v3 = vrot.slane %v3106_v1, 2  ;;  %v256_v6 = vld [vmem:[%s3102_s23] sm:$0x77]  ;;  %v505_v27 = vcombine.low %v495_v0, %v495_v0  ;;  %v343_v49 = vcombine.high %v3106_v1, %v3106_v1  ;;  %v275_v51 = vrot.slane %v258_v48, 5 }
  0x13   : > { %v273_v4 = vrot.slane %v3109_v2, 5  ;;  %v3115_v5 = vld [vmem:[%s3102_s23 + $0x8] sm:$0x77]  ;;  %v266_v7 = vcombine.high %v256_v6, %v256_v6  ;;  %v419_v8 = vld [vmem:[%s3102_s23] sm:$0x77]  ;;  %v271_v23 = vrot.slane %v256_v6, 5  ;;  %v267_v46 = vcombine.high %v3109_v2, %v3109_v2 }
  0x14   : > { %361 = vrot.lane.b32.xlu1 %v349_v3, %s3017_s25  ;;  %v436_v9 = vrot.slane %v3115_v5, 7  ;;  %v3122_v10 = vld [vmem:[%s3102_s23 + $0x8] sm:$0x77]  ;;  %v332_v11 = vld [vmem:[%s3102_s23] sm:$0x77]  ;;  %v429_v13 = vcombine.high %v419_v8, %v419_v8  ;;  %v434_v26 = vrot.slane %v419_v8, 7  ;;  %v430_v54 = vcombine.high %v3115_v5, %v3115_v5 }
  0x15   : > { %v272_v12 = vrot.slane %v266_v7, 5  ;;  %v561_v14 = vld [vmem:[%s3102_s23] sm:$0x77]  ;;  %v506_v15 = vcombine.low %v3122_v10, %v3122_v10  ;;  %v342_v16 = vcombine.high %v332_v11, %v332_v11  ;;  %v3133_v20 = vld [vmem:[%s3102_s23 + $0x8] sm:$0x77]  ;;  %v347_v24 = vrot.slane %v332_v11, 2 }
  0x16   : > { %285 = vrot.lane.b32.xlu0 %v273_v4, %s3018_s26  ;;  %v435_v17 = vrot.slane %v429_v13, 7  ;;  %v571_v18 = vcombine.high %v561_v14, %v561_v14  ;;  %v578_v22 = vrot.slane %v3133_v20, 1  ;;  %v648_v25 = vld [vmem:[%s3102_s23] sm:$0x77]  ;;  %v576_v32 = vrot.slane %v561_v14, 1  ;;  %s3046_s13 = smov 52  }
  0x17   : > { %v348_v19 = vrot.slane %v342_v16, 2  ;;  %v660_v28 = vcombine.high %v648_v25, %v648_v25  ;;  %v225_v29 = vld [vmem:[%s3102_s23] sm:$0x77]  ;;  %v649_v33 = vld [vmem:[%s3102_s23 + $0x8] sm:$0x77]  ;;  %v665_v43 = vrot.slane %v648_v25, 6  ;;  %v572_v60 = vcombine.high %v3133_v20, %v3133_v20 }
  0x18   : > { %448 = vrot.lane.b32.xlu1 %v436_v9, %s3019_s27  ;;  %v577_v21 = vrot.slane %v571_v18, 1  ;;  %v730_v30 = vld [vmem:[%s3102_s23] sm:$0x77]  ;;  %v235_v31 = vcombine.high %v225_v29, %v225_v29  ;;  %245 = vst [vmem:[#allocation2] sm:$0x7] %v225_v29  ;;  %v667_v36 = vrot.slane %v649_v33, 6  ;;  %v661_v0 = vcombine.high %v649_v33, %v649_v33 }
  0x19   : > { %v666_v34 = vrot.slane %v660_v28, 6  ;;  %v742_v35 = vcombine.high %v730_v30, %v730_v30  ;;  %v731_v37 = vld [vmem:[%s3102_s23 + $0x8] sm:$0x77]  ;;  %v812_v39 = vld [vmem:[%s3102_s23] sm:$0x77]  ;;  %v747_v45 = vrot.slane %v730_v30, 3 }
  0x1a   : > { %283 = vrot.lane.b32.xlu0 %v272_v12, %s3018_s26  ;;  %246 = vst [vmem:[#allocation2 + $0x8] sm:$0x7] %v235_v31  ;;  %v749_v40 = vrot.slane %v731_v37, 3  ;;  %v824_v41 = vcombine.high %v812_v39, %v812_v39  ;;  %v3156_v42 = vld [vmem:[%s3102_s23 + $0x8] sm:$0x77]  ;;  %v274_v50 = vrot.slane %v267_v46, 5  ;;  %v743_v4 = vcombine.high %v731_v37, %v731_v37 }
  0x1b   : > { %v748_v38 = vrot.slane %v742_v35, 3  ;;  %v226_v44 = vld [vmem:[%s3102_s23 + $0x8] sm:$0x77]  ;;  %v334_v52 = vld [vmem:[%s3102_s23 + $0x10] sm:$0x77]  ;;  %v350_v53 = vrot.slane %v343_v49, 2  ;;  %v825_v11 = vcombine.high %v3156_v42, %v3156_v42  ;;  %v268_v12 = vcombine.high %v258_v48, %v258_v48 }
  0x1c   : > { %514 = vrot.lane.b32.xlu1 %v506_v15, %s3016_s24  ;;  %v236_v47 = vcombine.high %v226_v44, %v226_v44  ;;  %247 = vst [vmem:[#allocation2 + $0x10] sm:$0x7] %v226_v44  ;;  %v351_v55 = vrot.slane %v334_v52, 2  ;;  %v421_v56 = vld [vmem:[%s3102_s23 + $0x10] sm:$0x77]  ;;  %v437_v57 = vrot.slane %v430_v54, 7 }
  0x1d   : > { %v438_v58 = vrot.slane %v421_v56, 7  ;;  %v497_v59 = vld [vmem:[%s3102_s23 + $0x10] sm:$0x77]  ;;  %v579_v63 = vrot.slane %v572_v60, 1  ;;  %v668_v3 = vrot.slane %v661_v0, 6  ;;  %v3024_v5 = vmov 0.0  }
  0x1e   : > { %446 = vrot.lane.b32.xlu0 %v435_v17, %s3019_s27  ;;  %248 = vst [vmem:[#allocation2 + $0x18] sm:$0x7] %v236_v47  ;;  %v507_v61 = vcombine.low %v497_v59, %v497_v59  ;;  %v563_v62 = vld [vmem:[%s3102_s23 + $0x10] sm:$0x77]  ;;  %1028 = vmatprep.mubr.f32.mxu0 %v3024_v5  ;;  %v750_v8 = vrot.slane %v743_v4, 3  ;;  %v276_v16 = vrot.slane %v268_v12, 5  ;;  %v344_v17 = vcombine.high %v334_v52, %v334_v52 }
  0x1f   : > { %v580_v1 = vrot.slane %v563_v62, 1  ;;  %v3188_v2 = vld [vmem:[%s3102_s23 + $0x10] sm:$0x77]  ;;  %1241 = vmatprep.mubr.f32.mxu1 %v3024_v5  ;;  %v259_v15 = vld [vmem:[%s3102_s23 + $0x18] sm:$0x77]  ;;  %s3047_s14 = smov 44  }
  0x20   : > { %359 = vrot.lane.b32.xlu1 %v348_v19, %s3017_s25  ;;  %v669_v6 = vrot.slane %v3188_v2, 6  ;;  %v3196_v7 = vld [vmem:[%s3102_s23 + $0x10] sm:$0x77]  ;;  %v277_v18 = vrot.slane %v259_v15, 5  ;;  %v335_v19 = vld [vmem:[%s3102_s23 + $0x18] sm:$0x77] }
  0x21   : > { %v751_v9 = vrot.slane %v3196_v7, 3  ;;  %v3207_v14 = vld [vmem:[%s3102_s23 + $0x10] sm:$0x77]  ;;  %v352_v20 = vrot.slane %v344_v17, 2  ;;  %v564_v29 = vld [vmem:[%s3102_s23 + $0x18] sm:$0x77]  ;;  %v345_v37 = vcombine.high %v335_v19, %v335_v19 }
  0x22   : > { %588 = vrot.lane.b32.xlu0 %v577_v21, %s3020_s28  ;;  %v431_v21 = vcombine.high %v421_v56, %v421_v56  ;;  %v228_v30 = vld [vmem:[%s3102_s23 + $0x18] sm:$0x77]  ;;  %v3227_v35 = vld [vmem:[%s3102_s23 + $0x20] sm:$0x77]  ;;  %v574_v47 = vcombine.high %v564_v29, %v564_v29  ;;  %s3048_s15 = smov 32   ;;  %s3049_s16 = smov 28  }
  0x23   : > { %v238_v33 = vcombine.high %v228_v30, %v228_v30  ;;  %251 = vst [vmem:[#allocation2 + $0x30] sm:$0x7] %v228_v30  ;;  %v3245_v46 = vld [vmem:[%s3102_s23 + $0x20] sm:$0x77]  ;;  %v651_v54 = vld [vmem:[%s3102_s23 + $0x18] sm:$0x77] }
  0x24   : > { %590 = vrot.lane.b32.xlu1 %v578_v22, %s3020_s28  ;;  %v353_v22 = vrot.slane %v335_v19, 2  ;;  %v509_v48 = vcombine.low %v3245_v46, %v3245_v46  ;;  %v3252_v49 = vld [vmem:[%s3102_s23 + $0x20] sm:$0x77]  ;;  %v733_v60 = vld [vmem:[%s3102_s23 + $0x18] sm:$0x77]  ;;  %v663_v4 = vcombine.high %v651_v54, %v651_v54  ;;  %s3050_s17 = smov 40  }
  0x25   : > { %252 = vst [vmem:[#allocation2 + $0x38] sm:$0x7] %v238_v33  ;;  %v753_v0 = vrot.slane %v733_v60, 3  ;;  %v3298_v17 = vld [vmem:[%s3102_s23 + $0x20] sm:$0x77] }
  0x26   : > { %281 = vrot.lane.b32.xlu0 %v271_v23, %s3018_s26  ;;  %v422_v23 = vld [vmem:[%s3102_s23 + $0x18] sm:$0x77]  ;;  %v672_v12 = vrot.slane %v663_v4, 6  ;;  %v3318_v33 = vld [vmem:[%s3102_s23 + $0x20] sm:$0x77] }
  0x27   : > { %v440_v25 = vrot.slane %v422_v23, 7 }
  0x28   : > { %357 = vrot.lane.b32.xlu1 %v347_v24, %s3017_s25  ;;  %v439_v24 = vrot.slane %v431_v21, 7  ;;  %v229_v21 = vld [vmem:[%s3102_s23 + $0x20] sm:$0x77] }
  0x29   : > { %253 = vst [vmem:[#allocation2 + $0x40] sm:$0x7] %v229_v21 }
  0x2a   : > { %444 = vrot.lane.b32.xlu0 %v434_v26, %s3019_s27  ;;  %v498_v26 = vld [vmem:[%s3102_s23 + $0x18] sm:$0x77] }
  0x2b   : > { %v508_v28 = vcombine.low %v498_v26, %v498_v26 }
  0x2c   : > { %510 = vrot.lane.b32.xlu1 %v505_v27, %s3016_s24  ;;  %v573_v27 = vcombine.high %v563_v62, %v563_v62 }
  0x2e   : > { %586 = vrot.lane.b32.xlu0 %v576_v32, %s3020_s28  ;;  %v581_v31 = vrot.slane %v573_v27, 1  ;;  %v269_v32 = vcombine.high %v259_v15, %v259_v15  ;;  %v270_v27 = vcombine.high %v3227_v35, %v3227_v35 }
  0x30   : > { %678 = vrot.lane.b32.xlu1 %v666_v34, %s3021_s29  ;;  %v582_v34 = vrot.slane %v564_v29, 1  ;;  %v239_v29 = vcombine.high %v229_v21, %v229_v21 }
  0x32   : > { %680 = vrot.lane.b32.xlu0 %v667_v36, %s3021_s29  ;;  %v278_v36 = vrot.slane %v269_v32, 5  ;;  %255 = vst.msk [vmem:[#allocation2 + $0x48] sm:$0x7] %vm254_vm5, %v239_v29 }
  0x34   : > { %760 = vrot.lane.b32.xlu1 %v748_v38, %s3022_s30  ;;  %v279_v38 = vrot.slane %v3227_v35, 5  ;;  %v280_v35 = vrot.slane %v270_v27, 5  ;;  %v3026_v27 = vmov 0  }
  0x35   : > { %2801 = vset.pattern.permute.xlu1 %v3026_v27  ;;  %2962 = vset.pattern.permute.xlu0 %v3026_v27 }
  0x36   : > { %762 = vrot.lane.b32.xlu0 %v749_v40, %s3022_s30  ;;  %v354_v40 = vrot.slane %v345_v37, 2 }
  0x38   : > { %831 = vrot.lane.b32.xlu1 %v824_v41, %s3023_s6  ;;  %v432_v41 = vcombine.high %v422_v23, %v422_v23  ;;  %v755_v23 = vrot.slane %v3298_v17, 3 }
  0x3a   : > { %833 = vrot.lane.b32.xlu0 %v3156_v42, %s3023_s6  ;;  %v441_v44 = vrot.slane %v432_v41, 7 }
  0x3c   : > { %676 = vrot.lane.b32.xlu1 %v665_v43, %s3021_s29  ;;  %v3239_v43 = vld [vmem:[%s3102_s23 + $0x20] sm:$0x77] }
  0x3e   : > { %758 = vrot.lane.b32.xlu0 %v747_v45, %s3022_s30  ;;  %v442_v45 = vrot.slane %v3239_v43, 7 }
  0x40   : > { %829 = vrot.lane.b32.xlu1 %v812_v39, %s3023_s6  ;;  %v3233_v39 = vld [vmem:[%s3102_s23 + $0x20] sm:$0x77] }
  0x41   : > { %v355_v42 = vrot.slane %v3233_v39, 2 }
  0x42   : > { %287 = vrot.lane.b32.xlu0 %v274_v50, %s3018_s26  ;;  %v583_v50 = vrot.slane %v574_v47, 1  ;;  %v575_v47 = vcombine.high %v3252_v49, %v3252_v49 }
  0x44   : > { %289 = vrot.lane.b32.xlu1 %v275_v51, %s3018_s26  ;;  %v662_v51 = vcombine.high %v3188_v2, %v3188_v2  ;;  %v826_v2 = vcombine.high %v3207_v14, %v3207_v14 }
  0x46   : > { %363 = vrot.lane.b32.xlu0 %v350_v53, %s3017_s25  ;;  %v584_v53 = vrot.slane %v3252_v49, 1  ;;  %v670_v56 = vrot.slane %v662_v51, 6 }
  0x48   : > { %365 = vrot.lane.b32.xlu1 %v351_v55, %s3017_s25 }
  0x4a   : > { %450 = vrot.lane.b32.xlu0 %v437_v57, %s3019_s27  ;;  %v744_v57 = vcombine.high %v3196_v7, %v3196_v7 }
  0x4c   : > { %452 = vrot.lane.b32.xlu1 %v438_v58, %s3019_s27  ;;  %v752_v62 = vrot.slane %v744_v57, 3  ;;  %v746_v57 = vcombine.high %v3298_v17, %v3298_v17 }
  0x4e   : > { %516 = vrot.lane.b32.xlu0 %v3122_v10, %s3016_s24  ;;  %v227_v10 = vld [vmem:[%s3102_s23 + $0x10] sm:$0x77]  ;;  %v756_v4 = vrot.slane %v746_v57, 3 }
  0x4f   : > { %v237_v13 = vcombine.high %v227_v10, %v227_v10  ;;  %249 = vst [vmem:[#allocation2 + $0x20] sm:$0x7] %v227_v10  ;;  %v3290_v10 = vld [vmem:[%s3102_s23 + $0x20] sm:$0x77] }
  0x50   : > { %518 = vrot.lane.b32.xlu1 %v507_v61, %s3016_s24 }
  0x51   : > { %250 = vst [vmem:[#allocation2 + $0x28] sm:$0x7] %v237_v13  ;;  %v745_v13 = vcombine.high %v733_v60, %v733_v60 }
  0x52   : > { %592 = vrot.lane.b32.xlu0 %v579_v63, %s3020_s28 }
  0x53   : > { %v754_v19 = vrot.slane %v745_v13, 3 }
  0x54   : > { %594 = vrot.lane.b32.xlu1 %v580_v1, %s3020_s28 }
  0x56   : > { %682 = vrot.lane.b32.xlu0 %v668_v3, %s3021_s29 }
  0x58   : > { %684 = vrot.lane.b32.xlu1 %v669_v6, %s3021_s29 }
  0x5a   : > { %764 = vrot.lane.b32.xlu0 %v750_v8, %s3022_s30 }
  0x5c   : > { %766 = vrot.lane.b32.xlu1 %v751_v9, %s3022_s30  ;;  %v815_v9 = vld [vmem:[%s3102_s23 + $0x18] sm:$0x77] }
  0x5e   : > { %835 = vrot.lane.b32.xlu0 %v825_v11, %s3023_s6 }
  0x60   : > { %837 = vrot.lane.b32.xlu1 %v3207_v14, %s3023_s6 }
  0x62   : > { %291 = vrot.lane.b32.xlu0 %v276_v16, %s3018_s26  ;;  %v673_v16 = vrot.slane %v3290_v10, 6 }
  0x64   : > { %293 = vrot.lane.b32.xlu1 %v277_v18, %s3018_s26 }
  0x66   : > { %367 = vrot.lane.b32.xlu0 %v352_v20, %s3017_s25 }
  0x68   : > { %369 = vrot.lane.b32.xlu1 %v353_v22, %s3017_s25 }
  0x6a   : > { %454 = vrot.lane.b32.xlu0 %v439_v24, %s3019_s27 }
  0x6c   : > { %456 = vrot.lane.b32.xlu1 %v440_v25, %s3019_s27  ;;  %v827_v25 = vcombine.high %v815_v9, %v815_v9 }
  0x6e   : > { %520 = vrot.lane.b32.xlu0 %v497_v59, %s3016_s24  ;;  %v671_v59 = vrot.slane %v651_v54, 6  ;;  %v653_v54 = vld [vmem:[%s3102_s23 + $0x28] sm:$0x7] }
  0x70   : > { %522 = vrot.lane.b32.xlu1 %v508_v28, %s3016_s24 }
  0x72   : > { %596 = vrot.lane.b32.xlu0 %v581_v31, %s3020_s28  ;;  %v346_v31 = vcombine.high %v3233_v39, %v3233_v39 }
  0x74   : > { %598 = vrot.lane.b32.xlu1 %v582_v34, %s3020_s28 }
  0x76   : > { %295 = vrot.lane.b32.xlu0 %v278_v36, %s3018_s26  ;;  %v433_v36 = vcombine.high %v3239_v43, %v3239_v43 }
  0x78   : > { %297 = vrot.lane.b32.xlu1 %v279_v38, %s3018_s26  ;;  %v443_v43 = vrot.slane %v433_v36, 7 }
  0x7a   : > { %371 = vrot.lane.b32.xlu0 %v354_v40, %s3017_s25 }
  0x7c   : > { %373 = vrot.lane.b32.xlu1 %v355_v42, %s3017_s25  ;;  %v356_v42 = vrot.slane %v346_v31, 2 }
  0x7e   : > { %458 = vrot.lane.b32.xlu0 %v441_v44, %s3019_s27 }
  0x80   : > { %460 = vrot.lane.b32.xlu1 %v442_v45, %s3019_s27 }
  0x82   : > { %524 = vrot.lane.b32.xlu0 %v498_v26, %s3016_s24 }
  0x84   : > { %v3257_v52 = vpop.permute.xlu0 %512  ;;  %526 = vrot.lane.b32.xlu1 %v509_v48, %s3016_s24 }
  0x86   : > { %v3262_v55 = vpop.permute.xlu1 %361  ;;  %600 = vrot.lane.b32.xlu0 %v583_v50, %s3020_s28  ;;  %v664_v50 = vcombine.high %v3290_v10, %v3290_v10  ;;  %v828_v10 = vcombine.high %v3318_v33, %v3318_v33 }
  0x88   : > { %602 = vrot.lane.b32.xlu1 %v584_v53, %s3020_s28  ;;  %v3268_v58 = vpop.permute.xlu0 %285  ;;  %v585_v53 = vrot.slane %v575_v47, 1 }
  0x8a   : > { %v3271_v61 = vpop.permute.xlu1 %448  ;;  %686 = vrot.lane.b32.xlu0 %v670_v56, %s3021_s29  ;;  %v674_v56 = vrot.slane %v664_v50, 6 }
  0x8c   : > { %688 = vrot.lane.b32.xlu1 %v671_v59, %s3021_s29  ;;  %v284_v63 = vpop.permute.xlu0 %283 }
  0x8d   : > { %v303_v1 = vsel %vm4004_vm0, %v284_v63, %v3268_v58 }
  0x8e   : > { %322 = vst [vmem:[#allocation2 + $0x8] sm:$0x38] %v303_v1  ;;  %v3279_v3 = vpop.permute.xlu1 %514  ;;  %768 = vrot.lane.b32.xlu0 %v752_v62, %s3022_s30  ;;  %v675_v1 = vrot.slane %v653_v54, 6 }
  0x8f   : > { %v532_v6 = vsel %vm530_vm1, %v3257_v52, %v3279_v3 }
  0x90   : > { %551 = vst [vmem:[#allocation2 + $0x58] sm:$0x70] %v532_v6  ;;  %770 = vrot.lane.b32.xlu1 %v753_v0, %s3022_s30  ;;  %v447_v7 = vpop.permute.xlu0 %446 }
  0x91   : > { %v466_v8 = vsel %vm464_vm2, %v447_v7, %v3271_v61 }
  0x92   : > { %485 = vst [vmem:[#allocation2 + $0x58] sm:$0xe] %v466_v8  ;;  %v360_v11 = vpop.permute.xlu1 %359  ;;  %839 = vrot.lane.b32.xlu0 %v826_v2, %s3023_s6  ;;  %v735_v2 = vld [vmem:[%s3102_s23 + $0x28] sm:$0x7] }
  0x93   : > { %v379_v14 = vsel %vm377_vm3, %v360_v11, %v3262_v55  ;;  %v757_v8 = vrot.slane %v735_v2, 3 }
  0x94   : > { %398 = vst [vmem:[#allocation2 + $0x58] ss:$-76 sps:$4 sm:$0xc1] %v379_v14   ;;  %841 = vrot.lane.b32.xlu1 %v815_v9, %s3023_s6  ;;  %v589_v15 = vpop.permute.xlu0 %588 }
  0x96   : > { %v3300_v18 = vpop.permute.xlu1 %590  ;;  %690 = vrot.lane.b32.xlu0 %v672_v12, %s3021_s29 }
  0x97   : > { %v608_v20 = vsel %vm606_vm4, %v589_v15, %v3300_v18 }
  0x98   : > { %627 = vst [vmem:[#allocation2 + $0xa8] ss:$-76 sps:$4 sm:$0x83] %v608_v20   ;;  %692 = vrot.lane.b32.xlu1 %v673_v16, %s3021_s29  ;;  %v282_v22 = vpop.permute.xlu0 %281 }
  0x99   : > { %v302_v24 = vsel %vm4004_vm0, %v282_v22, %v284_v63 }
  0x9a   : > { %321 = vst [vmem:[#allocation2] sm:$0x38] %v302_v24  ;;  %v358_v26 = vpop.permute.xlu1 %357  ;;  %772 = vrot.lane.b32.xlu0 %v754_v19, %s3022_s30 }
  0x9b   : > { %v378_v28 = vsel %vm377_vm3, %v358_v26, %v360_v11  ;;  %v884_v38 = vld [vmem:[#allocation2 + $0x8] sm:$0xff] }
  0x9c   : > { %397 = vst [vmem:[#allocation2 + $0x50] ss:$-76 sps:$4 sm:$0xc1] %v378_v28   ;;  %774 = vrot.lane.b32.xlu1 %v755_v23, %s3022_s30  ;;  %v445_v30 = vpop.permute.xlu0 %444 }
  0x9d   : > { %v465_v32 = vsel %vm464_vm2, %v445_v30, %v447_v7 }
  0x9e   : > { %484 = vst [vmem:[#allocation2 + $0x50] sm:$0xe] %v465_v32  ;;  %v511_v34 = vpop.permute.xlu1 %510  ;;  %843 = vrot.lane.b32.xlu0 %v827_v25, %s3023_s6 }
  0x9f   : > { %v531_v37 = vsel %vm530_vm1, %v511_v34, %v3257_v52  ;;  %v894_v39 = vld [vmem:[#allocation2 + $0x58] sm:$0xff] }
  0xa0   : > { %550 = vst [vmem:[#allocation2 + $0x50] sm:$0x70] %v531_v37  ;;  %845 = vrot.lane.b32.xlu1 %v3318_v33, %s3023_s6  ;;  %v587_v40 = vpop.permute.xlu0 %586  ;;  %v2624_v41 = vpack.c.bf16 %v894_v39, %v884_v38 }
  0xa1   : > { %v607_v44 = vsel %vm606_vm4, %v587_v40, %v589_v15  ;;  %v817_v15 = vld [vmem:[%s3102_s23 + $0x28] sm:$0x7]  ;;  %s3032_s23 = smov 120  }
  0xa2   : > { %626 = vst [vmem:[#allocation2 + $0xa0] ss:$-76 sps:$4 sm:$0x83] %v607_v44   ;;  %v679_v45 = vpop.permute.xlu1 %678  ;;  %299 = vrot.lane.b32.xlu0 %v280_v35, %s3018_s26  ;;  %2625 = vmatprep.subr.bf16.mxu0 %v2624_v41  ;;  %v3397_v35 = vld [vmem:[%s3999_s1] sm:$0xff] }
  0xa3   : > { %v883_v60 = vld [vmem:[#allocation2] sm:$0xff] }
  0xa4   : > { %375 = vrot.lane.b32.xlu1 %v356_v42, %s3017_s25  ;;  %v3333_v48 = vpop.permute.xlu0 %680 }
  0xa5   : > { %v700_v51 = vsel %vm698_vm6, %v679_v45, %v3333_v48 }
  0xa6   : > { %720 = vst [vmem:[#allocation2 + $0xa8] sm:$0x1c] %v700_v51  ;;  %v761_v52 = vpop.permute.xlu1 %760  ;;  %462 = vrot.lane.b32.xlu0 %v443_v43, %s3019_s27 }
  0xa8   : > { %528 = vrot.lane.b32.xlu1 %v3245_v46, %s3016_s24  ;;  %v3343_v49 = vpop.permute.xlu0 %762 }
  0xa9   : > { %v782_v59 = vsel %vm780_vm7, %v761_v52, %v3343_v49  ;;  %v893_v62 = vld [vmem:[#allocation2 + $0x50] sm:$0xff] }
  0xaa   : > { %802 = vst [vmem:[#allocation2 + $0xa8] sm:$0xe0] %v782_v59  ;;  %v832_v63 = vpop.permute.xlu1 %831  ;;  %604 = vrot.lane.b32.xlu0 %v585_v53, %s3020_s28  ;;  %v2626_v0 = vpack.c.bf16 %v893_v62, %v883_v60 }
  0xac   : > { %694 = vrot.lane.b32.xlu1 %v674_v56, %s3021_s29  ;;  %v3352_v46 = vpop.permute.xlu0 %833  ;;  %2627 = vmatpush1.bf16.msra.mxu0 %v2626_v0 }
  0xad   : > { %v853_v6 = vsel %vm851_vm8, %v832_v63, %v3352_v46 }
  0xae   : > { %873 = vst [vmem:[#allocation2 + $0xf8] sm:$0x7] %v853_v6  ;;  %v677_v7 = vpop.permute.xlu1 %676  ;;  %696 = vrot.lane.b32.xlu0 %v675_v1, %s3021_s29 }
  0xaf   : > { %v699_v9 = vsel %vm698_vm6, %v677_v7, %v679_v45 }
  0xb0   : > { %719 = vst [vmem:[#allocation2 + $0xa0] sm:$0x1c] %v699_v9  ;;  %776 = vrot.lane.b32.xlu1 %v756_v4, %s3022_s30  ;;  %v759_v11 = vpop.permute.xlu0 %758 }
  0xb1   : > { %v781_v12 = vsel %vm780_vm7, %v759_v11, %v761_v52  ;;  %v904_v19 = vld [vmem:[#allocation2 + $0xa8] sm:$0xff] }
  0xb2   : > { %801 = vst [vmem:[#allocation2 + $0xa0] sm:$0xe0] %v781_v12  ;;  %v830_v13 = vpop.permute.xlu1 %829  ;;  %778 = vrot.lane.b32.xlu0 %v757_v8, %s3022_s30 }
  0xb3   : > { %v852_v14 = vsel %vm851_vm8, %v830_v13, %v832_v63 }
  0xb4   : > { %872 = vst [vmem:[#allocation2 + $0xf0] sm:$0x7] %v852_v14  ;;  %847 = vrot.lane.b32.xlu1 %v828_v10, %s3023_s6  ;;  %v288_v16 = vpop.permute.xlu0 %287 }
  0xb5   : > { %v304_v17 = vsel %vm4004_vm0, %v3268_v58, %v288_v16  ;;  %v914_v20 = vld [vmem:[#allocation2 + $0xf8] sm:$0x7]  ;;  %v923_v58 = vld [vmem:[%s4000_s2] sm:$0xff] }
  0xb6   : > { %323 = vst [vmem:[#allocation2 + $0x10] sm:$0x38] %v304_v17  ;;  %v3372_v22 = vpop.permute.xlu1 %289  ;;  %849 = vrot.lane.b32.xlu0 %v817_v15, %s3023_s6  ;;  %v2628_v23 = vpack.c.bf16 %v914_v20, %v904_v19 }
  0xb7   : > { %v305_v24 = vsel %vm4004_vm0, %v288_v16, %v3372_v22 }
  0xb8   : > { %324 = vst [vmem:[#allocation2 + $0x18] sm:$0x38] %v305_v24  ;;  %v364_v25 = vpop.permute.xlu0 %363  ;;  %2630 = vmatprep.subr.msk.bf16.mxu0 %vm3368_vm11, %v2628_v23  ;;  %926 = vperm.xlu1 %2801, %v923_v58  }
  0xb9   : > { %v380_v26 = vsel %vm377_vm3, %v3262_v55, %v364_v25  ;;  %v903_v30 = vld [vmem:[#allocation2 + $0xa0] sm:$0xff] }
  0xba   : > { %399 = vst [vmem:[#allocation2 + $0x60] ss:$-76 sps:$4 sm:$0xc1] %v380_v26   ;;  %v3384_v28 = vpop.permute.xlu1 %365 }
  0xbb   : > { %v381_v29 = vsel %vm377_vm3, %v364_v25, %v3384_v28  ;;  %v913_v31 = vld [vmem:[#allocation2 + $0xf0] sm:$0x7] }
  0xbc   : > { %400 = vst [vmem:[#allocation2 + $0x68] ss:$-76 sps:$4 sm:$0xc1] %v381_v29   ;;  %v451_v32 = vpop.permute.xlu0 %450  ;;  %v2631_v33 = vpack.c.bf16 %v913_v31, %v903_v30 }
  0xbd   : > { %v467_v34 = vsel %vm464_vm2, %v3271_v61, %v451_v32 }
  0xbe   : > { %486 = vst [vmem:[#allocation2 + $0x60] sm:$0xe] %v467_v34  ;;  %v3390_v55 = vpop.permute.xlu1 %452  ;;  %2633 = vmatpush1.bf16.msk.msra.mxu0 %vm3368_vm11, %v2631_v33 }
  0xbf   : > { %v468_v36 = vsel %vm464_vm2, %v451_v32, %v3390_v55 }
  0xc0   : > { %487 = vst [vmem:[#allocation2 + $0x68] sm:$0xe] %v468_v36  ;;  %v517_v37 = vpop.permute.xlu0 %516 }
  0xc1   : > { %v533_v61 = vsel %vm530_vm1, %v3279_v3, %v517_v37  ;;  %2572 = vmatmul.mubr.msk.f32.vlgmr.msra.gmra.mrb[0].mxu0 %vm929_vm12, %v3397_v35  ;;  %v885_v59 = vld [vmem:[#allocation2 + $0x10] sm:$0xff] }
  0xc2   : > { %552 = vst [vmem:[#allocation2 + $0x60] sm:$0x70] %v533_v61  ;;  %v3405_v38 = vpop.permute.xlu1 %518  ;;  %1099 = vmatprep.mubr.f32.mxu0 %v3024_v5 }
  0xc3   : > { %v534_v39 = vsel %vm530_vm1, %v517_v37, %v3405_v38  ;;  %v886_v54 = vld [vmem:[#allocation2 + $0x18] sm:$0xff] }
  0xc4   : > { %553 = vst [vmem:[#allocation2 + $0x68] sm:$0x70] %v534_v39  ;;  %v593_v40 = vpop.permute.xlu0 %592 }
  0xc5   : > { %v609_v41 = vsel %vm606_vm4, %v3300_v18, %v593_v40 }
  0xc6   : > { %628 = vst [vmem:[#allocation2 + $0xb0] ss:$-76 sps:$4 sm:$0x83] %v609_v41   ;;  %v3412_v42 = vpop.permute.xlu1 %594 }
  0xc7   : > { %v610_v3 = vsel %vm606_vm4, %v593_v40, %v3412_v42 }
  0xc8   : > { %629 = vst [vmem:[#allocation2 + $0xb8] ss:$-76 sps:$4 sm:$0x83] %v610_v3   ;;  %v683_v44 = vpop.permute.xlu0 %682 }
  0xc9   : > { %v701_v45 = vsel %vm698_vm6, %v3333_v48, %v683_v44 }
  0xca   : > { %721 = vst [vmem:[#allocation2 + $0xb0] sm:$0x1c] %v701_v45  ;;  %v3418_v43 = vpop.permute.xlu1 %684 }
  0xcb   : > { %v702_v47 = vsel %vm698_vm6, %v683_v44, %v3418_v43 }
  0xcc   : > { %722 = vst [vmem:[#allocation2 + $0xb8] sm:$0x1c] %v702_v47  ;;  %v765_v50 = vpop.permute.xlu0 %764 }
  0xcd   : > { %v783_v18 = vsel %vm780_vm7, %v3343_v49, %v765_v50  ;;  %v895_v52 = vld [vmem:[#allocation2 + $0x60] sm:$0xff] }
  0xce   : > { %803 = vst [vmem:[#allocation2 + $0xb0] sm:$0xe0] %v783_v18  ;;  %v3424_v51 = vpop.permute.xlu1 %766  ;;  %v2636_v62 = vpack.c.bf16 %v895_v52, %v885_v59 }
  0xcf   : > { %v784_v53 = vsel %vm780_vm7, %v765_v50, %v3424_v51  ;;  %v896_v48 = vld [vmem:[#allocation2 + $0x68] sm:$0xff] }
  0xd0   : > { %804 = vst [vmem:[#allocation2 + $0xb8] sm:$0xe0] %v784_v53  ;;  %v836_v56 = vpop.permute.xlu0 %835  ;;  %v2634_v57 = vpack.c.bf16 %v896_v48, %v886_v54 }
  0xd1   : > { %v854_v60 = vsel %vm851_vm8, %v3352_v46, %v836_v56 }
  0xd2   : > { %874 = vst [vmem:[#allocation2 + $0x100] sm:$0x7] %v854_v60  ;;  %v3430_v63 = vpop.permute.xlu1 %837  ;;  %2635 = vmatprep.subr.bf16.mxu0 %v2634_v57 }
  0xd3   : > { %v855_v49 = vsel %vm851_vm8, %v836_v56, %v3430_v63  ;;  %2637 = vmatpush1.bf16.msra.mxu0 %v2636_v62 }
  0xd4   : > { %875 = vst [vmem:[#allocation2 + $0x108] sm:$0x7] %v855_v49  ;;  %v292_v0 = vpop.permute.xlu0 %291 }
  0xd5   : > { %v306_v1 = vsel %vm4004_vm0, %v3372_v22, %v292_v0  ;;  %v905_v14 = vld [vmem:[#allocation2 + $0xb0] sm:$0xff] }
  0xd6   : > { %325 = vst [vmem:[#allocation2 + $0x20] sm:$0x38] %v306_v1  ;;  %v294_v2 = vpop.permute.xlu1 %293 }
  0xd7   : > { %v307_v4 = vsel %vm4004_vm0, %v292_v0, %v294_v2  ;;  %v906_v10 = vld [vmem:[#allocation2 + $0xb8] sm:$0xff] }
  0xd8   : > { %326 = vst [vmem:[#allocation2 + $0x28] sm:$0x38] %v307_v4  ;;  %v368_v46 = vpop.permute.xlu0 %367 }
  0xd9   : > { %v382_v6 = vsel %vm377_vm3, %v3384_v28, %v368_v46  ;;  %v915_v8 = vld [vmem:[#allocation2 + $0x100] sm:$0x7] }
  0xda   : > { %401 = vst [vmem:[#allocation2 + $0x70] ss:$-76 sps:$4 sm:$0xc1] %v382_v6   ;;  %v370_v7 = vpop.permute.xlu1 %369  ;;  %v2641_v16 = vpack.c.bf16 %v915_v8, %v905_v14 }
  0xdb   : > { %v383_v9 = vsel %vm377_vm3, %v368_v46, %v370_v7  ;;  %v916_v11 = vld [vmem:[#allocation2 + $0x108] sm:$0x7] }
  0xdc   : > { %402 = vst [vmem:[#allocation2 + $0x78] ss:$-76 sps:$4 sm:$0xc1] %v383_v9   ;;  %v455_v12 = vpop.permute.xlu0 %454  ;;  %v2638_v13 = vpack.c.bf16 %v916_v11, %v906_v10 }
  0xdd   : > { %v469_v15 = vsel %vm464_vm2, %v3390_v55, %v455_v12 }
  0xde   : > { %488 = vst [vmem:[#allocation2 + $0x70] sm:$0xe] %v469_v15  ;;  %v457_v17 = vpop.permute.xlu1 %456  ;;  %2640 = vmatprep.subr.msk.bf16.mxu0 %vm3368_vm11, %v2638_v13 }
  0xdf   : > { %v470_v19 = vsel %vm464_vm2, %v455_v12, %v457_v17  ;;  %2643 = vmatpush1.bf16.msk.msra.mxu0 %vm3368_vm11, %v2641_v16 }
  0xe0   : > { %489 = vst [vmem:[#allocation2 + $0x78] sm:$0xe] %v470_v19  ;;  %v521_v20 = vpop.permute.xlu0 %520 }
  0xe1   : > { %v535_v22 = vsel %vm530_vm1, %v3405_v38, %v521_v20  ;;  %v887_v40 = vld [vmem:[#allocation2 + $0x20] sm:$0xff] }
  0xe2   : > { %554 = vst [vmem:[#allocation2 + $0x70] sm:$0x70] %v535_v22  ;;  %v523_v23 = vpop.permute.xlu1 %522  ;;  %2575 = vmatmul.mubr.msk.f32.vlgmr.msra.gmra.mrb[2].mxu0 %vm929_vm12, %v3397_v35 }
  0xe3   : > { %v536_v24 = vsel %vm530_vm1, %v521_v20, %v523_v23  ;;  %1170 = vmatprep.mubr.f32.mxu0 %v3024_v5  ;;  %v888_v37 = vld [vmem:[#allocation2 + $0x28] sm:$0xff] }
  0xe4   : > { %555 = vst [vmem:[#allocation2 + $0x78] sm:$0x70] %v536_v24  ;;  %v597_v25 = vpop.permute.xlu0 %596 }
  0xe5   : > { %v611_v58 = vsel %vm606_vm4, %v3412_v42, %v597_v25 }
  0xe6   : > { %630 = vst [vmem:[#allocation2 + $0xc0] ss:$-76 sps:$4 sm:$0x83] %v611_v58   ;;  %v599_v26 = vpop.permute.xlu1 %598 }
  0xe7   : > { %v612_v27 = vsel %vm606_vm4, %v597_v25, %v599_v26 }
  0xe8   : > { %631 = vst [vmem:[#allocation2 + $0xc8] ss:$-76 sps:$4 sm:$0x83] %v612_v27   ;;  %v296_v28 = vpop.permute.xlu0 %295 }
  0xe9   : > { %v308_v29 = vsel %vm4004_vm0, %v294_v2, %v296_v28 }
  0xea   : > { %327 = vst [vmem:[#allocation2 + $0x30] sm:$0x38] %v308_v29  ;;  %v3457_v30 = vpop.permute.xlu1 %297 }
  0xeb   : > { %v309_v31 = vsel %vm4004_vm0, %v296_v28, %v3457_v30 }
  0xec   : > { %328 = vst [vmem:[#allocation2 + $0x38] sm:$0x38] %v309_v31  ;;  %v372_v32 = vpop.permute.xlu0 %371 }
  0xed   : > { %v384_v33 = vsel %vm377_vm3, %v370_v7, %v372_v32  ;;  %v897_v55 = vld [vmem:[#allocation2 + $0x70] sm:$0xff] }
  0xee   : > { %403 = vst [vmem:[#allocation2 + $0x80] ss:$-76 sps:$4 sm:$0xc1] %v384_v33   ;;  %v3462_v34 = vpop.permute.xlu1 %373  ;;  %v2646_v42 = vpack.c.bf16 %v897_v55, %v887_v40 }
  0xef   : > { %v385_v36 = vsel %vm377_vm3, %v372_v32, %v3462_v34  ;;  %v898_v61 = vld [vmem:[#allocation2 + $0x78] sm:$0xff] }
  0xf0   : > { %404 = vst [vmem:[#allocation2 + $0x88] ss:$-76 sps:$4 sm:$0xc1] %v385_v36   ;;  %v459_v38 = vpop.permute.xlu0 %458  ;;  %v2644_v39 = vpack.c.bf16 %v898_v61, %v888_v37 }
  0xf1   : > { %v471_v41 = vsel %vm464_vm2, %v457_v17, %v459_v38 }
  0xf2   : > { %490 = vst [vmem:[#allocation2 + $0x80] sm:$0xe] %v471_v41  ;;  %v3467_v3 = vpop.permute.xlu1 %460  ;;  %2645 = vmatprep.subr.bf16.mxu0 %v2644_v39 }
  0xf3   : > { %v472_v44 = vsel %vm464_vm2, %v459_v38, %v3467_v3  ;;  %2647 = vmatpush1.bf16.msra.mxu0 %v2646_v42 }
  0xf4   : > { %491 = vst [vmem:[#allocation2 + $0x88] sm:$0xe] %v472_v44  ;;  %v525_v45 = vpop.permute.xlu0 %524 }
  0xf5   : > { %v537_v47 = vsel %vm530_vm1, %v523_v23, %v525_v45 }
  0xf6   : > { %556 = vst [vmem:[#allocation2 + $0x80] sm:$0x70] %v537_v47  ;;  %v3472_v50 = vpop.permute.xlu1 %526 }
  0xf7   : > { %v538_v18 = vsel %vm530_vm1, %v525_v45, %v3472_v50  ;;  %v890_v4 = vld [vmem:[#allocation2 + $0x38] sm:$0xff] }
  0xf8   : > { %557 = vst [vmem:[#allocation2 + $0x88] sm:$0x70] %v538_v18  ;;  %v601_v52 = vpop.permute.xlu0 %600 }
  0xf9   : > { %v613_v53 = vsel %vm606_vm4, %v599_v26, %v601_v52 }
  0xfa   : > { %632 = vst [vmem:[#allocation2 + $0xd0] ss:$-76 sps:$4 sm:$0x83] %v613_v53   ;;  %v3477_v54 = vpop.permute.xlu1 %602 }
  0xfb   : > { %v614_v48 = vsel %vm606_vm4, %v601_v52, %v3477_v54 }
  0xfc   : > { %633 = vst [vmem:[#allocation2 + $0xd8] ss:$-76 sps:$4 sm:$0x83] %v614_v48   ;;  %v687_v56 = vpop.permute.xlu0 %686 }
  0xfd   : > { %v703_v57 = vsel %vm698_vm6, %v3418_v43, %v687_v56  ;;  %v889_v43 = vld [vmem:[#allocation2 + $0x30] sm:$0xff] }
  0xfe   : > { %723 = vst [vmem:[#allocation2 + $0xc0] sm:$0x1c] %v703_v57  ;;  %v689_v59 = vpop.permute.xlu1 %688 }
  0xff   : > { %v704_v60 = vsel %vm698_vm6, %v687_v56, %v689_v59 }
 0x100   : > { %724 = vst [vmem:[#allocation2 + $0xc8] sm:$0x1c] %v704_v60  ;;  %v769_v62 = vpop.permute.xlu0 %768 }
 0x101   : > { %v785_v49 = vsel %vm780_vm7, %v3424_v51, %v769_v62  ;;  %v899_v1 = vld [vmem:[#allocation2 + $0x80] sm:$0xff] }
 0x102   : > { %805 = vst [vmem:[#allocation2 + $0xc0] sm:$0xe0] %v785_v49  ;;  %v771_v0 = vpop.permute.xlu1 %770  ;;  %v2656_v9 = vpack.c.bf16 %v899_v1, %v889_v43 }
 0x103   : > { %v786_v2 = vsel %vm780_vm7, %v769_v62, %v771_v0  ;;  %v900_v46 = vld [vmem:[#allocation2 + $0x88] sm:$0xff] }
 0x104   : > { %806 = vst [vmem:[#allocation2 + $0xc8] sm:$0xe0] %v786_v2  ;;  %v840_v6 = vpop.permute.xlu0 %839  ;;  %v2654_v7 = vpack.c.bf16 %v900_v46, %v890_v4 }
 0x105   : > { %v856_v8 = vsel %vm851_vm8, %v3430_v63, %v840_v6 }
 0x106   : > { %876 = vst [vmem:[#allocation2 + $0x110] sm:$0x7] %v856_v8  ;;  %v842_v10 = vpop.permute.xlu1 %841  ;;  %2655 = vmatprep.subr.bf16.mxu1 %v2654_v7 }
 0x107   : > { %v857_v51 = vsel %vm851_vm8, %v840_v6, %v842_v10  ;;  %2657 = vmatpush1.bf16.msra.mxu1 %v2656_v9 }
 0x108   : > { %877 = vst [vmem:[#allocation2 + $0x118] sm:$0x7] %v857_v51  ;;  %v691_v11 = vpop.permute.xlu0 %690 }
 0x109   : > { %v705_v12 = vsel %vm698_vm6, %v689_v59, %v691_v11  ;;  %v907_v25 = vld [vmem:[#allocation2 + $0xc0] sm:$0xff] }
 0x10a   : > { %725 = vst [vmem:[#allocation2 + $0xd0] sm:$0x1c] %v705_v12  ;;  %v3491_v13 = vpop.permute.xlu1 %692 }
 0x10b   : > { %v706_v14 = vsel %vm698_vm6, %v691_v11, %v3491_v13  ;;  %v908_v20 = vld [vmem:[#allocation2 + $0xc8] sm:$0xff] }
 0x10c   : > { %726 = vst [vmem:[#allocation2 + $0xd8] sm:$0x1c] %v706_v14  ;;  %v773_v15 = vpop.permute.xlu0 %772 }
 0x10d   : > { %v787_v63 = vsel %vm780_vm7, %v771_v0, %v773_v15  ;;  %v917_v17 = vld [vmem:[#allocation2 + $0x110] sm:$0x7] }
 0x10e   : > { %807 = vst [vmem:[#allocation2 + $0xd0] sm:$0xe0] %v787_v63  ;;  %v3496_v16 = vpop.permute.xlu1 %774  ;;  %v2651_v26 = vpack.c.bf16 %v917_v17, %v907_v25 }
 0x10f   : > { %v788_v19 = vsel %vm780_vm7, %v773_v15, %v3496_v16  ;;  %v918_v22 = vld [vmem:[#allocation2 + $0x118] sm:$0x7] }
 0x110   : > { %808 = vst [vmem:[#allocation2 + $0xd8] sm:$0xe0] %v788_v19  ;;  %v844_v23 = vpop.permute.xlu0 %843  ;;  %v2648_v24 = vpack.c.bf16 %v918_v22, %v908_v20 }
 0x111   : > { %v858_v58 = vsel %vm851_vm8, %v842_v10, %v844_v23 }
 0x112   : > { %878 = vst [vmem:[#allocation2 + $0x120] sm:$0x7] %v858_v58  ;;  %v3501_v27 = vpop.permute.xlu1 %845  ;;  %2650 = vmatprep.subr.msk.bf16.mxu0 %vm3368_vm11, %v2648_v24 }
 0x113   : > { %v859_v28 = vsel %vm851_vm8, %v844_v23, %v3501_v27  ;;  %2653 = vmatpush1.bf16.msk.msra.mxu0 %vm3368_vm11, %v2651_v26 }
 0x114   : > { %879 = vst [vmem:[#allocation2 + $0x128] sm:$0x7] %v859_v28  ;;  %v300_v29 = vpop.permute.xlu0 %299 }
 0x115   : > { %v310_v31 = vsel %vm4004_vm0, %v3457_v30, %v300_v29  ;;  %331 = vst.msk [vmem:[#allocation2 + $0x48] sm:$0x38] %vm330_vm13, %v300_v29  ;;  %vm635_vm13 = vcmask 572423   ;;  %vm646_vm0 = vcmask 566272   ;;  %v909_v41 = vld [vmem:[#allocation2 + $0xd0] sm:$0xff] }
 0x116   : > { %329 = vst [vmem:[#allocation2 + $0x40] sm:$0x38] %v310_v31  ;;  %v376_v32 = vpop.permute.xlu1 %375  ;;  %2578 = vmatmul.mubr.msk.f32.vlgmr.msra.gmra.mrb[4].mxu0 %vm929_vm12, %v3397_v35 }
 0x117   : > { %v386_v33 = vsel %vm377_vm3, %v3462_v34, %v376_v32  ;;  %407 = vst.msk [vmem:[#allocation2 + $0x48] sm:$0xc0] %vm406_vm14, %v376_v32  ;;  %1312 = vmatprep.mubr.f32.mxu0 %v3024_v5  ;;  %v910_v34 = vld [vmem:[#allocation2 + $0xd8] sm:$0xff]  ;;  %vm728_vm14 = vcmask 569346  }
 0x118   : > { %418 = vst.msk [vmem:[#allocation2 + $0x98] sm:$0x1] %vm417_vm15, %v376_v32  ;;  %405 = vst [vmem:[#allocation2 + $0x90] ss:$-76 sps:$4 sm:$0xc1] %v386_v33   ;;  %v463_v55 = vpop.permute.xlu0 %462 }
 0x119   : > { %v473_v30 = vsel %vm464_vm2, %v3467_v3, %v463_v55  ;;  %494 = vst.msk [vmem:[#allocation2 + $0x98] sm:$0xe] %vm493_vm9, %v463_v55  ;;  %v919_v37 = vld [vmem:[#allocation2 + $0x120] sm:$0x7] }
 0x11a   : > { %492 = vst [vmem:[#allocation2 + $0x90] sm:$0xe] %v473_v30  ;;  %v529_v36 = vpop.permute.xlu1 %528  ;;  %v2661_v3 = vpack.c.bf16 %v919_v37, %v909_v41 }
 0x11b   : > { %v539_v61 = vsel %vm530_vm1, %v3472_v50, %v529_v36  ;;  %560 = vst.msk [vmem:[#allocation2 + $0x98] sm:$0x70] %vm559_vm10, %v529_v36  ;;  %v920_v38 = vld [vmem:[#allocation2 + $0x128] sm:$0x7] }
 0x11c   : > { %558 = vst [vmem:[#allocation2 + $0x90] sm:$0x70] %v539_v61  ;;  %v605_v39 = vpop.permute.xlu0 %604  ;;  %v2658_v40 = vpack.c.bf16 %v920_v38, %v910_v34 }
 0x11d   : > { %v615_v42 = vsel %vm606_vm4, %v3477_v54, %v605_v39  ;;  %636 = vst.msk [vmem:[#allocation2 + $0x98] sm:$0x80] %vm635_vm13, %v605_v39 }
 0x11e   : > { %647 = vst.msk [vmem:[#allocation2 + $0xe8] sm:$0x3] %vm646_vm0, %v605_v39  ;;  %634 = vst [vmem:[#allocation2 + $0xe0] ss:$-76 sps:$4 sm:$0x83] %v615_v42   ;;  %v695_v44 = vpop.permute.xlu1 %694  ;;  %2660 = vmatprep.subr.msk.bf16.mxu1 %vm3368_vm11, %v2658_v40  ;;  %v892_v52 = vld [vmem:[#allocation2 + $0x48] sm:$0xff] }
 0x11f   : > { %v707_v45 = vsel %vm698_vm6, %v3491_v13, %v695_v44  ;;  %2663 = vmatpush1.bf16.msk.msra.mxu1 %vm3368_vm11, %v2661_v3  ;;  %vm810_vm0 = vcmask 572421   ;;  %v891_v59 = vld [vmem:[#allocation2 + $0x40] sm:$0xff] }
 0x120   : > { %727 = vst [vmem:[#allocation2 + $0xe0] sm:$0x1c] %v707_v45  ;;  %v697_v47 = vpop.permute.xlu0 %696  ;;  %v1978_v3 = vld [vmem:[%s4002_s4] sm:$0xff] }
 0x121   : > { %v708_v50 = vsel %vm698_vm6, %v695_v44, %v697_v47 }
 0x122   : > { %729 = vst.msk [vmem:[#allocation2 + $0xe8] sm:$0x1c] %vm728_vm14, %v708_v50  ;;  %v777_v18 = vpop.permute.xlu1 %776  ;;  %2581 = vmatmul.mubr.msk.f32.vlgmr.msra.gmra.mrb[0].mxu1 %vm929_vm12, %v3397_v35 }
 0x123   : > { %v789_v53 = vsel %vm780_vm7, %v3496_v16, %v777_v18  ;;  %2052 = vmatprep.mubr.f32.mxu1 %v3024_v5 }
 0x124   : > { %809 = vst [vmem:[#allocation2 + $0xe0] sm:$0xe0] %v789_v53  ;;  %v779_v54 = vpop.permute.xlu0 %778  ;;  %v902_v48 = vld [vmem:[#allocation2 + $0x98] sm:$0xff] }
 0x125   : > { %v790_v56 = vsel %vm780_vm7, %v777_v18, %v779_v54  ;;  %v2664_v57 = vpack.c.bf16 %v902_v48, %v892_v52  ;;  %v901_v60 = vld [vmem:[#allocation2 + $0x90] sm:$0xff] }
 0x126   : > { %811 = vst.msk [vmem:[#allocation2 + $0xe8] sm:$0xe0] %vm810_vm0, %v790_v56  ;;  %v848_v62 = vpop.permute.xlu1 %847  ;;  %v2666_v49 = vpack.c.bf16 %v901_v60, %v891_v59  ;;  %vm1984_vm0 = vcmask 588800  }
 0x127   : > { %v860_v0 = vsel %vm851_vm8, %v3501_v27, %v848_v62  ;;  %2665 = vmatprep.subr.bf16.mxu0 %v2664_v57 }
 0x128   : > { %880 = vst [vmem:[#allocation2 + $0x130] sm:$0x7] %v860_v0  ;;  %v850_v1 = vpop.permute.xlu0 %849  ;;  %2667 = vmatpush1.bf16.msra.mxu0 %v2666_v49 }
 0x129   : > { %v861_v2 = vsel %vm851_vm8, %v848_v62, %v850_v1 }
 0x12a   : > { %881 = vst.msk [vmem:[#allocation2 + $0x138] sm:$0x7] %vm254_vm5, %v861_v2  ;;  %vm1338_vm5 = vcmask 572416  }
 0x12b   : > { %v911_v43 = vld [vmem:[#allocation2 + $0xe0] sm:$0xff] }
 0x12d   : > { %v912_v4 = vld [vmem:[#allocation2 + $0xe8] sm:$0xff] }
 0x12f   : > { %v921_v46 = vld [vmem:[#allocation2 + $0x130] sm:$0x7] }
 0x130   : > { %v2671_v8 = vpack.c.bf16 %v921_v46, %v911_v43 }
 0x131   : > { %v922_v6 = vld [vmem:[#allocation2 + $0x138] sm:$0x7] }
 0x132   : > { %v2668_v7 = vpack.c.bf16 %v922_v6, %v912_v4 }
 0x134   : > { %2670 = vmatprep.subr.msk.bf16.mxu0 %vm3368_vm11, %v2668_v7 }
 0x135   : > { %2673 = vmatpush1.bf16.msk.msra.mxu0 %vm3368_vm11, %v2671_v8  ;;  %vm1340_vm11 = vcmask 605744  }
 0x137   : > { %v927_v9 = vpop.permute.xlu1 %926 }
 0x138   : > { %2584 = vmatmul.mubr.msk.f32.vlgmr.msra.gmra.mrb[6].mxu0 %vm929_vm12, %v3397_v35  ;;  %vm4009_vm12 = vcmask 1039360  }
 0x139   : > { %2123 = vmatprep.mubr.f32.mxu0 %v3024_v5  ;;  %vm4010_vm15 = vmmov %vm4009_vm12 }
 0x13a   : > { %vm4011_vm9 = vmmov %vm4009_vm12 }
 0x13b   : > { %vm4012_vm10 = vmmov %vm4011_vm9 }
 0x13c   : > { %vm4013_vm13 = vmmov %vm4011_vm9 }
 0x13d   : > { %vm4014_vm14 = vmmov %vm4011_vm9 }
 0x194   : > { %v1030_v10 = vpop.f32.mrb[0].mxu0 }
 0x195   : > { %v1031_v51 = vadd.f32 %v1030_v10, %v927_v9  ;;  %v1032_v11 = vpop.f32.mrb[1].mxu0 }
 0x196   : > { %v1033_v12 = vadd.f32 %v1032_v11, %v927_v9 }
 0x197   : > { %v3546_v13 = vmax.f32 %v1031_v51, 0.0 }
 0x198   : > { %v3548_v14 = vmax.f32 %v1033_v12, 0.0 }
 0x199   : > { %1849 = vrot.lane.b32.xlu0 %v3546_v13, %s3023_s6 }
 0x1b5   : > { %v1101_v15 = vpop.f32.mrb[2].mxu0 }
 0x1b6   : > { %v1102_v21 = vadd.f32 %v1101_v15, %v927_v9  ;;  %v1103_v63 = vpop.f32.mrb[3].mxu0 }
 0x1b7   : > { %v1104_v16 = vadd.f32 %v1103_v63, %v927_v9 }
 0x1b8   : > { %v3552_v17 = vmax.f32 %v1102_v21, 0.0 }
 0x1b9   : > { %v3554_v35 = vmax.f32 %v1104_v16, 0.0 }
 0x1ba   : > { %v2822_v33 = vpack.i.bf16 %v3552_v17, %v3548_v14 }
 0x1bb   : > { %v2862_v38 = vpack.i.bf16 %v3554_v35, %v3546_v13 }
 0x1e9   : > { %v1172_v19 = vpop.f32.mrb[4].mxu0 }
 0x1ea   : > { %v1173_v20 = vadd.f32 %v1172_v19, %v927_v9  ;;  %v1174_v22 = vpop.f32.mrb[5].mxu0 }
 0x1eb   : > { %v1175_v23 = vadd.f32 %v1174_v22, %v927_v9 }
 0x1ec   : > { %v3556_v24 = vmax.f32 %v1173_v20, 0.0 }
 0x1ed   : > { %v3558_v25 = vmax.f32 %v1175_v23, 0.0 }
 0x1ef   : > { %v2892_v39 = vpack.i.bf16 %v3558_v25, %v3556_v24 }
 0x1f5   : > { %v1243_v58 = vpop.f32.mrb[0].mxu1 }
 0x1f6   : > { %v1244_v26 = vadd.f32 %v1243_v58, %v927_v9  ;;  %v1245_v27 = vpop.f32.mrb[1].mxu1 }
 0x1f7   : > { %v1246_v28 = vadd.f32 %v1245_v27, %v927_v9 }
 0x1f8   : > { %v3560_v29 = vmax.f32 %v1244_v26, 0.0 }
 0x1f9   : > { %v3562_v31 = vmax.f32 %v1246_v28, 0.0 }
 0x1fa   : > { %1727 = vrot.lane.b32.xlu1 %v3560_v29, %s3021_s29  ;;  %1660 = vrot.lane.b32.xlu0 %v3560_v29, %s3020_s28 }
 0x1fb   : > { %v2802_v32 = vpack.i.bf16 %v3562_v31, %v3560_v29 }
 0x1fe   : > { %1861 = vrot.lane.b32.xlu1 %v3560_v29, %s3023_s6  ;;  %1794 = vrot.lane.b32.xlu0 %v3560_v29, %s3022_s30 }
 0x202   : > { %2803 = vrot.lane.b32.xlu1 %v2802_v32, %s3018_s26  ;;  %1851 = vrot.lane.b32.xlu0 %v3548_v14, %s3023_s6 }
 0x206   : > { %2808 = vrot.lane.b32.xlu1 %v2802_v32, %s3017_s25  ;;  %2813 = vrot.lane.b32.xlu0 %v2802_v32, %s3019_s27 }
 0x20a   : > { %2818 = vrot.lane.b32.xlu1 %v2802_v32, %s3016_s24  ;;  %2823 = vrot.lane.b32.xlu0 %v2822_v33, %s3018_s26 }
 0x20b   : > { %v1314_v55 = vpop.f32.mrb[6].mxu0  ;;  %v3639_v44 = vpop.permute.xlu0 %1849 }
 0x20c   : > { %v1315_v30 = vadd.f32 %v1314_v55, %v927_v9  ;;  %v1316_v36 = vpop.f32.mrb[7].mxu0 }
 0x20d   : > { %v1317_v37 = vadd.f32 %v1316_v36, %v927_v9 }
 0x20e   : > { %v3583_v61 = vmax.f32 %v1315_v30, 0.0  ;;  %2833 = vrot.lane.b32.xlu1 %v2822_v33, %s3019_s27  ;;  %2828 = vrot.lane.b32.xlu0 %v2822_v33, %s3017_s25 }
 0x20f   : > { %v1328_v34 = vmax.f32 %v1317_v37, 0.0 }
 0x210   : > { %v2927_v42 = vpack.i.bf16 %v3583_v61, %v3562_v31 }
 0x211   : > { %1339 = vst.msk [vmem:[#allocation3 + $0x48] sm:$0xff] %vm1338_vm5, %v1328_v34  ;;  %vm4015_vm5 = vmmov %vm4011_vm9 }
 0x212   : > { %1341 = vst.msk [vmem:[#allocation3 + $0x48] sm:$0xff] %vm1340_vm11, %v3024_v5  ;;  %2843 = vrot.lane.b32.xlu1 %v2822_v33, %s3020_s28  ;;  %2838 = vrot.lane.b32.xlu0 %v2822_v33, %s3016_s24  ;;  %vm4016_vm11 = vmmov %vm4015_vm5 }
 0x216   : > { %2853 = vrot.lane.b32.xlu1 %v2822_v33, %s3022_s30  ;;  %2848 = vrot.lane.b32.xlu0 %v2822_v33, %s3021_s29 }
 0x219   : > { %v1436_v40 = vld [vmem:[#allocation3 + $0x48] sm:$0xff] }
 0x21a   : > { %1853 = vrot.lane.b32.xlu1 %v3552_v17, %s3023_s6  ;;  %2863 = vrot.lane.b32.xlu0 %v2862_v38, %s3017_s25  ;;  %v2937_v41 = vpack.i.bf16 %v1436_v40, %v3583_v61 }
 0x21e   : > { %2873 = vrot.lane.b32.xlu0 %v2862_v38, %s3016_s24  ;;  %2858 = vrot.lane.b32.xlu1 %v2862_v38, %s3018_s26 }
 0x222   : > { %2883 = vrot.lane.b32.xlu0 %v2862_v38, %s3021_s29  ;;  %2868 = vrot.lane.b32.xlu1 %v2862_v38, %s3019_s27 }
 0x226   : > { %1855 = vrot.lane.b32.xlu0 %v3554_v35, %s3023_s6  ;;  %2878 = vrot.lane.b32.xlu1 %v2862_v38, %s3020_s28 }
 0x22a   : > { %2893 = vrot.lane.b32.xlu0 %v2892_v39, %s3018_s26  ;;  %2888 = vrot.lane.b32.xlu1 %v2862_v38, %s3022_s30 }
 0x22e   : > { %2903 = vrot.lane.b32.xlu0 %v2892_v39, %s3019_s27  ;;  %1857 = vrot.lane.b32.xlu1 %v3556_v24, %s3023_s6 }
 0x232   : > { %2913 = vrot.lane.b32.xlu0 %v2892_v39, %s3020_s28  ;;  %2898 = vrot.lane.b32.xlu1 %v2892_v39, %s3017_s25 }
 0x236   : > { %2923 = vrot.lane.b32.xlu0 %v2892_v39, %s3022_s30  ;;  %2908 = vrot.lane.b32.xlu1 %v2892_v39, %s3016_s24 }
 0x23a   : > { %1859 = vrot.lane.b32.xlu0 %v3558_v25, %s3023_s6  ;;  %2918 = vrot.lane.b32.xlu1 %v2892_v39, %s3021_s29 }
 0x23e   : > { %2938 = vrot.lane.b32.xlu0 %v2937_v41, %s3017_s25  ;;  %2928 = vrot.lane.b32.xlu1 %v2927_v42, %s3020_s28  ;;  %s3034_s25 = smov 100  }
 0x242   : > { %2953 = vrot.lane.b32.xlu0 %v2927_v42, %s3022_s30  ;;  %2933 = vrot.lane.b32.xlu1 %v2937_v41, %s3018_s26  ;;  %s3035_s26 = smov 108  }
 0x246   : > { %2958 = vrot.lane.b32.xlu0 %v2937_v41, %s3016_s24  ;;  %2943 = vrot.lane.b32.xlu1 %v2937_v41, %s3019_s27  ;;  %s3033_s24 = smov 104  }
 0x24a   : > { %1666 = vrot.lane.b32.xlu0 %v1436_v40, %s3020_s28  ;;  %2948 = vrot.lane.b32.xlu1 %v2927_v42, %s3021_s29  ;;  %s3036_s28 = smov 96  }
 0x24e   : > { %1800 = vrot.lane.b32.xlu0 %v1436_v40, %s3022_s30  ;;  %1733 = vrot.lane.b32.xlu1 %v1436_v40, %s3021_s29  ;;  %s3037_s30 = smov 80  }
 0x252   : > { %1865 = vrot.lane.b32.xlu0 %v3583_v61, %s3023_s6  ;;  %1863 = vrot.lane.b32.xlu1 %v3562_v31, %s3023_s6 }
 0x256   : > { %1867 = vrot.lane.b32.xlu1 %v1436_v40, %s3023_s6  ;;  %1981 = vperm.xlu0 %2962, %v1978_v3   ;;  %s3038_s6 = smov 88  }
 0x26c   : > { %v3641_v45 = vpop.permute.xlu1 %1727  ;;  %v3643_v47 = vpop.permute.xlu0 %1660 }
 0x270   : > { %v3645_v50 = vpop.permute.xlu1 %1861  ;;  %v3647_v18 = vpop.permute.xlu0 %1794 }
 0x274   : > { %v3649_v52 = vpop.permute.xlu1 %2803  ;;  %v3651_v53 = vpop.permute.xlu0 %1851 }
 0x278   : > { %v3653_v54 = vpop.permute.xlu1 %2808  ;;  %v3655_v48 = vpop.permute.xlu0 %2813 }
 0x279   : > { %v4006_v56 = vunpack.i.h.bf16 %v3653_v54  ;;  %v2810_v57 = vunpack.i.l.bf16 %v3653_v54  ;;  %v4005_v59 = vunpack.i.h.bf16 %v3655_v48  ;;  %v2815_v60 = vunpack.i.l.bf16 %v3655_v48 }
 0x27b   : > { %v3666_v62 = vsel %vm377_vm3, %v2810_v57, %v4006_v56  ;;  %v3673_v49 = vsel %vm464_vm2, %v2815_v60, %v4005_v59 }
 0x27c   : > { %v3677_v1 = vpop.permute.xlu1 %2818  ;;  %v3679_v2 = vpop.permute.xlu0 %2823 }
 0x27d   : > { %v2826_v4 = vunpack.i.h.bf16 %v3679_v2  ;;  %v2825_v46 = vunpack.i.l.bf16 %v3679_v2 }
 0x27f   : > { %v1401_v6 = vsel %vm4009_vm12, %v2825_v46, %v2826_v4  ;;  %vm4017_vm12 = vmmov %vm4015_vm5 }
 0x280   : > { %v3686_v7 = vpop.permute.xlu1 %2833  ;;  %v3688_v43 = vpop.permute.xlu0 %2828  ;;  %v2674_v8 = vpack.c.bf16 %v1401_v6, %v3548_v14 }
 0x281   : > { %v2836_v21 = vunpack.i.h.bf16 %v3686_v7  ;;  %v2835_v63 = vunpack.i.l.bf16 %v3686_v7  ;;  %v2831_v16 = vunpack.i.h.bf16 %v3688_v43  ;;  %v2830_v14 = vunpack.i.l.bf16 %v3688_v43 }
 0x282   : > { %2675 = vmatprep.subr.bf16.mxu1 %v2674_v8 }
 0x283   : > { %v1468_v28 = vsel %vm377_vm3, %v2830_v14, %v2831_v16  ;;  %v1535_v32 = vsel %vm464_vm2, %v2835_v63, %v2836_v21 }
 0x284   : > { %v3691_v9 = vpop.permute.xlu1 %2843  ;;  %v3693_v10 = vpop.permute.xlu0 %2838  ;;  %v2678_v38 = vpack.c.bf16 %v1535_v32, %v1468_v28 }
 0x285   : > { %v2846_v19 = vunpack.i.h.bf16 %v3691_v9  ;;  %v2845_v23 = vunpack.i.l.bf16 %v3691_v9  ;;  %v2841_v58 = vunpack.i.h.bf16 %v3693_v10  ;;  %v2840_v26 = vunpack.i.l.bf16 %v3693_v10 }
 0x287   : > { %v1602_v39 = vsel %vm530_vm1, %v2840_v26, %v2841_v58  ;;  %v1669_v40 = vsel %vm606_vm4, %v2845_v23, %v2846_v19 }
 0x288   : > { %v3695_v51 = vpop.permute.xlu1 %2853  ;;  %v3697_v11 = vpop.permute.xlu0 %2848  ;;  %v2682_v0 = vpack.c.bf16 %v1669_v40, %v1602_v39 }
 0x289   : > { %v2856_v41 = vunpack.i.h.bf16 %v3695_v51  ;;  %v2855_v42 = vunpack.i.l.bf16 %v3695_v51  ;;  %v2850_v3 = vunpack.i.l.bf16 %v3697_v11 }
 0x28c   : > { %v3699_v12 = vpop.permute.xlu1 %1853  ;;  %v3701_v15 = vpop.permute.xlu0 %2863 }
 0x28d   : > { %v2865_v33 = vunpack.i.l.bf16 %v3701_v15 }
 0x290   : > { %v3708_v20 = vpop.permute.xlu0 %2873  ;;  %v2859_v22 = vpop.permute.xlu1 %2858 }
 0x291   : > { %v2860_v27 = vunpack.i.l.bf16 %v2859_v22  ;;  %v2875_v6 = vunpack.i.l.bf16 %v3708_v20  ;;  %v2861_v59 = vunpack.i.h.bf16 %v2859_v22 }
 0x293   : > { %v1400_v55 = vsel %vm4010_vm15, %v2860_v27, %v2825_v46  ;;  %v1467_v46 = vsel %vm377_vm3, %v2865_v33, %v2830_v14  ;;  %v1803_v14 = vsel %vm780_vm7, %v2855_v42, %v2856_v41  ;;  %vm3028_vm15 = vmmov 0  }
 0x294   : > { %v2676_v30 = vpack.c.bf16 %v1400_v55, %v3546_v13  ;;  %v3722_v36 = vpop.permute.xlu0 %2883  ;;  %v3724_v37 = vpop.permute.xlu1 %2868  ;;  %v2851_v13 = vunpack.i.h.bf16 %v3697_v11 }
 0x295   : > { %v2870_v34 = vunpack.i.l.bf16 %v3724_v37  ;;  %v2885_v33 = vunpack.i.l.bf16 %v3722_v36 }
 0x296   : > { %2677 = vmatpush1.bf16.msra.mxu1 %v2676_v30  ;;  %v1736_v30 = vsel %vm698_vm6, %v2850_v3, %v2851_v13 }
 0x297   : > { %v1534_v8 = vsel %vm464_vm2, %v2870_v34, %v2835_v63  ;;  %2679 = vmatprep.subr.bf16.mxu1 %v2678_v38  ;;  %v1601_v63 = vsel %vm530_vm1, %v2875_v6, %v2840_v26  ;;  %v1735_v26 = vsel %vm698_vm6, %v2885_v33, %v2850_v3  ;;  %v2871_v6 = vunpack.i.h.bf16 %v3724_v37 }
 0x298   : > { %v2680_v27 = vpack.c.bf16 %v1534_v8, %v1467_v46  ;;  %v3740_v28 = vpop.permute.xlu0 %1855  ;;  %v3742_v32 = vpop.permute.xlu1 %2878  ;;  %v2686_v8 = vpack.c.bf16 %v1803_v14, %v1736_v30 }
 0x299   : > { %v2880_v55 = vunpack.i.l.bf16 %v3742_v32  ;;  %v2881_v3 = vunpack.i.h.bf16 %v3742_v32  ;;  %v1536_v37 = vsel %vm464_vm2, %v2836_v21, %v2871_v6  ;;  %v2820_v32 = vunpack.i.l.bf16 %v3677_v1 }
 0x29a   : > { %2681 = vmatpush1.bf16.msra.mxu1 %v2680_v27  ;;  %v1402_v27 = vsel %vm4011_vm9, %v2826_v4, %v2861_v59  ;;  %v2876_v21 = vunpack.i.h.bf16 %v3708_v20  ;;  %vm2436_vm9 = vcmask 490496  }
 0x29b   : > { %v1668_v34 = vsel %vm606_vm4, %v2880_v55, %v2845_v23  ;;  %2683 = vmatprep.subr.bf16.mxu1 %v2682_v0  ;;  %v2805_v55 = vunpack.i.l.bf16 %v3649_v52  ;;  %v1670_v43 = vsel %vm606_vm4, %v2846_v19, %v2881_v3 }
 0x29c   : > { %v2684_v38 = vpack.c.bf16 %v1668_v34, %v1601_v63  ;;  %v2894_v46 = vpop.permute.xlu0 %2893  ;;  %v3754_v39 = vpop.permute.xlu1 %2888  ;;  %v2866_v63 = vunpack.i.h.bf16 %v3701_v15  ;;  %v2692_v34 = vpack.c.bf16 %v1402_v27, %v3552_v17  ;;  %v1869_v17 = vsel %vm851_vm8, %v3639_v44, %v3651_v53 }
 0x29d   : > { %v2895_v22 = vunpack.i.l.bf16 %v2894_v46  ;;  %v2890_v40 = vunpack.i.l.bf16 %v3754_v39  ;;  %v2896_v56 = vunpack.i.h.bf16 %v2894_v46 }
 0x29e   : > { %2685 = vmatpush1.bf16.msra.mxu1 %v2684_v38  ;;  %v1469_v33 = vsel %vm377_vm3, %v2831_v16, %v2866_v63 }
 0x29f   : > { %v1802_v0 = vsel %vm780_vm7, %v2890_v40, %v2855_v42  ;;  %2687 = vmatprep.subr.bf16.mxu1 %v2686_v8  ;;  %v1403_v23 = vsel %vm4012_vm10, %v2861_v59, %v2895_v22  ;;  %v1870_v59 = vsel %vm851_vm8, %v3651_v53, %v3699_v12  ;;  %v1405_v15 = vsel %vm4013_vm13, %v2896_v56, %v2805_v55 }
 0x2a0   : > { %v2688_v30 = vpack.c.bf16 %v1802_v0, %v1735_v26  ;;  %v2904_v14 = vpop.permute.xlu0 %2903  ;;  %v3766_v2 = vpop.permute.xlu1 %1857  ;;  %v2690_v4 = vpack.c.bf16 %v1403_v23, %v3554_v35  ;;  %v1404_v35 = vsel %vm4014_vm14, %v2895_v22, %v2896_v56  ;;  %v3791_v56 = vld [vmem:[%s4001_s3] sm:$0xff]  ;;  %v2706_v44 = vpack.c.bf16 %v1405_v15, %v3558_v25 }
 0x2a1   : > { %v2905_v42 = vunpack.i.l.bf16 %v2904_v14  ;;  %v2906_v38 = vunpack.i.h.bf16 %v2904_v14  ;;  %v2696_v53 = vpack.c.bf16 %v1536_v37, %v1469_v33  ;;  %v2708_v16 = vpack.c.bf16 %v1404_v35, %v3556_v24 }
 0x2a2   : > { %2689 = vmatpush1.bf16.msra.mxu1 %v2688_v30  ;;  %2691 = vmatprep.subr.bf16.mxu0 %v2690_v4  ;;  %v2891_v0 = vunpack.i.h.bf16 %v3754_v39  ;;  %v1872_v11 = vsel %vm851_vm8, %v3740_v28, %v3766_v2  ;;  %vm2457_vm10 = vcmask 359424   ;;  %vm2491_vm13 = vcmask 130048  }
 0x2a3   : > { %2004 = vmatprep.subr.mxu1 %v1870_v59  ;;  %2693 = vmatpush1.bf16.msra.mxu0 %v2692_v34  ;;  %v1537_v25 = vsel %vm464_vm2, %v2871_v6, %v2905_v42  ;;  %v1538_v9 = vsel %vm464_vm2, %v2905_v42, %v2906_v38  ;;  %v1603_v42 = vsel %vm530_vm1, %v2841_v58, %v2876_v21 }
 0x2a4   : > { %v2914_v7 = vpop.permute.xlu0 %2913  ;;  %v2899_v46 = vpop.permute.xlu1 %2898 }
 0x2a5   : > { %v2901_v22 = vunpack.i.h.bf16 %v2899_v46  ;;  %v2900_v40 = vunpack.i.l.bf16 %v2899_v46  ;;  %v2915_v8 = vunpack.i.l.bf16 %v2914_v7  ;;  %v2916_v27 = vunpack.i.h.bf16 %v2914_v7 }
 0x2a6   : > { %2005 = vmatpush1.msra.mxu1 %v1869_v17  ;;  %v2886_v17 = vunpack.i.h.bf16 %v3722_v36  ;;  %v2700_v46 = vpack.c.bf16 %v1670_v43, %v1603_v42 }
 0x2a7   : > { %v1471_v26 = vsel %vm377_vm3, %v2900_v40, %v2901_v22  ;;  %2585 = vmatmul.mubr.msk.f32.vlgmr.msra.gmra.mrb[2].mxu1 %vm1984_vm0, %v3791_v56  ;;  %2707 = vmatprep.subr.bf16.mxu1 %v2706_v44  ;;  %v1470_v20 = vsel %vm377_vm3, %v2866_v63, %v2900_v40  ;;  %v1472_v30 = vsel %vm377_vm3, %v2901_v22, %v2810_v57 }
 0x2a8   : > { %v2924_v19 = vpop.permute.xlu0 %2923  ;;  %v2909_v23 = vpop.permute.xlu1 %2908  ;;  %2709 = vmatpush1.bf16.msra.mxu1 %v2708_v16  ;;  %v2694_v24 = vpack.c.bf16 %v1537_v25, %v1470_v20  ;;  %v2712_v14 = vpack.c.bf16 %v1538_v9, %v1471_v26  ;;  %v1539_v63 = vsel %vm464_vm2, %v2906_v38, %v2815_v60  ;;  %2194 = vmatprep.mubr.f32.mxu1 %v3024_v5  ;;  %v2806_v25 = vunpack.i.h.bf16 %v3649_v52 }
 0x2a9   : > { %v2911_v4 = vunpack.i.h.bf16 %v2909_v23  ;;  %v2910_v34 = vunpack.i.l.bf16 %v2909_v23  ;;  %v2926_v39 = vunpack.i.h.bf16 %v2924_v19  ;;  %v2925_v6 = vunpack.i.l.bf16 %v2924_v19 }
 0x2aa   : > { %2695 = vmatprep.subr.bf16.mxu0 %v2694_v24  ;;  %v2710_v59 = vpack.c.bf16 %v1539_v63, %v1472_v30  ;;  %v1671_v15 = vsel %vm606_vm4, %v2881_v3, %v2915_v8  ;;  %v1673_v60 = vsel %vm606_vm4, %v2916_v27, %v3643_v47  ;;  %v1672_v22 = vsel %vm606_vm4, %v2915_v8, %v2916_v27 }
 0x2ab   : > { %v1605_v37 = vsel %vm530_vm1, %v2910_v34, %v2911_v4  ;;  %2697 = vmatpush1.bf16.msra.mxu0 %v2696_v53  ;;  %v1604_v57 = vsel %vm530_vm1, %v2876_v21, %v2910_v34  ;;  %v1606_v35 = vsel %vm530_vm1, %v2911_v4, %v2820_v32  ;;  %v1804_v53 = vsel %vm780_vm7, %v2856_v41, %v2891_v0 }
 0x2ac   : > { %2711 = vmatprep.subr.bf16.mxu1 %v2710_v59  ;;  %v1860_v3 = vpop.permute.xlu0 %1859  ;;  %v2919_v33 = vpop.permute.xlu1 %2918  ;;  %v2698_v38 = vpack.c.bf16 %v1671_v15, %v1604_v57  ;;  %v2714_v7 = vpack.c.bf16 %v1673_v60, %v1606_v35  ;;  %v2716_v10 = vpack.c.bf16 %v1672_v22, %v1605_v37  ;;  %v1805_v36 = vsel %vm780_vm7, %v2891_v0, %v2925_v6 }
 0x2ad   : > { %v2921_v40 = vunpack.i.h.bf16 %v2919_v33  ;;  %v2920_v44 = vunpack.i.l.bf16 %v2919_v33  ;;  %2713 = vmatpush1.bf16.msra.mxu1 %v2712_v14  ;;  %v1807_v43 = vsel %vm780_vm7, %v2926_v39, %v3647_v18  ;;  %v1737_v51 = vsel %vm698_vm6, %v2851_v13, %v2886_v17 }
 0x2ae   : > { %2699 = vmatprep.subr.bf16.mxu0 %v2698_v38  ;;  %2715 = vmatprep.subr.bf16.mxu1 %v2714_v7  ;;  %v2704_v20 = vpack.c.bf16 %v1804_v53, %v1737_v51  ;;  %v1806_v0 = vsel %vm780_vm7, %v2925_v6, %v2926_v39  ;;  %v1874_v30 = vsel %vm851_vm8, %v1860_v3, %v3645_v50  ;;  %v2821_v60 = vunpack.i.h.bf16 %v3677_v1 }
 0x2af   : > { %2701 = vmatpush1.bf16.msra.mxu0 %v2700_v46  ;;  %v1738_v58 = vsel %vm698_vm6, %v2886_v17, %v2920_v44  ;;  %v1740_v21 = vsel %vm698_vm6, %v2921_v40, %v3641_v45  ;;  %v1739_v41 = vsel %vm698_vm6, %v2920_v44, %v2921_v40  ;;  %v1406_v14 = vsel %vm4015_vm5, %v2805_v55, %v2806_v25 }
 0x2b0   : > { %v2939_v16 = vpop.permute.xlu0 %2938  ;;  %v3839_v8 = vpop.permute.xlu1 %2928  ;;  %v2702_v27 = vpack.c.bf16 %v1805_v36, %v1738_v58  ;;  %v2718_v26 = vpack.c.bf16 %v1807_v43, %v1740_v21  ;;  %v2720_v9 = vpack.c.bf16 %v1806_v0, %v1739_v41  ;;  %v1871_v4 = vsel %vm851_vm8, %v3699_v12, %v3740_v28 }
 0x2b1   : > { %2717 = vmatpush1.bf16.msra.mxu1 %v2716_v10  ;;  %v2941_v34 = vunpack.i.h.bf16 %v2939_v16  ;;  %v2940_v63 = vunpack.i.l.bf16 %v2939_v16  ;;  %v1873_v59 = vsel %vm851_vm8, %v3766_v2, %v1860_v3  ;;  %v2724_v28 = vpack.c.bf16 %v1406_v14, %v3560_v29 }
 0x2b2   : > { %2703 = vmatprep.subr.bf16.mxu0 %v2702_v27  ;;  %2719 = vmatprep.subr.bf16.mxu1 %v2718_v26  ;;  %v2930_v42 = vunpack.i.l.bf16 %v3839_v8  ;;  %v4018_v17 = vunpack.i.h.bf16 %v3653_v54  ;;  %v4019_v33 = vunpack.i.h.bf16 %v3655_v48  ;;  %v4020_v16 = vpack.c.bf16 %v3673_v49, %v3666_v62 }
 0x2b3   : > { %2705 = vmatpush1.bf16.msra.mxu0 %v2704_v20  ;;  %v1475_v2 = vsel %vm377_vm3, %v2940_v63, %v2941_v34  ;;  %v1607_v20 = vsel %vm530_vm1, %v2820_v32, %v2821_v60 }
 0x2b4   : > { %v3846_v13 = vpop.permute.xlu0 %2953  ;;  %v2934_v19 = vpop.permute.xlu1 %2933  ;;  %2075 = vmatprep.subr.mxu0 %v1872_v11  ;;  %v1474_v3 = vsel %vm377_vm3, %v4018_v17, %v2940_v63  ;;  %v1674_v43 = vsel %vm606_vm4, %v3643_v47, %v2930_v42  ;;  %vm2353_vm3 = vcmask 785920  }
 0x2b5   : > { %v2936_v23 = vunpack.i.h.bf16 %v2934_v19  ;;  %v2935_v24 = vunpack.i.l.bf16 %v2934_v19  ;;  %2721 = vmatpush1.bf16.msra.mxu1 %v2720_v9  ;;  %v2956_v54 = vunpack.i.h.bf16 %v3846_v13  ;;  %v2955_v48 = vunpack.i.l.bf16 %v3846_v13 }
 0x2b6   : > { %2146 = vmatprep.subr.mxu1 %v1874_v30  ;;  %v2732_v47 = vpack.c.bf16 %v1674_v43, %v1607_v20 }
 0x2b7   : > { %v1408_v39 = vsel %vm4016_vm11, %v2935_v24, %v2936_v23  ;;  %2076 = vmatpush1.msra.mxu0 %v1871_v4  ;;  %v1407_v6 = vsel %vm4017_vm12, %v2806_v25, %v2935_v24  ;;  %v1809_v11 = vsel %vm780_vm7, %v2955_v48, %v2956_v54  ;;  %v1808_v1 = vsel %vm780_vm7, %v3647_v18, %v2955_v48 }
 0x2b8   : > { %v2739_v15 = vpack.c.bf16 %v1408_v39, %v3583_v61  ;;  %v2959_v52 = vpop.permute.xlu0 %2958  ;;  %v2944_v37 = vpop.permute.xlu1 %2943  ;;  %2586 = vmatmul.mubr.msk.f32.vlgmr.msra.gmra.mrb[8].mxu0 %vm1984_vm0, %v3791_v56  ;;  %v2722_v12 = vpack.c.bf16 %v1407_v6, %v3562_v31  ;;  %v2931_v61 = vunpack.i.h.bf16 %v3839_v8  ;;  %v3027_v31 = vmov 0.0|0.0  }
 0x2b9   : > { %v2960_v55 = vunpack.i.l.bf16 %v2959_v52  ;;  %v2946_v57 = vunpack.i.h.bf16 %v2944_v37  ;;  %v2945_v35 = vunpack.i.l.bf16 %v2944_v37  ;;  %2147 = vmatpush1.msra.mxu1 %v1873_v59  ;;  %2265 = vmatprep.mubr.f32.mxu0 %v3024_v5  ;;  %v2961_v7 = vunpack.i.h.bf16 %v2959_v52 }
 0x2ba   : > { %2587 = vmatmul.mubr.msk.f32.vlgmr.msra.gmra.mrb[4].mxu1 %vm1984_vm0, %v3791_v56  ;;  %2738 = vmatprep.subr.bf16.mxu1 %v3027_v31  ;;  %v1675_v21 = vsel %vm606_vm4, %v2930_v42, %v2931_v61 }
 0x2bb   : > { %v1542_v29 = vsel %vm464_vm2, %v2945_v35, %v2946_v57  ;;  %2723 = vmatprep.subr.bf16.mxu0 %v2722_v12  ;;  %2740 = vmatpush3.bf16.msra.mxu1 %v2739_v15  ;;  %v1541_v38 = vsel %vm464_vm2, %v4019_v33, %v2945_v35  ;;  %v1608_v53 = vsel %vm530_vm1, %v2821_v60, %v2960_v55  ;;  %vm2348_vm2 = vcmask 523520  }
 0x2bc   : > { %v2742_v46 = vpack.c.bf16 %v1542_v29, %v1475_v2  ;;  %2725 = vmatpush1.bf16.msra.mxu0 %v2724_v28  ;;  %v1667_v22 = vpop.permute.xlu0 %1666  ;;  %v2949_v40 = vpop.permute.xlu1 %2948  ;;  %2741 = vmatprep.subr.bf16.mxu1 %v3027_v31  ;;  %v2726_v44 = vpack.c.bf16 %v1541_v38, %v1474_v3  ;;  %v2730_v51 = vpack.c.bf16 %v1675_v21, %v1608_v53 }
 0x2bd   : > { %v2951_v10 = vunpack.i.h.bf16 %v2949_v40  ;;  %v2950_v58 = vunpack.i.l.bf16 %v2949_v40  ;;  %2621 = vmatprep.mubr.msk.f32.mxu1 %vm3028_vm15, %v3024_v5  ;;  %v1676_v36 = vsel %vm606_vm4, %v2931_v61, %v1667_v22  ;;  %v1609_v41 = vsel %vm530_vm1, %v2960_v55, %v2961_v7 }
 0x2be   : > { %2727 = vmatprep.subr.bf16.mxu0 %v2726_v44  ;;  %v2745_v25 = vpack.c.bf16 %v1676_v36, %v1609_v41  ;;  %vm2342_vm1 = vcmask 261120   ;;  %vm2360_vm4 = vcmask 949248  }
 0x2bf   : > { %2743 = vmatpush3.bf16.msra.mxu1 %v2742_v46  ;;  %v1742_v26 = vsel %vm698_vm6, %v2950_v58, %v2951_v10  ;;  %v1741_v62 = vsel %vm698_vm6, %v3641_v45, %v2950_v58 }
 0x2c0   : > { %2729 = vmatpush1.bf16.msra.mxu0 %v4020_v16  ;;  %v1801_v8 = vpop.permute.xlu0 %1800  ;;  %v1734_v27 = vpop.permute.xlu1 %1733  ;;  %2744 = vmatprep.subr.bf16.mxu1 %v3027_v31  ;;  %v2734_v49 = vpack.c.bf16 %v1809_v11, %v1742_v26  ;;  %v2736_v23 = vpack.c.bf16 %v1808_v1, %v1741_v62 }
 0x2c1   : > { %2731 = vmatprep.subr.bf16.mxu0 %v2730_v51  ;;  %v1810_v0 = vsel %vm780_vm7, %v2956_v54, %v1801_v8  ;;  %v1743_v9 = vsel %vm698_vm6, %v2951_v10, %v1734_v27  ;;  %vm2363_vm6 = vcmask 1048320   ;;  %vm2399_vm7 = vcmask 719872  }
 0x2c2   : > { %v2748_v32 = vpack.c.bf16 %v1810_v0, %v1743_v9 }
 0x2c3   : > { %2746 = vmatpush3.bf16.msra.mxu1 %v2745_v25 }
 0x2c4   : > { %2733 = vmatpush1.bf16.msra.mxu0 %v2732_v47  ;;  %v1864_v13 = vpop.permute.xlu1 %1863  ;;  %2747 = vmatprep.subr.bf16.mxu1 %v3027_v31  ;;  %v1866_v19 = vpop.permute.xlu0 %1865 }
 0x2c5   : > { %2735 = vmatprep.subr.bf16.mxu0 %v2734_v49  ;;  %v1876_v30 = vsel %vm851_vm8, %v1864_v13, %v1866_v19  ;;  %v1875_v14 = vsel %vm851_vm8, %v3645_v50, %v1864_v13 }
 0x2c7   : > { %2749 = vmatpush3.bf16.msra.mxu1 %v2748_v32 }
 0x2c8   : > { %2737 = vmatpush1.bf16.msra.mxu0 %v2736_v23  ;;  %v1868_v24 = vpop.permute.xlu1 %1867  ;;  %2619 = vmatprep.subr.mxu1 %v3024_v5 }
 0x2c9   : > { %v1877_v45 = vsel %vm851_vm8, %v1866_v19, %v1868_v24  ;;  %2217 = vmatprep.subr.mxu0 %v1876_v30  ;;  %vm2382_vm8 = vcmask 818176  }
 0x2cb   : > { %2620 = vmatpush3.msra.mxu1 %v1877_v45 }
 0x2cc   : > { %2218 = vmatpush1.msra.mxu0 %v1875_v14  ;;  %2622 = vmatmul.mubr.msk.f32.vlgmr.msra.gmra.mrb[6].mxu1 %vm1984_vm0, %v3791_v56 }
 0x2cd   : > { %2588 = vmatmul.mubr.msk.f32.vlgmr.msra.gmra.mrb[10].mxu0 %vm1984_vm0, %v3791_v56 }
 0x2d5   : > { %v3912_v18 = vpop.permute.xlu0 %1981 }
 0x37a   : > { %v2054_v4 = vpop.f32.mrb[2].mxu1 }
 0x37b   : > { %v2055_v5 = vadd.f32 %v2054_v4, %v3912_v18  ;;  %v2056_v50 = vpop.f32.mrb[3].mxu1 }
 0x37c   : > { %v2057_v56 = vadd.f32 %v2056_v50, %v3912_v18 }
 0x37d   : > { %2356 = vrot.lane.b32.xlu0 %v2055_v5, %s3029_s21  ;;  %2345 = vrot.lane.b32.xlu1 %v2055_v5, %s3030_s22  ;;  %2343 = vst.msk [vmem:[%s3917_s20] sm:$0xff] %vm2342_vm1, %v2055_v5  ;;  %s3052_s22 = smov 36  }
 0x381   : > { %2365 = vrot.lane.b32.xlu0 %v2057_v56, %s3031_s19  ;;  %2350 = vrot.lane.b32.xlu1 %v2055_v5, %s3032_s23  ;;  %s3054_s19 = smov 20   ;;  %s3055_s23 = smov 12  }
 0x385   : > { %2373 = vrot.lane.b32.xlu0 %v2057_v56, %s3033_s24  ;;  %2358 = vrot.lane.b32.xlu1 %v2057_v56, %s3029_s21  ;;  %s3051_s21 = smov 24   ;;  %s3056_s24 = smov 8  }
 0x389   : > { %2378 = vrot.lane.b32.xlu0 %v2057_v56, %s3034_s25  ;;  %2369 = vrot.lane.b32.xlu1 %v2057_v56, %s3035_s26 }
 0x38b   : > { %v2125_v34 = vpop.f32.mrb[8].mxu0 }
 0x38c   : > { %v2126_v63 = vadd.f32 %v2125_v34, %v3912_v18  ;;  %v2127_v39 = vpop.f32.mrb[9].mxu0 }
 0x38d   : > { %v2196_v6 = vpop.f32.mrb[4].mxu1  ;;  %v2128_v15 = vadd.f32 %v2127_v39, %v3912_v18 }
 0x38e   : > { %v2198_v59 = vpop.f32.mrb[5].mxu1  ;;  %2390 = vrot.lane.b32.xlu0 %v2126_v63, %s3019_s27  ;;  %2386 = vrot.lane.b32.xlu1 %v2126_v63, %s3036_s28  ;;  %v2197_v52 = vadd.f32 %v2196_v6, %v3912_v18  ;;  %s3043_s27 = smov 60  }
 0x38f   : > { %v2199_v57 = vadd.f32 %v2198_v59, %v3912_v18 }
 0x392   : > { %2407 = vrot.lane.b32.xlu0 %v2128_v15, %s3037_s30  ;;  %2395 = vrot.lane.b32.xlu1 %v2126_v63, %s3038_s6 }
 0x396   : > { %2397 = vrot.lane.b32.xlu0 %v2128_v15, %s3038_s6  ;;  %2380 = vrot.lane.b32.xlu1 %v2126_v63, %s3034_s25  ;;  %s3057_s25 = smov 4  }
 0x39a   : > { %2416 = vrot.lane.b32.xlu0 %v2128_v15, %s3039_s7  ;;  %2411 = vrot.lane.b32.xlu1 %v2128_v15, %s3040_s8 }
 0x39e   : > { %2403 = vrot.lane.b32.xlu0 %v2128_v15, %s3041_s9  ;;  %2427 = vrot.lane.b32.xlu1 %v2197_v52, %s3042_s10 }
 0x39f   : > { %v2338_v37 = vpop.f32.mrb[6].mxu1 }
 0x3a0   : > { %v2267_v12 = vpop.f32.mrb[10].mxu0  ;;  %v2623_v28 = vpop.f32.mrb[7].mxu1  ;;  %v2339_v2 = vadd.f32 %v2338_v37, %v3912_v18 }
 0x3a1   : > { %v2269_v55 = vpop.f32.mrb[11].mxu0  ;;  %v2268_v35 = vadd.f32 %v2267_v12, %v3912_v18 }
 0x3a2   : > { %2432 = vrot.lane.b32.xlu0 %v2197_v52, %s3043_s27  ;;  %2418 = vrot.lane.b32.xlu1 %v2197_v52, %s3039_s7  ;;  %v2270_v60 = vadd.f32 %v2269_v55, %v3912_v18 }
 0x3a6   : > { %2448 = vrot.lane.b32.xlu0 %v2199_v57, %s3044_s11  ;;  %2423 = vrot.lane.b32.xlu1 %v2197_v52, %s3045_s12 }
 0x3aa   : > { %2440 = vrot.lane.b32.xlu0 %v2199_v57, %s3021_s29  ;;  %2434 = vrot.lane.b32.xlu1 %v2199_v57, %s3043_s27  ;;  %s3053_s29 = smov 16  }
 0x3ae   : > { %2444 = vrot.lane.b32.xlu0 %v2199_v57, %s3046_s13  ;;  %2453 = vrot.lane.b32.xlu1 %v2199_v57, %s3047_s14 }
 0x3b2   : > { %2455 = vrot.lane.b32.xlu0 %v2268_v35, %s3047_s14  ;;  %2469 = vrot.lane.b32.xlu1 %v2268_v35, %s3048_s15 }
 0x3b6   : > { %2474 = vrot.lane.b32.xlu0 %v2270_v60, %s3049_s16  ;;  %2461 = vrot.lane.b32.xlu1 %v2268_v35, %s3050_s17 }
 0x3ba   : > { %2478 = vrot.lane.b32.xlu0 %v2270_v60, %s3051_s21  ;;  %2465 = vrot.lane.b32.xlu1 %v2268_v35, %s3052_s22 }
 0x3be   : > { %2489 = vrot.lane.b32.xlu0 %v2339_v2, %s3053_s29  ;;  %2487 = vrot.lane.b32.xlu1 %v2270_v60, %s3053_s29 }
 0x3c2   : > { %2482 = vrot.lane.b32.xlu0 %v2270_v60, %s3054_s19  ;;  %2495 = vrot.lane.b32.xlu1 %v2339_v2, %s3055_s23 }
 0x3c6   : > { %2499 = vrot.lane.b32.xlu1 %v2339_v2, %s3056_s24 }
 0x3ca   : > { %2503 = vrot.lane.b32.xlu1 %v2339_v2, %s3057_s25 }
 0x3ef   : > { %v2357_v61 = vpop.permute.xlu0 %2356  ;;  %v2346_v42 = vpop.permute.xlu1 %2345 }
 0x3f0   : > { %2349 = vst.msk [vmem:[%s3917_s20] sm:$0xff] %vm2348_vm2, %v2346_v42 }
 0x3f3   : > { %v2366_v31 = vpop.permute.xlu0 %2365  ;;  %v2351_v29 = vpop.permute.xlu1 %2350 }
 0x3f4   : > { %2368 = vst.msk [vmem:[%s3917_s20 + $0x8] sm:$0xff] %vm2342_vm1, %v2366_v31 }
 0x3f5   : > { %2354 = vst.msk [vmem:[%s3917_s20] sm:$0xff] %vm2353_vm3, %v2351_v29 }
 0x3f7   : > { %v2374_v17 = vpop.permute.xlu0 %2373  ;;  %v2359_v3 = vpop.permute.xlu1 %2358 }
 0x3f8   : > { %v2361_v33 = vsel %vm2360_vm4, %v2357_v61, %v2359_v3 }
 0x3f9   : > { %2364 = vst.msk [vmem:[%s3917_s20] sm:$0xff] %vm2363_vm6, %v2361_v33 }
 0x3fb   : > { %v2379_v38 = vpop.permute.xlu0 %2378  ;;  %v2370_v7 = vpop.permute.xlu1 %2369 }
 0x3fc   : > { %2372 = vst.msk [vmem:[%s3917_s20 + $0x8] sm:$0xff] %vm2348_vm2, %v2370_v7 }
 0x3fd   : > { %2376 = vst.msk [vmem:[%s3917_s20 + $0x8] sm:$0xff] %vm2353_vm3, %v2374_v17 }
 0x400   : > { %v2391_v46 = vpop.permute.xlu0 %2390  ;;  %v2387_v22 = vpop.permute.xlu1 %2386 }
 0x401   : > { %2389 = vst.msk [vmem:[%s3917_s20 + $0x10] sm:$0xff] %vm2342_vm1, %v2387_v22 }
 0x402   : > { %2393 = vst.msk [vmem:[%s3917_s20 + $0x10] sm:$0xff] %vm2348_vm2, %v2391_v46 }
 0x404   : > { %v2408_v40 = vpop.permute.xlu0 %2407  ;;  %v2396_v44 = vpop.permute.xlu1 %2395 }
 0x405   : > { %2410 = vst.msk [vmem:[%s3917_s20 + $0x18] sm:$0xff] %vm2342_vm1, %v2408_v40 }
 0x408   : > { %v2398_v53 = vpop.permute.xlu0 %2397  ;;  %v2381_v10 = vpop.permute.xlu1 %2380 }
 0x409   : > { %v2400_v58 = vsel %vm2399_vm7, %v2396_v44, %v2398_v53  ;;  %v2383_v54 = vsel %vm2382_vm8, %v2379_v38, %v2381_v10 }
 0x40a   : > { %2402 = vst.msk [vmem:[%s3917_s20 + $0x10] sm:$0xff] %vm2353_vm3, %v2400_v58 }
 0x40b   : > { %2385 = vst.msk [vmem:[%s3917_s20 + $0x8] sm:$0xff] %vm2363_vm6, %v2383_v54 }
 0x40c   : > { %v2417_v48 = vpop.permute.xlu0 %2416  ;;  %v2412_v36 = vpop.permute.xlu1 %2411 }
 0x40d   : > { %2414 = vst.msk [vmem:[%s3917_s20 + $0x18] sm:$0xff] %vm2348_vm2, %v2412_v36 }
 0x410   : > { %v2404_v21 = vpop.permute.xlu0 %2403  ;;  %v2428_v43 = vpop.permute.xlu1 %2427 }
 0x411   : > { %2406 = vst.msk [vmem:[%s3917_s20 + $0x10] sm:$0xff] %vm2363_vm6, %v2404_v21 }
 0x412   : > { %2430 = vst.msk [vmem:[%s3917_s20 + $0x20] sm:$0xff] %vm2342_vm1, %v2428_v43 }
 0x414   : > { %v2433_v51 = vpop.permute.xlu0 %2432  ;;  %v2419_v41 = vpop.permute.xlu1 %2418 }
 0x415   : > { %v2420_v16 = vsel %vm1984_vm0, %v2417_v48, %v2419_v41 }
 0x416   : > { %2422 = vst.msk [vmem:[%s3917_s20 + $0x18] sm:$0xff] %vm2353_vm3, %v2420_v16 }
 0x418   : > { %v2449_v8 = vpop.permute.xlu0 %2448  ;;  %v2424_v27 = vpop.permute.xlu1 %2423 }
 0x419   : > { %2451 = vst.msk [vmem:[%s3917_s20 + $0x28] sm:$0xff] %vm2342_vm1, %v2449_v8 }
 0x41a   : > { %2426 = vst.msk [vmem:[%s3917_s20 + $0x18] sm:$0xff] %vm2363_vm6, %v2424_v27 }
 0x41c   : > { %v2441_v26 = vpop.permute.xlu0 %2440  ;;  %v2435_v20 = vpop.permute.xlu1 %2434 }
 0x41d   : > { %v2437_v25 = vsel %vm2436_vm9, %v2433_v51, %v2435_v20 }
 0x41e   : > { %2439 = vst.msk [vmem:[%s3917_s20 + $0x20] sm:$0xff] %vm2348_vm2, %v2437_v25 }
 0x41f   : > { %2443 = vst.msk [vmem:[%s3917_s20 + $0x20] sm:$0xff] %vm2353_vm3, %v2441_v26 }
 0x420   : > { %v2445_v47 = vpop.permute.xlu0 %2444  ;;  %v2454_v0 = vpop.permute.xlu1 %2453 }
 0x421   : > { %2447 = vst.msk [vmem:[%s3917_s20 + $0x20] sm:$0xff] %vm2363_vm6, %v2445_v47 }
 0x424   : > { %v2456_v9 = vpop.permute.xlu0 %2455  ;;  %v2470_v11 = vpop.permute.xlu1 %2469 }
 0x425   : > { %v2458_v62 = vsel %vm2457_vm10, %v2454_v0, %v2456_v9  ;;  %2472 = vst.msk [vmem:[%s3917_s20 + $0x30] sm:$0xff] %vm2342_vm1, %v2470_v11 }
 0x426   : > { %2460 = vst.msk [vmem:[%s3917_s20 + $0x28] sm:$0xff] %vm2348_vm2, %v2458_v62 }
 0x428   : > { %v2475_v49 = vpop.permute.xlu0 %2474  ;;  %v2462_v13 = vpop.permute.xlu1 %2461 }
 0x429   : > { %2477 = vst.msk [vmem:[%s3917_s20 + $0x30] sm:$0xff] %vm2348_vm2, %v2475_v49 }
 0x42a   : > { %2464 = vst.msk [vmem:[%s3917_s20 + $0x28] sm:$0xff] %vm2353_vm3, %v2462_v13 }
 0x42c   : > { %v2479_v1 = vpop.permute.xlu0 %2478  ;;  %v2466_v32 = vpop.permute.xlu1 %2465 }
 0x42d   : > { %2481 = vst.msk [vmem:[%s3917_s20 + $0x30] sm:$0xff] %vm2353_vm3, %v2479_v1 }
 0x42e   : > { %2468 = vst.msk [vmem:[%s3917_s20 + $0x28] sm:$0xff] %vm2363_vm6, %v2466_v32 }
 0x430   : > { %v2490_v19 = vpop.permute.xlu0 %2489  ;;  %v2488_v23 = vpop.permute.xlu1 %2487 }
 0x431   : > { %v2492_v24 = vsel %vm2491_vm13, %v2488_v23, %v2490_v19 }
 0x432   : > { %2494 = vst.msk [vmem:[%s3917_s20 + $0x38] sm:$0xff] %vm2342_vm1, %v2492_v24 }
 0x434   : > { %v2483_v30 = vpop.permute.xlu0 %2482  ;;  %v2496_v45 = vpop.permute.xlu1 %2495 }
 0x435   : > { %2485 = vst.msk [vmem:[%s3917_s20 + $0x30] sm:$0xff] %vm2363_vm6, %v2483_v30 }
 0x436   : > { %2498 = vst.msk [vmem:[%s3917_s20 + $0x38] sm:$0xff] %vm2348_vm2, %v2496_v45 }
 0x438   : > { %v2500_v14 = vpop.permute.xlu1 %2499 }
 0x439   : > { %2502 = vst.msk [vmem:[%s3917_s20 + $0x38] sm:$0xff] %vm2353_vm3, %v2500_v14 }
 0x43c   : > { %v2504_v18 = vpop.permute.xlu1 %2503 }
 0x43d   : > { %2506 = vst.msk [vmem:[%s3917_s20 + $0x38] sm:$0xff] %vm2363_vm6, %v2504_v18 }
 0x43e PF: > { %s15_s18 = sadd.s32 1, %s3014_s18  }
 0x43f   : > { %p12_p4 = scmp.ge.s32.totalorder %s15_s18, 4  }
 0x441   :  { %14 = sbr.rel (!%p12_p4) target bundleno = 1 (0x1), region = 70 }

// kernel: encoder_forward.5
= control target key start
LH: loop header
LB: loop body
LE: loop exit
PB: predicated region body
PF: predicated region fallthrough
CT: control target
= control target key end

     0   :  { %s1250_s18 = smov 0   ;;  %s1492_s0 = inlined_call_operand.vmem [shape: f32[2,16,36], index: 0, kind: input, shape index: {}]   ;;  %s1493_s1 = inlined_call_operand.vmem [shape: f32[32,144], index: 1, kind: input, shape index: {}]   ;;  %s1494_s2 = inlined_call_operand.vmem [shape: f32[32,1], index: 2, kind: input, shape index: {}]   ;;  %s1495_s3 = inlined_call_operand.vmem [shape: f32[32,288], index: 3, kind: input, shape index: {}]   ;;  %s1496_s4 = inlined_call_operand.vmem [shape: f32[32,1], index: 4, kind: input, shape index: {}]   ;;  %s1497_s5 = inlined_call_operand.vmem [shape: f32[2,32,4], index: 5, kind: output, shape index: {}]  }
   0x1 LB: > { %s1024_s19 = sadd.s32 4294967295, %s1206_s18   ;;  %p1028_p0 = scmp.ge.s32.totalorder %s1206_s18, 1  ;;  %s1206_s18 = sphi %s1250_s18, %s15_s18  }
   0x2   : > { %p187_p1 = scmp.lt.s32.totalorder %s1206_s18, 3 }
   0x4   : > { %p188_p2 = pnand %p1028_p0, %p187_p1 }
   0x5   : > { %p215_p3 = scmp.lt.s32.totalorder (!%p188_p2), %s1024_s19, 1  ;;  %v1208_v0 = vmov (!%p188_p2), 0.0|0.0   ;;  %vm227_vm0 = vcmask (!%p188_p2), 179200   ;;  %s1209_s24 = smov (!%p188_p2), 126   ;;  %v327_v6 = vld [vmem:[%s1493_s1 + $0x8] sm:$0xff] (!%p188_p2)  ;;  %vm376_vm1 = vcmask (!%p188_p2), 130048  }
   0x6   : > { %191 = sbr.rel (%p188_p2) target bundleno = 937 (0x3a9), region = 40  ;;  %1111 = vmatprep.subr.bf16.mxu0 (!%p188_p2), %v1208_v0  ;;  %s1210_s25 = smov (!%p188_p2), 127   ;;  %1033 = vmatprep.mubr.msk.f32.mxu0 (!%p188_p2), %vm376_vm1, %v327_v6  ;;  %v353_v7 = vld [vmem:[%s1494_s2 + $0x8] sm:$0xff] (!%p188_p2)  ;;  %v352_v8 = vld [vmem:[%s1494_s2] sm:$0xff] (!%p188_p2)  ;;  %v1217_v9 = vmov (!%p188_p2), 0   ;;  %v354_v10 = vld [vmem:[%s1494_s2 + $0x10] sm:$0xff] (!%p188_p2) }
   0x7   : > { %s1211_s26 = smov (!%p188_p2), 122   ;;  %s1212_s27 = smov (!%p188_p2), 121   ;;  %1199 = vset.pattern.permute.xlu1 (!%p188_p2), %v1217_v9  ;;  %1198 = vset.pattern.permute.xlu0 (!%p188_p2), %v1217_v9  ;;  %v355_v11 = vld [vmem:[%s1494_s2 + $0x18] sm:$0xff] (!%p188_p2)  ;;  %v326_v52 = vld [vmem:[%s1493_s1] sm:$0xff] (!%p188_p2)  ;;  %v328_v54 = vld [vmem:[%s1493_s1 + $0x10] sm:$0xff] (!%p188_p2)  ;;  %vm482_vm2 = vcmask (!%p188_p2), 212144  }
   0x8   : > { %s1213_s28 = smov (!%p188_p2), 120   ;;  %s1214_s29 = smov (!%p188_p2), 116   ;;  %v329_v53 = vld [vmem:[%s1493_s1 + $0x18] sm:$0xff] (!%p188_p2)  ;;  %v331_v55 = vld [vmem:[%s1493_s1 + $0x28] sm:$0xff] (!%p188_p2)  ;;  %v330_v56 = vld [vmem:[%s1493_s1 + $0x20] sm:$0xff] (!%p188_p2)  ;;  %vm491_vm3 = vcmask (!%p188_p2), 97280  }
   0x9   : > { %s1215_s30 = smov (!%p188_p2), 115   ;;  %s1216_s6 = smov (!%p188_p2), 114   ;;  %v333_v57 = vld [vmem:[%s1493_s1 + $0x38] sm:$0xff] (!%p188_p2)  ;;  %v332_v58 = vld [vmem:[%s1493_s1 + $0x30] sm:$0xff] (!%p188_p2)  ;;  %vm760_vm4 = vcmask (!%p188_p2), 261120   ;;  %vm943_vm5 = vcmask (!%p188_p2), 15360  }
   0xa   : > { %vm964_vm6 = vcmask (!%p188_p2), 31760  }
   0xd   : > { %s1499_s19 = smov (!%p215_p3, %s1024_s19), 1 }
   0xe   : > { %s1043_s20 = sshll.u32 %s1499_s19, 4 }
   0xf   : > { %s219_s23 = scalar_lea.vmem %s1492_s0, %s1043_s20  ;;  %s1044_s20 = sshll.u32 %s1499_s19, 5 }
  0x10   : > { %v242_v1 = vld [vmem:[%s219_s23] sm:$0xff]  ;;  %v243_v2 = vld [vmem:[%s219_s23 + $0x8] sm:$0xff]  ;;  %s1475_s22 = scalar_lea.vmem %s1497_s5, %s1044_s20  ;;  %s1219_s19 = smov 124  }
  0x11   : > { %246 = vrot.lane.b32.xlu1 %v242_v1, %s1209_s24  ;;  %234 = vrot.lane.b32.xlu0 %v242_v1, %s1210_s25  ;;  %228 = vst.msk [vmem:[#allocation2] sm:$0xff] %vm227_vm0, %v242_v1  ;;  %229 = vst.msk [vmem:[#allocation2 + $0x8] sm:$0xff] %vm227_vm0, %v243_v2 }
  0x15   : > { %248 = vrot.lane.b32.xlu1 %v243_v2, %s1209_s24  ;;  %236 = vrot.lane.b32.xlu0 %v243_v2, %s1210_s25 }
  0x18   : > { %v334_v3 = vld [vmem:[#allocation2] sm:$0xff]  ;;  %v335_v4 = vld [vmem:[#allocation2 + $0x8] sm:$0xff] }
  0x19   : > { %260 = vrot.lane.b32.xlu1 %v243_v2, %s1211_s26  ;;  %258 = vrot.lane.b32.xlu0 %v242_v1, %s1211_s26  ;;  %v1112_v5 = vpack.c.bf16 %v335_v4, %v334_v3  ;;  %v1218_v4 = vmov 0.0  }
  0x1b   : > { %1113 = vmatpush1.bf16.msra.mxu0 %v1112_v5 }
  0x1c   : > { %1114 = vmatprep.subr.bf16.mxu0 %v1208_v0 }
  0x1d   : > { %272 = vrot.lane.b32.xlu1 %v243_v2, %s1212_s27  ;;  %270 = vrot.lane.b32.xlu0 %v242_v1, %s1212_s27 }
  0x21   : > { %284 = vrot.lane.b32.xlu1 %v243_v2, %s1213_s28  ;;  %282 = vrot.lane.b32.xlu0 %v242_v1, %s1213_s28 }
  0x25   : > { %296 = vrot.lane.b32.xlu1 %v243_v2, %s1214_s29  ;;  %294 = vrot.lane.b32.xlu0 %v242_v1, %s1214_s29 }
  0x29   : > { %308 = vrot.lane.b32.xlu1 %v243_v2, %s1215_s30  ;;  %306 = vrot.lane.b32.xlu0 %v242_v1, %s1215_s30 }
  0x2d   : > { %320 = vrot.lane.b32.xlu1 %v243_v2, %s1216_s6  ;;  %318 = vrot.lane.b32.xlu0 %v242_v1, %s1216_s6 }
  0x31   : > { %363 = vperm.xlu1 %1199, %v353_v7   ;;  %358 = vperm.xlu0 %1198, %v352_v8  }
  0x35   : > { %368 = vperm.xlu1 %1199, %v354_v10   ;;  %373 = vperm.xlu0 %1198, %v355_v11  }
  0x83   : > { %v247_v12 = vpop.permute.xlu1 %246  ;;  %v235_v13 = vpop.permute.xlu0 %234 }
  0x84   : > { %252 = vst.msk [vmem:[#allocation2 + $0x20] sm:$0xff] %vm227_vm0, %v247_v12  ;;  %240 = vst.msk [vmem:[#allocation2 + $0x10] sm:$0xff] %vm227_vm0, %v235_v13 }
  0x87   : > { %v249_v14 = vpop.permute.xlu1 %248  ;;  %v237_v15 = vpop.permute.xlu0 %236 }
  0x88   : > { %253 = vst.msk [vmem:[#allocation2 + $0x28] sm:$0xff] %vm227_vm0, %v249_v14  ;;  %241 = vst.msk [vmem:[#allocation2 + $0x18] sm:$0xff] %vm227_vm0, %v237_v15 }
  0x8b   : > { %v261_v16 = vpop.permute.xlu1 %260  ;;  %v259_v17 = vpop.permute.xlu0 %258  ;;  %v336_v18 = vld [vmem:[#allocation2 + $0x10] sm:$0xff]  ;;  %v338_v23 = vld [vmem:[#allocation2 + $0x20] sm:$0xff] }
  0x8c   : > { %265 = vst.msk [vmem:[#allocation2 + $0x38] sm:$0xff] %vm227_vm0, %v261_v16  ;;  %264 = vst.msk [vmem:[#allocation2 + $0x30] sm:$0xff] %vm227_vm0, %v259_v17 }
  0x8f   : > { %v337_v19 = vld [vmem:[#allocation2 + $0x18] sm:$0xff]  ;;  %v273_v20 = vpop.permute.xlu1 %272  ;;  %v271_v21 = vpop.permute.xlu0 %270  ;;  %v339_v24 = vld [vmem:[#allocation2 + $0x28] sm:$0xff] }
  0x90   : > { %v1115_v22 = vpack.c.bf16 %v337_v19, %v336_v18  ;;  %277 = vst.msk [vmem:[#allocation2 + $0x48] sm:$0xff] %vm227_vm0, %v273_v20  ;;  %276 = vst.msk [vmem:[#allocation2 + $0x40] sm:$0xff] %vm227_vm0, %v271_v21  ;;  %v1118_v29 = vpack.c.bf16 %v339_v24, %v338_v23  ;;  %v689_v20 = vld [vmem:[%s1495_s3 + $0x8] sm:$0xff]  ;;  %v736_v21 = vld [vmem:[%s1496_s4] sm:$0xff] }
  0x91   : > { %837 = vmatprep.mubr.f32.mxu1 %v689_v20  ;;  %v738_v23 = vld [vmem:[%s1496_s4 + $0x10] sm:$0xff]  ;;  %v739_v24 = vld [vmem:[%s1496_s4 + $0x18] sm:$0xff] }
  0x92   : > { %1116 = vmatpush1.bf16.msra.mxu0 %v1115_v22  ;;  %v737_v22 = vld [vmem:[%s1496_s4 + $0x8] sm:$0xff] }
  0x93   : > { %1117 = vmatprep.subr.bf16.mxu0 %v1208_v0  ;;  %v285_v25 = vpop.permute.xlu1 %284  ;;  %v283_v26 = vpop.permute.xlu0 %282  ;;  %v340_v27 = vld [vmem:[#allocation2 + $0x30] sm:$0xff]  ;;  %v341_v28 = vld [vmem:[#allocation2 + $0x38] sm:$0xff] }
  0x94   : > { %289 = vst.msk [vmem:[#allocation2 + $0x58] sm:$0xff] %vm227_vm0, %v285_v25  ;;  %288 = vst.msk [vmem:[#allocation2 + $0x50] sm:$0xff] %vm227_vm0, %v283_v26  ;;  %v1121_v30 = vpack.c.bf16 %v341_v28, %v340_v27 }
  0x96   : > { %1119 = vmatpush1.bf16.msra.mxu0 %v1118_v29 }
  0x97   : > { %1120 = vmatprep.subr.bf16.mxu0 %v1208_v0  ;;  %v297_v31 = vpop.permute.xlu1 %296  ;;  %v295_v32 = vpop.permute.xlu0 %294  ;;  %v342_v33 = vld [vmem:[#allocation2 + $0x40] sm:$0xff]  ;;  %v343_v34 = vld [vmem:[#allocation2 + $0x48] sm:$0xff] }
  0x98   : > { %301 = vst.msk [vmem:[#allocation2 + $0x68] sm:$0xff] %vm227_vm0, %v297_v31  ;;  %300 = vst.msk [vmem:[#allocation2 + $0x60] sm:$0xff] %vm227_vm0, %v295_v32  ;;  %v1124_v35 = vpack.c.bf16 %v343_v34, %v342_v33 }
  0x9a   : > { %1122 = vmatpush1.bf16.msra.mxu0 %v1121_v30 }
  0x9b   : > { %1123 = vmatprep.subr.bf16.mxu0 %v1208_v0  ;;  %v309_v36 = vpop.permute.xlu1 %308  ;;  %v307_v37 = vpop.permute.xlu0 %306  ;;  %v344_v38 = vld [vmem:[#allocation2 + $0x50] sm:$0xff]  ;;  %v345_v39 = vld [vmem:[#allocation2 + $0x58] sm:$0xff] }
  0x9c   : > { %313 = vst.msk [vmem:[#allocation2 + $0x78] sm:$0xff] %vm227_vm0, %v309_v36  ;;  %312 = vst.msk [vmem:[#allocation2 + $0x70] sm:$0xff] %vm227_vm0, %v307_v37  ;;  %v1127_v40 = vpack.c.bf16 %v345_v39, %v344_v38 }
  0x9e   : > { %1125 = vmatpush1.bf16.msra.mxu0 %v1124_v35 }
  0x9f   : > { %1126 = vmatprep.subr.bf16.mxu0 %v1208_v0  ;;  %v321_v41 = vpop.permute.xlu1 %320  ;;  %v319_v42 = vpop.permute.xlu0 %318  ;;  %v346_v43 = vld [vmem:[#allocation2 + $0x60] sm:$0xff]  ;;  %v347_v44 = vld [vmem:[#allocation2 + $0x68] sm:$0xff] }
  0xa0   : > { %325 = vst.msk [vmem:[#allocation2 + $0x88] sm:$0xff] %vm227_vm0, %v321_v41  ;;  %324 = vst.msk [vmem:[#allocation2 + $0x80] sm:$0xff] %vm227_vm0, %v319_v42  ;;  %v1130_v45 = vpack.c.bf16 %v347_v44, %v346_v43 }
  0xa2   : > { %1128 = vmatpush1.bf16.msra.mxu0 %v1127_v40 }
  0xa3   : > { %1129 = vmatprep.subr.bf16.mxu0 %v1208_v0  ;;  %v348_v46 = vld [vmem:[#allocation2 + $0x70] sm:$0xff]  ;;  %v349_v47 = vld [vmem:[#allocation2 + $0x78] sm:$0xff] }
  0xa4   : > { %v1133_v48 = vpack.c.bf16 %v349_v47, %v348_v46 }
  0xa6   : > { %1131 = vmatpush1.bf16.msra.mxu0 %v1130_v45 }
  0xa7   : > { %1132 = vmatprep.subr.bf16.mxu0 %v1208_v0  ;;  %v350_v49 = vld [vmem:[#allocation2 + $0x80] sm:$0xff]  ;;  %v351_v50 = vld [vmem:[#allocation2 + $0x88] sm:$0xff] }
  0xa8   : > { %v1136_v51 = vpack.c.bf16 %v351_v50, %v350_v49 }
  0xaa   : > { %1134 = vmatpush1.bf16.msra.mxu0 %v1133_v48 }
  0xab   : > { %1135 = vmatprep.subr.bf16.mxu0 %v1208_v0 }
  0xae   : > { %1137 = vmatpush1.bf16.msra.mxu0 %v1136_v51 }
  0xb0   : > { %v359_v59 = vpop.permute.xlu0 %358  ;;  %v364_v63 = vpop.permute.xlu1 %363 }
  0xb1   : > { %454 = vmatmul.mubr.f32.vlgmr.msra.gmra.mrb[0].mxu0 %v326_v52 }
  0xb2   : > { %1034 = vmatprep.mubr.msk.f32.mxu0 %vm376_vm1, %v329_v53 }
  0xb4   : > { %v369_v6 = vpop.permute.xlu1 %368  ;;  %v374_v11 = vpop.permute.xlu0 %373 }
  0xb5   : > { %459 = vmatmul.mubr.f32.gmra.mrb[2].mxu0 %v328_v54 }
  0xb6   : > { %1035 = vmatprep.mubr.msk.f32.mxu0 %vm376_vm1, %v331_v55 }
  0xb9   : > { %464 = vmatmul.mubr.f32.gmra.mrb[4].mxu0 %v330_v56 }
  0xba   : > { %1036 = vmatprep.mubr.msk.f32.mxu0 %vm376_vm1, %v333_v57 }
  0xbd   : > { %469 = vmatmul.mubr.f32.gmra.mrb[6].mxu0 %v332_v58 }
 0x184   : > { %v455_v60 = vpop.f32.mrb[0].mxu0 }
 0x185   : > { %v456_v61 = vadd.f32 %v455_v60, %v359_v59  ;;  %v457_v62 = vpop.f32.mrb[1].mxu0 }
 0x187   : > { %v474_v0 = vmax.f32 %v456_v61, 0.0 }
 0x188   : > { %v460_v1 = vpop.f32.mrb[2].mxu0 }
 0x189   : > { %478 = vst.msk [vmem:[#allocation3] sm:$0xff] %vm227_vm0, %v474_v0  ;;  %v461_v2 = vadd.f32 %v460_v1, %v364_v63  ;;  %v462_v3 = vpop.f32.mrb[3].mxu0 }
 0x18a   : > { %483 = vst.msk [vmem:[#allocation3] sm:$0xff] %vm482_vm2, %v1218_v4 }
 0x18b   : > { %v475_v5 = vmax.f32 %v461_v2, 0.0 }
 0x18c   : > { %v465_v7 = vpop.f32.mrb[4].mxu0 }
 0x18d   : > { %479 = vst.msk [vmem:[#allocation3 + $0x8] sm:$0xff] %vm227_vm0, %v475_v5  ;;  %v466_v8 = vadd.f32 %v465_v7, %v369_v6  ;;  %v467_v9 = vpop.f32.mrb[5].mxu0 }
 0x18e   : > { %484 = vst.msk [vmem:[#allocation3 + $0x8] sm:$0xff] %vm482_vm2, %v1218_v4 }
 0x18f   : > { %v476_v10 = vmax.f32 %v466_v8, 0.0 }
 0x190   : > { %v470_v12 = vpop.f32.mrb[6].mxu0 }
 0x191   : > { %480 = vst.msk [vmem:[#allocation3 + $0x10] sm:$0xff] %vm227_vm0, %v476_v10  ;;  %v471_v13 = vadd.f32 %v470_v12, %v374_v11  ;;  %v568_v14 = vld [vmem:[#allocation3] sm:$0xff]  ;;  %v472_v15 = vpop.f32.mrb[7].mxu0 }
 0x192   : > { %485 = vst.msk [vmem:[#allocation3 + $0x10] sm:$0xff] %vm482_vm2, %v1218_v4  ;;  %576 = vrot.lane.b32.xlu1 %v568_v14, %s1212_s27 }
 0x193   : > { %492 = vst.msk [vmem:[#allocation4] sm:$0xff] %vm491_vm3, %v568_v14  ;;  %v477_v16 = vmax.f32 %v471_v13, 0.0 }
 0x195   : > { %481 = vst.msk [vmem:[#allocation3 + $0x18] sm:$0xff] %vm227_vm0, %v477_v16  ;;  %v569_v17 = vld [vmem:[#allocation3 + $0x8] sm:$0xff] }
 0x196   : > { %486 = vst.msk [vmem:[#allocation3 + $0x18] sm:$0xff] %vm482_vm2, %v1218_v4  ;;  %578 = vrot.lane.b32.xlu0 %v569_v17, %s1212_s27  ;;  %600 = vrot.lane.b32.xlu1 %v568_v14, %s1213_s28 }
 0x197   : > { %493 = vst.msk [vmem:[#allocation4 + $0x8] sm:$0xff] %vm491_vm3, %v569_v17 }
 0x199   : > { %v489_v18 = vld [vmem:[#allocation3 + $0x10] sm:$0xff] }
 0x19a   : > { %602 = vrot.lane.b32.xlu0 %v569_v17, %s1213_s28  ;;  %504 = vrot.lane.b32.xlu1 %v568_v14, %s1210_s25  ;;  %494 = vst.msk [vmem:[#allocation4 + $0x10] sm:$0xff] %vm491_vm3, %v489_v18  ;;  %v700_v30 = vld [vmem:[#allocation4] sm:$0xff] }
 0x19d   : > { %v490_v19 = vld [vmem:[#allocation3 + $0x18] sm:$0xff] }
 0x19e   : > { %506 = vrot.lane.b32.xlu0 %v569_v17, %s1210_s25  ;;  %624 = vrot.lane.b32.xlu1 %v568_v14, %s1214_s29  ;;  %495 = vst.msk [vmem:[#allocation4 + $0x18] sm:$0xff] %vm491_vm3, %v490_v19  ;;  %v701_v31 = vld [vmem:[#allocation4 + $0x8] sm:$0xff] }
 0x19f   : > { %v1140_v36 = vpack.c.bf16 %v701_v31, %v700_v30 }
 0x1a1   : > { %v702_v48 = vld [vmem:[#allocation4 + $0x10] sm:$0xff] }
 0x1a2   : > { %626 = vrot.lane.b32.xlu0 %v569_v17, %s1214_s29  ;;  %528 = vrot.lane.b32.xlu1 %v568_v14, %s1209_s24 }
 0x1a5   : > { %v703_v49 = vld [vmem:[#allocation4 + $0x18] sm:$0xff] }
 0x1a6   : > { %530 = vrot.lane.b32.xlu0 %v569_v17, %s1209_s24  ;;  %648 = vrot.lane.b32.xlu1 %v568_v14, %s1215_s30  ;;  %v1144_v54 = vpack.c.bf16 %v703_v49, %v702_v48  ;;  %v695_v48 = vld [vmem:[%s1495_s3 + $0x38] sm:$0xff] }
 0x1aa   : > { %650 = vrot.lane.b32.xlu0 %v569_v17, %s1215_s30  ;;  %580 = vrot.lane.b32.xlu1 %v489_v18, %s1212_s27 }
 0x1ae   : > { %582 = vrot.lane.b32.xlu0 %v490_v19, %s1212_s27  ;;  %552 = vrot.lane.b32.xlu1 %v568_v14, %s1211_s26 }
 0x1b2   : > { %554 = vrot.lane.b32.xlu0 %v569_v17, %s1211_s26  ;;  %604 = vrot.lane.b32.xlu1 %v489_v18, %s1213_s28 }
 0x1b6   : > { %606 = vrot.lane.b32.xlu0 %v490_v19, %s1213_s28  ;;  %508 = vrot.lane.b32.xlu1 %v489_v18, %s1210_s25 }
 0x1ba   : > { %510 = vrot.lane.b32.xlu0 %v490_v19, %s1210_s25  ;;  %628 = vrot.lane.b32.xlu1 %v489_v18, %s1214_s29 }
 0x1be   : > { %630 = vrot.lane.b32.xlu0 %v490_v19, %s1214_s29  ;;  %532 = vrot.lane.b32.xlu1 %v489_v18, %s1209_s24 }
 0x1c2   : > { %534 = vrot.lane.b32.xlu0 %v490_v19, %s1209_s24  ;;  %652 = vrot.lane.b32.xlu1 %v489_v18, %s1215_s30 }
 0x1c6   : > { %654 = vrot.lane.b32.xlu0 %v490_v19, %s1215_s30  ;;  %556 = vrot.lane.b32.xlu1 %v489_v18, %s1211_s26 }
 0x1ca   : > { %558 = vrot.lane.b32.xlu0 %v490_v19, %s1211_s26  ;;  %672 = vrot.lane.b32.xlu1 %v568_v14, %s1216_s6 }
 0x1ce   : > { %674 = vrot.lane.b32.xlu0 %v569_v17, %s1216_s6  ;;  %676 = vrot.lane.b32.xlu1 %v489_v18, %s1216_s6 }
 0x1d2   : > { %678 = vrot.lane.b32.xlu0 %v490_v19, %s1216_s6  ;;  %742 = vperm.xlu1 %1199, %v736_v21  }
 0x1d6   : > { %747 = vperm.xlu0 %1198, %v737_v22   ;;  %752 = vperm.xlu1 %1199, %v738_v23  }
 0x1da   : > { %757 = vperm.xlu0 %1198, %v739_v24  }
 0x204   : > { %v577_v25 = vpop.permute.xlu1 %576 }
 0x205   : > { %588 = vst.msk [vmem:[#allocation4 + $0x80] sm:$0xff] %vm491_vm3, %v577_v25 }
 0x208   : > { %v579_v26 = vpop.permute.xlu0 %578  ;;  %v601_v27 = vpop.permute.xlu1 %600 }
 0x209   : > { %589 = vst.msk [vmem:[#allocation4 + $0x88] sm:$0xff] %vm491_vm3, %v579_v26  ;;  %612 = vst.msk [vmem:[#allocation4 + $0xa0] sm:$0xff] %vm491_vm3, %v601_v27 }
 0x20c   : > { %v603_v28 = vpop.permute.xlu0 %602  ;;  %v505_v29 = vpop.permute.xlu1 %504  ;;  %v716_v32 = vld [vmem:[#allocation4 + $0x80] sm:$0xff] }
 0x20d   : > { %613 = vst.msk [vmem:[#allocation4 + $0xa8] sm:$0xff] %vm491_vm3, %v603_v28  ;;  %516 = vst.msk [vmem:[#allocation4 + $0x20] sm:$0xff] %vm491_vm3, %v505_v29 }
 0x210   : > { %v507_v33 = vpop.permute.xlu0 %506  ;;  %v717_v34 = vld [vmem:[#allocation4 + $0x88] sm:$0xff]  ;;  %v625_v35 = vpop.permute.xlu1 %624  ;;  %v720_v55 = vld [vmem:[#allocation4 + $0xa0] sm:$0xff] }
 0x211   : > { %517 = vst.msk [vmem:[#allocation4 + $0x28] sm:$0xff] %vm491_vm3, %v507_v33  ;;  %v1138_v37 = vpack.c.bf16 %v717_v34, %v716_v32  ;;  %636 = vst.msk [vmem:[#allocation4 + $0xc0] sm:$0xff] %vm491_vm3, %v625_v35 }
 0x213   : > { %1139 = vmatprep.subr.bf16.mxu1 %v1138_v37 }
 0x214   : > { %v627_v38 = vpop.permute.xlu0 %626  ;;  %v529_v39 = vpop.permute.xlu1 %528  ;;  %1141 = vmatpush3.bf16.msra.mxu1 %v1140_v36  ;;  %v721_v56 = vld [vmem:[#allocation4 + $0xa8] sm:$0xff]  ;;  %v704_v59 = vld [vmem:[#allocation4 + $0x20] sm:$0xff] }
 0x215   : > { %637 = vst.msk [vmem:[#allocation4 + $0xc8] sm:$0xff] %vm491_vm3, %v627_v38  ;;  %540 = vst.msk [vmem:[#allocation4 + $0x40] sm:$0xff] %vm491_vm3, %v529_v39  ;;  %v1146_v58 = vpack.c.bf16 %v721_v56, %v720_v55  ;;  %v693_v55 = vld [vmem:[%s1495_s3 + $0x28] sm:$0xff]  ;;  %v696_v56 = vld [vmem:[%s1495_s3 + $0x40] sm:$0xff] }
 0x218   : > { %v531_v40 = vpop.permute.xlu0 %530  ;;  %v649_v41 = vpop.permute.xlu1 %648  ;;  %v705_v60 = vld [vmem:[#allocation4 + $0x28] sm:$0xff]  ;;  %v724_v6 = vld [vmem:[#allocation4 + $0xc0] sm:$0xff] }
 0x219   : > { %541 = vst.msk [vmem:[#allocation4 + $0x48] sm:$0xff] %vm491_vm3, %v531_v40  ;;  %660 = vst.msk [vmem:[#allocation4 + $0xe0] sm:$0xff] %vm491_vm3, %v649_v41  ;;  %v1148_v63 = vpack.c.bf16 %v705_v60, %v704_v59 }
 0x21c   : > { %v651_v42 = vpop.permute.xlu0 %650  ;;  %v581_v43 = vpop.permute.xlu1 %580  ;;  %v725_v7 = vld [vmem:[#allocation4 + $0xc8] sm:$0xff]  ;;  %v708_v13 = vld [vmem:[#allocation4 + $0x40] sm:$0xff] }
 0x21d   : > { %661 = vst.msk [vmem:[#allocation4 + $0xe8] sm:$0xff] %vm491_vm3, %v651_v42  ;;  %590 = vst.msk [vmem:[#allocation4 + $0x90] sm:$0xff] %vm491_vm3, %v581_v43  ;;  %v1154_v12 = vpack.c.bf16 %v725_v7, %v724_v6  ;;  %v688_v42 = vld [vmem:[%s1495_s3] sm:$0xff] }
 0x220   : > { %v583_v44 = vpop.permute.xlu0 %582  ;;  %v553_v45 = vpop.permute.xlu1 %552  ;;  %v709_v14 = vld [vmem:[#allocation4 + $0x48] sm:$0xff]  ;;  %v728_v22 = vld [vmem:[#allocation4 + $0xe0] sm:$0xff] }
 0x221   : > { %591 = vst.msk [vmem:[#allocation4 + $0x98] sm:$0xff] %vm491_vm3, %v583_v44  ;;  %564 = vst.msk [vmem:[#allocation4 + $0x60] sm:$0xff] %vm491_vm3, %v553_v45  ;;  %v1156_v19 = vpack.c.bf16 %v709_v14, %v708_v13  ;;  %v692_v44 = vld [vmem:[%s1495_s3 + $0x20] sm:$0xff] }
 0x224   : > { %v555_v46 = vpop.permute.xlu0 %554  ;;  %v605_v47 = vpop.permute.xlu1 %604  ;;  %v718_v50 = vld [vmem:[#allocation4 + $0x90] sm:$0xff]  ;;  %v729_v23 = vld [vmem:[#allocation4 + $0xe8] sm:$0xff] }
 0x225   : > { %565 = vst.msk [vmem:[#allocation4 + $0x68] sm:$0xff] %vm491_vm3, %v555_v46  ;;  %614 = vst.msk [vmem:[#allocation4 + $0xb0] sm:$0xff] %vm491_vm3, %v605_v47  ;;  %v1162_v28 = vpack.c.bf16 %v729_v23, %v728_v22  ;;  %v691_v47 = vld [vmem:[%s1495_s3 + $0x18] sm:$0xff] }
 0x228   : > { %v607_v51 = vpop.permute.xlu0 %606  ;;  %v719_v52 = vld [vmem:[#allocation4 + $0x98] sm:$0xff]  ;;  %v509_v53 = vpop.permute.xlu1 %508  ;;  %v712_v29 = vld [vmem:[#allocation4 + $0x60] sm:$0xff] }
 0x229   : > { %615 = vst.msk [vmem:[#allocation4 + $0xb8] sm:$0xff] %vm491_vm3, %v607_v51  ;;  %v1142_v57 = vpack.c.bf16 %v719_v52, %v718_v50  ;;  %518 = vst.msk [vmem:[#allocation4 + $0x30] sm:$0xff] %vm491_vm3, %v509_v53  ;;  %v694_v51 = vld [vmem:[%s1495_s3 + $0x30] sm:$0xff]  ;;  %v697_v53 = vld [vmem:[%s1495_s3 + $0x48] sm:$0xff] }
 0x22a   : > { %v698_v52 = vld [vmem:[%s1495_s3 + $0x50] sm:$0xff] }
 0x22b   : > { %1143 = vmatprep.subr.bf16.mxu1 %v1142_v57  ;;  %v699_v57 = vld [vmem:[%s1495_s3 + $0x58] sm:$0xff] }
 0x22c   : > { %v511_v61 = vpop.permute.xlu0 %510  ;;  %1145 = vmatpush3.bf16.msra.mxu1 %v1144_v54  ;;  %v629_v62 = vpop.permute.xlu1 %628  ;;  %v722_v0 = vld [vmem:[#allocation4 + $0xb0] sm:$0xff]  ;;  %v713_v30 = vld [vmem:[#allocation4 + $0x68] sm:$0xff]  ;;  %v690_v54 = vld [vmem:[%s1495_s3 + $0x10] sm:$0xff] }
 0x22d   : > { %519 = vst.msk [vmem:[#allocation4 + $0x38] sm:$0xff] %vm491_vm3, %v511_v61  ;;  %1147 = vmatprep.subr.bf16.mxu1 %v1146_v58  ;;  %638 = vst.msk [vmem:[#allocation4 + $0xd0] sm:$0xff] %vm491_vm3, %v629_v62  ;;  %v1164_v35 = vpack.c.bf16 %v713_v30, %v712_v29 }
 0x230   : > { %v631_v1 = vpop.permute.xlu0 %630  ;;  %1149 = vmatpush3.bf16.msra.mxu1 %v1148_v63  ;;  %v723_v2 = vld [vmem:[#allocation4 + $0xb8] sm:$0xff]  ;;  %v533_v3 = vpop.permute.xlu1 %532  ;;  %v706_v5 = vld [vmem:[#allocation4 + $0x30] sm:$0xff] }
 0x231   : > { %639 = vst.msk [vmem:[#allocation4 + $0xd8] sm:$0xff] %vm491_vm3, %v631_v1  ;;  %v1150_v4 = vpack.c.bf16 %v723_v2, %v722_v0  ;;  %542 = vst.msk [vmem:[#allocation4 + $0x50] sm:$0xff] %vm491_vm3, %v533_v3 }
 0x233   : > { %1151 = vmatprep.subr.bf16.mxu1 %v1150_v4 }
 0x234   : > { %v535_v8 = vpop.permute.xlu0 %534  ;;  %v707_v9 = vld [vmem:[#allocation4 + $0x38] sm:$0xff]  ;;  %v653_v10 = vpop.permute.xlu1 %652  ;;  %v726_v15 = vld [vmem:[#allocation4 + $0xd0] sm:$0xff] }
 0x235   : > { %543 = vst.msk [vmem:[#allocation4 + $0x58] sm:$0xff] %vm491_vm3, %v535_v8  ;;  %v1152_v11 = vpack.c.bf16 %v707_v9, %v706_v5  ;;  %662 = vst.msk [vmem:[#allocation4 + $0xf0] sm:$0xff] %vm491_vm3, %v653_v10 }
 0x237   : > { %1153 = vmatpush3.bf16.msra.mxu1 %v1152_v11 }
 0x238   : > { %v655_v16 = vpop.permute.xlu0 %654  ;;  %1155 = vmatprep.subr.bf16.mxu1 %v1154_v12  ;;  %v557_v17 = vpop.permute.xlu1 %556  ;;  %v727_v18 = vld [vmem:[#allocation4 + $0xd8] sm:$0xff]  ;;  %v710_v21 = vld [vmem:[#allocation4 + $0x50] sm:$0xff] }
 0x239   : > { %663 = vst.msk [vmem:[#allocation4 + $0xf8] sm:$0xff] %vm491_vm3, %v655_v16  ;;  %566 = vst.msk [vmem:[#allocation4 + $0x70] sm:$0xff] %vm491_vm3, %v557_v17  ;;  %v1158_v20 = vpack.c.bf16 %v727_v18, %v726_v15 }
 0x23b   : > { %1157 = vmatpush3.bf16.msra.mxu1 %v1156_v19 }
 0x23c   : > { %v559_v24 = vpop.permute.xlu0 %558  ;;  %1159 = vmatprep.subr.bf16.mxu1 %v1158_v20  ;;  %v711_v25 = vld [vmem:[#allocation4 + $0x58] sm:$0xff]  ;;  %v673_v26 = vpop.permute.xlu1 %672  ;;  %v730_v31 = vld [vmem:[#allocation4 + $0xf0] sm:$0xff] }
 0x23d   : > { %567 = vst.msk [vmem:[#allocation4 + $0x78] sm:$0xff] %vm491_vm3, %v559_v24  ;;  %v1160_v27 = vpack.c.bf16 %v711_v25, %v710_v21  ;;  %684 = vst.msk [vmem:[#allocation4 + $0x100] sm:$0xff] %vm491_vm3, %v673_v26 }
 0x23f   : > { %1161 = vmatpush3.bf16.msra.mxu1 %v1160_v27 }
 0x240   : > { %v675_v32 = vpop.permute.xlu0 %674  ;;  %1163 = vmatprep.subr.bf16.mxu1 %v1162_v28  ;;  %v731_v33 = vld [vmem:[#allocation4 + $0xf8] sm:$0xff]  ;;  %v677_v34 = vpop.permute.xlu1 %676  ;;  %v714_v37 = vld [vmem:[#allocation4 + $0x70] sm:$0xff] }
 0x241   : > { %685 = vst.msk [vmem:[#allocation4 + $0x108] sm:$0xff] %vm491_vm3, %v675_v32  ;;  %v1166_v36 = vpack.c.bf16 %v731_v33, %v730_v31  ;;  %686 = vst.msk [vmem:[#allocation4 + $0x110] sm:$0xff] %vm491_vm3, %v677_v34 }
 0x243   : > { %1165 = vmatpush3.bf16.msra.mxu1 %v1164_v35 }
 0x244   : > { %1167 = vmatprep.subr.bf16.mxu1 %v1166_v36  ;;  %v679_v38 = vpop.permute.xlu0 %678  ;;  %v715_v39 = vld [vmem:[#allocation4 + $0x78] sm:$0xff]  ;;  %v732_v41 = vld [vmem:[#allocation4 + $0x100] sm:$0xff] }
 0x245   : > { %687 = vst.msk [vmem:[#allocation4 + $0x118] sm:$0xff] %vm491_vm3, %v679_v38  ;;  %v1168_v40 = vpack.c.bf16 %v715_v39, %v714_v37 }
 0x247   : > { %1169 = vmatpush3.bf16.msra.mxu1 %v1168_v40 }
 0x248   : > { %v733_v43 = vld [vmem:[#allocation4 + $0x108] sm:$0xff]  ;;  %v734_v46 = vld [vmem:[#allocation4 + $0x110] sm:$0xff] }
 0x249   : > { %v1170_v45 = vpack.c.bf16 %v733_v43, %v732_v41 }
 0x24a   : > { %838 = vmatmul.mubr.f32.vlgmr.msra.gmra.mrb[0].mxu1 %v688_v42 }
 0x24b   : > { %1171 = vmatprep.subr.bf16.mxu1 %v1170_v45  ;;  %842 = vmatprep.mubr.f32.mxu1 %v692_v44 }
 0x24c   : > { %1173 = vmatpush3.bf16.msra.mxu1 %v1170_v45  ;;  %v735_v49 = vld [vmem:[#allocation4 + $0x118] sm:$0xff] }
 0x24d   : > { %v1174_v50 = vpack.c.bf16 %v735_v49, %v734_v46 }
 0x24e   : > { %843 = vmatmul.mubr.f32.gmra.mrb[2].mxu1 %v691_v47 }
 0x24f   : > { %847 = vmatprep.mubr.f32.mxu1 %v695_v48  ;;  %1175 = vmatprep.subr.bf16.mxu1 %v1174_v50 }
 0x250   : > { %1177 = vmatpush3.bf16.msra.mxu1 %v1174_v50 }
 0x251   : > { %v743_v5 = vpop.permute.xlu1 %742 }
 0x252   : > { %848 = vmatmul.mubr.f32.gmra.mrb[4].mxu1 %v694_v51 }
 0x253   : > { %852 = vmatprep.mubr.f32.mxu1 %v698_v52 }
 0x255   : > { %v748_v3 = vpop.permute.xlu0 %747  ;;  %v753_v15 = vpop.permute.xlu1 %752 }
 0x256   : > { %853 = vmatmul.mubr.f32.gmra.mrb[6].mxu1 %v697_v53 }
 0x257   : > { %1105 = vmatprep.mubr.msk.f32.mxu1 %vm760_vm4, %v690_v54 }
 0x259   : > { %v758_v13 = vpop.permute.xlu0 %757 }
 0x25a   : > { %1106 = vmatmul.mubr.msk.f32.vlgmr.msra.gmra.mrb[8].mxu1 %vm760_vm4, %v693_v55 }
 0x25b   : > { %1108 = vmatprep.mubr.msk.f32.mxu1 %vm760_vm4, %v696_v56 }
 0x25e   : > { %1109 = vmatmul.mubr.msk.f32.gmra.mrb[10].mxu1 %vm760_vm4, %v699_v57 }
 0x31d   : > { %v1077_v58 = vpop.f32.mrb[0].mxu1 }
 0x31e   : > { %v1078_v59 = vpop.f32.mrb[1].mxu1 }
 0x31f   : > { %v1079_v60 = vadd.f32 %v1078_v59, %v1077_v58 }
 0x321   : > { %v1080_v61 = vpop.f32.mrb[2].mxu1  ;;  %v840_v10 = vadd.f32 %v1079_v60, %v743_v5 }
 0x322   : > { %v1081_v62 = vpop.f32.mrb[3].mxu1 }
 0x323   : > { %v1082_v63 = vadd.f32 %v1081_v62, %v1080_v61 }
 0x325   : > { %v1083_v0 = vpop.f32.mrb[4].mxu1  ;;  %v845_v8 = vadd.f32 %v1082_v63, %v748_v3 }
 0x326   : > { %v1084_v1 = vpop.f32.mrb[5].mxu1 }
 0x327   : > { %v1085_v2 = vadd.f32 %v1084_v1, %v1083_v0 }
 0x329   : > { %v1086_v4 = vpop.f32.mrb[6].mxu1  ;;  %v850_v18 = vadd.f32 %v1085_v2, %v753_v15 }
 0x32a   : > { %v1087_v6 = vpop.f32.mrb[7].mxu1 }
 0x32b   : > { %v1088_v7 = vadd.f32 %v1087_v6, %v1086_v4 }
 0x32d   : > { %v1107_v9 = vpop.f32.mrb[8].mxu1  ;;  %v855_v16 = vadd.f32 %v1088_v7, %v758_v13 }
 0x32e   : > { %v930_v11 = vadd.f32 %v1107_v9, %v845_v8  ;;  %v924_v12 = vpop.f32.mrb[9].mxu1 }
 0x32f   : > { %v925_v14 = vadd.f32 %v924_v12, %v840_v10 }
 0x330   : > { %945 = vst.msk [vmem:[%s1475_s22 + $0x8] sm:$0xff] %vm943_vm5, %v930_v11  ;;  %954 = vrot.lane.b32.xlu0 %v930_v11, %s1219_s19 }
 0x331   : > { %944 = vst.msk [vmem:[%s1475_s22] sm:$0xff] %vm943_vm5, %v925_v14  ;;  %v1110_v17 = vpop.f32.mrb[10].mxu1  ;;  %952 = vrot.lane.b32.xlu1 %v925_v14, %s1219_s19 }
 0x332   : > { %v940_v19 = vadd.f32 %v1110_v17, %v855_v16  ;;  %v934_v20 = vpop.f32.mrb[11].mxu1 }
 0x333   : > { %v935_v21 = vadd.f32 %v934_v20, %v850_v18 }
 0x334   : > { %947 = vst.msk [vmem:[%s1475_s22 + $0x18] sm:$0xff] %vm943_vm5, %v940_v19  ;;  %958 = vrot.lane.b32.xlu0 %v940_v19, %s1219_s19 }
 0x335   : > { %946 = vst.msk [vmem:[%s1475_s22 + $0x10] sm:$0xff] %vm943_vm5, %v935_v21  ;;  %956 = vrot.lane.b32.xlu1 %v935_v21, %s1219_s19 }
 0x3a2   : > { %v955_v22 = vpop.permute.xlu0 %954 }
 0x3a3   : > { %966 = vst.msk [vmem:[%s1475_s22 + $0x8] sm:$0xff] %vm964_vm6, %v955_v22  ;;  %v953_v23 = vpop.permute.xlu1 %952 }
 0x3a4   : > { %965 = vst.msk [vmem:[%s1475_s22] sm:$0xff] %vm964_vm6, %v953_v23 }
 0x3a6   : > { %v959_v24 = vpop.permute.xlu0 %958 }
 0x3a7   : > { %968 = vst.msk [vmem:[%s1475_s22 + $0x18] sm:$0xff] %vm964_vm6, %v959_v24  ;;  %v957_v25 = vpop.permute.xlu1 %956 }
 0x3a8   : > { %967 = vst.msk [vmem:[%s1475_s22 + $0x10] sm:$0xff] %vm964_vm6, %v957_v25 }
 0x3a9 PF: > { %s15_s18 = sadd.s32 1, %s1206_s18  }
 0x3aa   : > { %p12_p4 = scmp.ge.s32.totalorder %s15_s18, 4  }
 0x3ac   :  { %14 = sbr.rel (!%p12_p4) target bundleno = 1 (0x1), region = 70 }

</bundles_post_ra>
